<compile_context>
chip_gen: v5e
topology: v5e:2x2
jax: 0.10.0
libtpu: 0.0.40
codegen_flags: <defaults>
</compile_context>

<pallas_src>
import functools

import jax
import jax.numpy as jnp
import numpy as np
from jax.experimental import pallas as pl
from jax.experimental.pallas import tpu as pltpu

# (Cout, conv_kernel, pool_kernel) for the four stages of the torch module.
_CONV_SPECS = ((128, 3, 3), (64, 3, 3), (32, 5, 5), (16, 5, 5))
_FC_SPECS = ((160, 64), (64, 32), (32, 16), (16, 4), (4, 2))
_LANES = 128
_BN_EPS = 1e-5


def _stage_dims(max_length, hidden_size):
    """Static per-stage geometry (Conv1d valid conv, MaxPool1d stride 2)."""
    dims = []
    length, chans = max_length, hidden_size
    for cout, k, p in _CONV_SPECS:
        lconv = length - k + 1
        lm = lconv - p + 1
        lpool = (lm - 1) // 2 + 1
        dims.append(dict(K=k, P=p, Lin=length, Cin=chans, Cout=cout,
                         Lconv=lconv, Lm=lm, Lpool=lpool))
        length, chans = lpool, cout
    return dims


# ----------------------------------------------------------------------------
# Fused decoder kernel: one batch element per grid step, VMEM resident.
# ----------------------------------------------------------------------------
def _decoder_kernel(x_ref,
                    wc1, bc1, wc2, bc2, wc3, bc3, wc4, bc4,
                    fw1, fb1, fw2, fb2, fw3, fb3, fw4, fb4, fw5, fb5,
                    o_ref,
                    xi1, y1, h1, xi2, y2, h2, xi3, y3, h3, xi4, y4, h4,
                    *, dims):

    def stage(hin_ref, d, w_ref, b_ref, xi, y, h):
        K, P, Lin, cin = d
        Lconv = Lin - K + 1
        Lm = Lconv - P + 1
        Lpool = (Lm - 1) // 2 + 1
        # im2col: tap k lives at lane offset k*128 (zero padding when cin<128).
        for k in range(K):
            xi[:, k * _LANES:k * _LANES + cin] = (
                hin_ref[k:k + Lconv, :].astype(jnp.bfloat16))
        # Conv1d + folded BatchNorm: a single MXU matmul, f32 accumulation.
        y[...] = jnp.dot(xi[...], w_ref[...],
                         preferred_element_type=jnp.float32) + b_ref[...]
        # MaxPool1d(P, stride=2): P-1 unstrided shifted maxes (VPU), then one
        # strided sublane subsample.
        m = y[0:Lm, :]
        for p in range(1, P):
            m = jnp.maximum(m, y[p:p + Lm, :])
        y[0:Lm, :] = m
        h[...] = y[pl.ds(0, Lpool, stride=2), :]

    d1, d2, d3, d4 = dims
    # Stage-1 input only fills `hidden_size` of the 128 lanes per tap; zero the
    # padding lanes (uninitialised scratch may hold NaN bit patterns).
    xi1[...] = jnp.zeros_like(xi1)
    stage(x_ref, d1, wc1, bc1, xi1, y1, h1)
    stage(h1, d2, wc2, bc2, xi2, y2, h2)
    stage(h2, d3, wc3, bc3, xi3, y3, h3)
    stage(h3, d4, wc4, bc4, xi4, y4, h4)

    # MLP head.  fc1 contracts the (Lpool4, C4) conv output directly; its
    # weight was pre-permuted to (Lpool4, C4, 64) to reproduce torch's
    # channel-major (B, C, L).view(B, -1) flatten order.
    lpool4, c4 = fw1.shape[0], fw1.shape[1]
    acc = fb1[...]                                        # (1, 64) f32
    for l in range(lpool4):
        acc = acc + jnp.dot(h4[l:l + 1, 0:c4].astype(jnp.bfloat16), fw1[l],
                            preferred_element_type=jnp.float32)
    hh = acc
    for w_ref, b_ref in ((fw2, fb2), (fw3, fb3), (fw4, fb4), (fw5, fb5)):
        hh = jnp.dot(hh, w_ref[...],
                     preferred_element_type=jnp.float32) + b_ref[...]
    o_ref[...] = hh.astype(o_ref.dtype)


def _const_index_map(ndim):
    return lambda b: (0,) * ndim


def decoder_forward(x, conv_kparams, fc_kparams):
    """x: (B, max_length, hidden_size) f32 (the torch input, channels-last).

    conv_kparams: 4 x (w (K*128, 128) bf16, b (1, 128) f32) with BN folded.
    fc_kparams: [(fw1 (L4, C4, 64) bf16, b1 (1,64) f32)] + 4 x ((in,out) f32, b).
    """
    B, L, H = x.shape
    dims = _stage_dims(L, H)
    assert H <= _LANES
    assert fc_kparams[0][0].shape[0] == dims[-1]["Lpool"]
    assert fc_kparams[0][0].shape[1] == dims[-1]["Cout"]

    kdims = tuple((d["K"], d["P"], d["Lin"], (H if i == 0 else _LANES))
                  for i, d in enumerate(dims))
    kernel = functools.partial(_decoder_kernel, dims=kdims)

    flat_params = []
    for w, b in list(conv_kparams) + list(fc_kparams):
        flat_params += [w, b]

    in_specs = [pl.BlockSpec((None, L, H), lambda b: (b, 0, 0))]
    for a in flat_params:
        in_specs.append(pl.BlockSpec(a.shape, _const_index_map(a.ndim)))

    scratch = []
    for d in dims:
        scratch += [
            pltpu.VMEM((d["Lconv"], d["K"] * _LANES), jnp.bfloat16),  # im2col
            pltpu.VMEM((d["Lconv"], _LANES), jnp.float32),            # conv+BN
            pltpu.VMEM((d["Lpool"], _LANES), jnp.float32),            # pooled
        ]

    out = pl.pallas_call(
        kernel,
        out_shape=jax.ShapeDtypeStruct((B, 1, 2), jnp.float32),
        grid_spec=pltpu.PrefetchScalarGridSpec(
            num_scalar_prefetch=0,
            grid=(B,),
            in_specs=in_specs,
            out_specs=pl.BlockSpec((None, 1, 2), lambda b: (b, 0, 0)),
            scratch_shapes=scratch,
        ),
        compiler_params=pltpu.CompilerParams(
            dimension_semantics=("parallel",)),
    )(x, *flat_params)
    return out.reshape(B, 2)


# ----------------------------------------------------------------------------
# Parameter preparation (torch layout -> kernel layout)
# ----------------------------------------------------------------------------
def _fold_conv(w, bias, gamma, beta, mean, var):
    """Fold eval-mode BN into the conv and lay out for the kernel:
    torch (Cout, Cin, K) -> (K*128, 128) bf16, tap k at rows [k*128, k*128+Cin),
    padding rows/cols zero; plus a (1, 128) f32 folded bias."""
    cout, cin, k = w.shape
    assert cin <= _LANES and cout <= _LANES
    s = gamma / jnp.sqrt(var + _BN_EPS)                     # (Cout,)
    wk = jnp.transpose(w, (2, 1, 0)) * s                    # (K, Cin, Cout)
    wp = jnp.zeros((k, _LANES, _LANES), jnp.float32).at[:, :cin, :cout].set(wk)
    bp = jnp.zeros((1, _LANES), jnp.float32).at[0, :cout].set(
        (bias - mean) * s + beta)
    return wp.reshape(k * _LANES, _LANES).astype(jnp.bfloat16), bp


def _prep_fc1(w, bias, lpool, cout):
    """torch fc1 weight (64, lpool*cout) expects channel-major features
    (feature index = c*lpool + l).  Permute to (lpool, cout, 64) so the kernel
    contracts the (L, C) conv output directly (no transpose / flatten)."""
    out_f = w.shape[0]
    g = w.reshape(out_f, cout, lpool)          # [j, c, l]
    g = jnp.transpose(g, (2, 1, 0))            # [l, c, j]
    return g.astype(jnp.bfloat16), bias.reshape(1, out_f).astype(jnp.float32)


def _prep_fc(w, bias):
    return (jnp.transpose(w, (1, 0)).astype(jnp.float32),
            bias.reshape(1, -1).astype(jnp.float32))


# ----------------------------------------------------------------------------
# Synthetic torch-layout parameters (deterministic)
# ----------------------------------------------------------------------------
def _rand_conv(key, cin, cout, k):
    kw, kb, kg, kbeta, km, kv = jax.random.split(key, 6)
    w = jax.random.normal(kw, (cout, cin, k), jnp.float32) / jnp.sqrt(cin * k)
    bias = 0.01 * jax.random.normal(kb, (cout,), jnp.float32)
    gamma = 1.0 + 0.05 * jax.random.normal(kg, (cout,), jnp.float32)
    beta = 0.01 * jax.random.normal(kbeta, (cout,), jnp.float32)
    mean = 0.01 * jax.random.normal(km, (cout,), jnp.float32)
    var = 1.0 + 0.05 * jax.random.uniform(kv, (cout,), jnp.float32)
    return w, bias, gamma, beta, mean, var


def _rand_fc(key, fin, fout):
    kw, kb = jax.random.split(key)
    w = jax.random.normal(kw, (fout, fin), jnp.float32) / jnp.sqrt(fin)
    b = 0.01 * jax.random.normal(kb, (fout,), jnp.float32)
    return w, b


# ----------------------------------------------------------------------------
# Pure-JAX f32 reference (eval-mode BN), for a numerical sanity check
# ----------------------------------------------------------------------------
def _reference_forward(x, torch_conv, torch_fc):
    h = x                                             # (B, L, C) channels-last
    for (w, bias, gamma, beta, mean, var), (_, k, p) in zip(
            torch_conv, _CONV_SPECS):
        lconv = h.shape[1] - k + 1
        wk = jnp.transpose(w, (2, 1, 0))              # (K, Cin, Cout)
        y = bias + sum(
            jnp.einsum("blc,cd->bld", h[:, q:q + lconv, :], wk[q])
            for q in range(k))
        s = gamma / jnp.sqrt(var + _BN_EPS)
        y = (y - mean) * s + beta
        lm = lconv - p + 1
        m = y[:, 0:lm, :]
        for q in range(1, p):
            m = jnp.maximum(m, y[:, q:q + lm, :])
        h = m[:, ::2, :]
    bsz = h.shape[0]
    feat = jnp.transpose(h, (0, 2, 1)).reshape(bsz, -1)   # torch .view(B, -1)
    for w, b in torch_fc:
        feat = feat @ w.T + b
    return feat


if __name__ == "__main__":
    B = 2
    hidden_size = 32
    max_length = 256          # -> 16 channels x 10 length = 160 fc1 features

    keys = jax.random.split(jax.random.PRNGKey(0), 10)
    x = jax.random.normal(keys[0], (B, max_length, hidden_size), jnp.float32)

    torch_conv = []
    cin = hidden_size
    for i, (cout, k, _) in enumerate(_CONV_SPECS):
        torch_conv.append(_rand_conv(keys[1 + i], cin, cout, k))
        cin = cout
    torch_fc = [_rand_fc(keys[5 + i], fin, fout)
                for i, (fin, fout) in enumerate(_FC_SPECS)]

    dims = _stage_dims(max_length, hidden_size)
    conv_kparams = [_fold_conv(*t) for t in torch_conv]
    fc_kparams = [_prep_fc1(torch_fc[0][0], torch_fc[0][1],
                            dims[-1]["Lpool"], dims[-1]["Cout"])]
    fc_kparams += [_prep_fc(w, b) for (w, b) in torch_fc[1:]]

    fwd = jax.jit(decoder_forward)
    out = jax.block_until_ready(fwd(x, conv_kparams, fc_kparams))
    assert out.shape == (B, 2), out.shape

    ref = _reference_forward(x, torch_conv, torch_fc)
    np.testing.assert_allclose(np.asarray(out), np.asarray(ref),
                               rtol=0.1, atol=0.1)
    print("KERNEL_OK")
</pallas_src>

<mosaic_0001>
module attributes {stable_mosaic.version = 11 : i64} {
  func.func @_decoder_kernel(%arg0: i32, %arg1: memref<1x256x32xf32, #tpu.memory_space<vmem>>, %arg2: memref<384x128xbf16, #tpu.memory_space<vmem>>, %arg3: memref<1x128xf32, #tpu.memory_space<vmem>>, %arg4: memref<384x128xbf16, #tpu.memory_space<vmem>>, %arg5: memref<1x128xf32, #tpu.memory_space<vmem>>, %arg6: memref<640x128xbf16, #tpu.memory_space<vmem>>, %arg7: memref<1x128xf32, #tpu.memory_space<vmem>>, %arg8: memref<640x128xbf16, #tpu.memory_space<vmem>>, %arg9: memref<1x128xf32, #tpu.memory_space<vmem>>, %arg10: memref<10x16x64xbf16, #tpu.memory_space<vmem>>, %arg11: memref<1x64xf32, #tpu.memory_space<vmem>>, %arg12: memref<64x32xf32, #tpu.memory_space<vmem>>, %arg13: memref<1x32xf32, #tpu.memory_space<vmem>>, %arg14: memref<32x16xf32, #tpu.memory_space<vmem>>, %arg15: memref<1x16xf32, #tpu.memory_space<vmem>>, %arg16: memref<16x4xf32, #tpu.memory_space<vmem>>, %arg17: memref<1x4xf32, #tpu.memory_space<vmem>>, %arg18: memref<4x2xf32, #tpu.memory_space<vmem>>, %arg19: memref<1x2xf32, #tpu.memory_space<vmem>>, %arg20: memref<1x1x2xf32, #tpu.memory_space<vmem>>, %arg21: memref<254x384xbf16, #tpu.memory_space<vmem>>, %arg22: memref<254x128xf32, #tpu.memory_space<vmem>>, %arg23: memref<126x128xf32, #tpu.memory_space<vmem>>, %arg24: memref<124x384xbf16, #tpu.memory_space<vmem>>, %arg25: memref<124x128xf32, #tpu.memory_space<vmem>>, %arg26: memref<61x128xf32, #tpu.memory_space<vmem>>, %arg27: memref<57x640xbf16, #tpu.memory_space<vmem>>, %arg28: memref<57x128xf32, #tpu.memory_space<vmem>>, %arg29: memref<27x128xf32, #tpu.memory_space<vmem>>, %arg30: memref<23x640xbf16, #tpu.memory_space<vmem>>, %arg31: memref<23x128xf32, #tpu.memory_space<vmem>>, %arg32: memref<10x128xf32, #tpu.memory_space<vmem>>) attributes {dimension_semantics = [#tpu.dimension_semantics<parallel>], iteration_bounds = array<i64: 2>, scalar_prefetch = 0 : i64, scratch_operands = 12 : i64, tpu.core_type = #tpu.core_type<tc>, window_params = [{transform_indices = @transform_0, window_bounds = array<i64: 1, 256, 32>}, {pipeline_mode = #tpu.pipeline_mode<synchronous>, transform_indices = @transform_1, window_bounds = array<i64: 384, 128>}, {pipeline_mode = #tpu.pipeline_mode<synchronous>, transform_indices = @transform_2, window_bounds = array<i64: 1, 128>}, {pipeline_mode = #tpu.pipeline_mode<synchronous>, transform_indices = @transform_3, window_bounds = array<i64: 384, 128>}, {pipeline_mode = #tpu.pipeline_mode<synchronous>, transform_indices = @transform_4, window_bounds = array<i64: 1, 128>}, {pipeline_mode = #tpu.pipeline_mode<synchronous>, transform_indices = @transform_5, window_bounds = array<i64: 640, 128>}, {pipeline_mode = #tpu.pipeline_mode<synchronous>, transform_indices = @transform_6, window_bounds = array<i64: 1, 128>}, {pipeline_mode = #tpu.pipeline_mode<synchronous>, transform_indices = @transform_7, window_bounds = array<i64: 640, 128>}, {pipeline_mode = #tpu.pipeline_mode<synchronous>, transform_indices = @transform_8, window_bounds = array<i64: 1, 128>}, {pipeline_mode = #tpu.pipeline_mode<synchronous>, transform_indices = @transform_9, window_bounds = array<i64: 10, 16, 64>}, {pipeline_mode = #tpu.pipeline_mode<synchronous>, transform_indices = @transform_10, window_bounds = array<i64: 1, 64>}, {pipeline_mode = #tpu.pipeline_mode<synchronous>, transform_indices = @transform_11, window_bounds = array<i64: 64, 32>}, {pipeline_mode = #tpu.pipeline_mode<synchronous>, transform_indices = @transform_12, window_bounds = array<i64: 1, 32>}, {pipeline_mode = #tpu.pipeline_mode<synchronous>, transform_indices = @transform_13, window_bounds = array<i64: 32, 16>}, {pipeline_mode = #tpu.pipeline_mode<synchronous>, transform_indices = @transform_14, window_bounds = array<i64: 1, 16>}, {pipeline_mode = #tpu.pipeline_mode<synchronous>, transform_indices = @transform_15, window_bounds = array<i64: 16, 4>}, {pipeline_mode = #tpu.pipeline_mode<synchronous>, transform_indices = @transform_16, window_bounds = array<i64: 1, 4>}, {pipeline_mode = #tpu.pipeline_mode<synchronous>, transform_indices = @transform_17, window_bounds = array<i64: 4, 2>}, {pipeline_mode = #tpu.pipeline_mode<synchronous>, transform_indices = @transform_18, window_bounds = array<i64: 1, 2>}, {transform_indices = @transform_19, window_bounds = array<i64: 1, 1, 2>}]} {
    %cst = arith.constant 0.000000e+00 : bf16
    %0 = vector.broadcast %cst : bf16 to vector<254x384xbf16>
    %c0 = arith.constant 0 : index
    %c0_0 = arith.constant 0 : index
    %1 = vector.load %arg21[%c0, %c0_0] : memref<254x384xbf16, #tpu.memory_space<vmem>>, vector<254x384xbf16>
    tpu.vector_store %arg21[%c0, %c0_0], %0 {strides = array<i32>} : memref<254x384xbf16, #tpu.memory_space<vmem>>, vector<254x384xbf16>,
    %c0_1 = arith.constant 0 : index
    %c0_2 = arith.constant 0 : index
    %c0_3 = arith.constant 0 : index
    %2 = vector.load %arg1[%c0_1, %c0_2, %c0_3] : memref<1x256x32xf32, #tpu.memory_space<vmem>>, vector<1x254x32xf32>
    %3 = vector.shape_cast %2 : vector<1x254x32xf32> to vector<254x32xf32>
    %4 = arith.truncf %3 : vector<254x32xf32> to vector<254x32xbf16>
    %c0_4 = arith.constant 0 : index
    %c0_5 = arith.constant 0 : index
    %5 = vector.load %arg21[%c0_4, %c0_5] : memref<254x384xbf16, #tpu.memory_space<vmem>>, vector<254x32xbf16>
    tpu.vector_store %arg21[%c0_4, %c0_5], %4 {strides = array<i32>} : memref<254x384xbf16, #tpu.memory_space<vmem>>, vector<254x32xbf16>,
    %c0_6 = arith.constant 0 : index
    %c1 = arith.constant 1 : index
    %c0_7 = arith.constant 0 : index
    %6 = vector.load %arg1[%c0_6, %c1, %c0_7] : memref<1x256x32xf32, #tpu.memory_space<vmem>>, vector<1x254x32xf32>
    %7 = vector.shape_cast %6 : vector<1x254x32xf32> to vector<254x32xf32>
    %8 = arith.truncf %7 : vector<254x32xf32> to vector<254x32xbf16>
    %c0_8 = arith.constant 0 : index
    %c128 = arith.constant 128 : index
    %9 = vector.load %arg21[%c0_8, %c128] : memref<254x384xbf16, #tpu.memory_space<vmem>>, vector<254x32xbf16>
    tpu.vector_store %arg21[%c0_8, %c128], %8 {strides = array<i32>} : memref<254x384xbf16, #tpu.memory_space<vmem>>, vector<254x32xbf16>,
    %c0_9 = arith.constant 0 : index
    %c2 = arith.constant 2 : index
    %c0_10 = arith.constant 0 : index
    %10 = vector.load %arg1[%c0_9, %c2, %c0_10] : memref<1x256x32xf32, #tpu.memory_space<vmem>>, vector<1x254x32xf32>
    %11 = vector.shape_cast %10 : vector<1x254x32xf32> to vector<254x32xf32>
    %12 = arith.truncf %11 : vector<254x32xf32> to vector<254x32xbf16>
    %c0_11 = arith.constant 0 : index
    %c256 = arith.constant 256 : index
    %13 = vector.load %arg21[%c0_11, %c256] : memref<254x384xbf16, #tpu.memory_space<vmem>>, vector<254x32xbf16>
    tpu.vector_store %arg21[%c0_11, %c256], %12 {strides = array<i32>} : memref<254x384xbf16, #tpu.memory_space<vmem>>, vector<254x32xbf16>,
    %c0_12 = arith.constant 0 : index
    %c0_13 = arith.constant 0 : index
    %14 = vector.load %arg21[%c0_12, %c0_13] : memref<254x384xbf16, #tpu.memory_space<vmem>>, vector<254x384xbf16>
    %c0_14 = arith.constant 0 : index
    %c0_15 = arith.constant 0 : index
    %15 = vector.load %arg2[%c0_14, %c0_15] : memref<384x128xbf16, #tpu.memory_space<vmem>>, vector<384x128xbf16>
    %cst_16 = arith.constant dense<0.000000e+00> : vector<254x128xf32>
    %16 = tpu.matmul %14, %15, %cst_16 {dimension_numbers = #tpu.dot_dimension_numbers<[1], [0], [0], [1], [0, 0, 1, 1], [], []>} : vector<254x384xbf16>, vector<384x128xbf16>, vector<254x128xf32> -> vector<254x128xf32>
    %c0_17 = arith.constant 0 : index
    %c0_18 = arith.constant 0 : index
    %17 = vector.load %arg3[%c0_17, %c0_18] : memref<1x128xf32, #tpu.memory_space<vmem>>, vector<1x128xf32>
    %18 = vector.broadcast %17 : vector<1x128xf32> to vector<254x128xf32>
    %19 = arith.addf %16, %18 : vector<254x128xf32>
    %c0_19 = arith.constant 0 : index
    %c0_20 = arith.constant 0 : index
    %20 = vector.load %arg22[%c0_19, %c0_20] : memref<254x128xf32, #tpu.memory_space<vmem>>, vector<254x128xf32>
    tpu.vector_store %arg22[%c0_19, %c0_20], %19 {strides = array<i32>} : memref<254x128xf32, #tpu.memory_space<vmem>>, vector<254x128xf32>,
    %c0_21 = arith.constant 0 : index
    %c0_22 = arith.constant 0 : index
    %21 = vector.load %arg22[%c0_21, %c0_22] : memref<254x128xf32, #tpu.memory_space<vmem>>, vector<252x128xf32>
    %c1_23 = arith.constant 1 : index
    %c0_24 = arith.constant 0 : index
    %22 = vector.load %arg22[%c1_23, %c0_24] : memref<254x128xf32, #tpu.memory_space<vmem>>, vector<252x128xf32>
    %23 = arith.maximumf %21, %22 : vector<252x128xf32>
    %c2_25 = arith.constant 2 : index
    %c0_26 = arith.constant 0 : index
    %24 = vector.load %arg22[%c2_25, %c0_26] : memref<254x128xf32, #tpu.memory_space<vmem>>, vector<252x128xf32>
    %25 = arith.maximumf %23, %24 : vector<252x128xf32>
    %c0_27 = arith.constant 0 : index
    %c0_28 = arith.constant 0 : index
    %26 = vector.load %arg22[%c0_27, %c0_28] : memref<254x128xf32, #tpu.memory_space<vmem>>, vector<252x128xf32>
    tpu.vector_store %arg22[%c0_27, %c0_28], %25 {strides = array<i32>} : memref<254x128xf32, #tpu.memory_space<vmem>>, vector<252x128xf32>,
    %c0_29 = arith.constant 0 : index
    %c0_30 = arith.constant 0 : index
    %27 = tpu.strided_load %arg22[%c0_29, %c0_30] {strides = array<i32: 2, 1>} : memref<254x128xf32, #tpu.memory_space<vmem>>, vector<126x128xf32>
    %c0_31 = arith.constant 0 : index
    %c0_32 = arith.constant 0 : index
    %28 = vector.load %arg23[%c0_31, %c0_32] : memref<126x128xf32, #tpu.memory_space<vmem>>, vector<126x128xf32>
    tpu.vector_store %arg23[%c0_31, %c0_32], %27 {strides = array<i32>} : memref<126x128xf32, #tpu.memory_space<vmem>>, vector<126x128xf32>,
    %c0_33 = arith.constant 0 : index
    %c0_34 = arith.constant 0 : index
    %29 = vector.load %arg23[%c0_33, %c0_34] : memref<126x128xf32, #tpu.memory_space<vmem>>, vector<124x128xf32>
    %30 = arith.truncf %29 : vector<124x128xf32> to vector<124x128xbf16>
    %c0_35 = arith.constant 0 : index
    %c0_36 = arith.constant 0 : index
    %31 = vector.load %arg24[%c0_35, %c0_36] : memref<124x384xbf16, #tpu.memory_space<vmem>>, vector<124x128xbf16>
    tpu.vector_store %arg24[%c0_35, %c0_36], %30 {strides = array<i32>} : memref<124x384xbf16, #tpu.memory_space<vmem>>, vector<124x128xbf16>,
    %c1_37 = arith.constant 1 : index
    %c0_38 = arith.constant 0 : index
    %32 = vector.load %arg23[%c1_37, %c0_38] : memref<126x128xf32, #tpu.memory_space<vmem>>, vector<124x128xf32>
    %33 = arith.truncf %32 : vector<124x128xf32> to vector<124x128xbf16>
    %c0_39 = arith.constant 0 : index
    %c128_40 = arith.constant 128 : index
    %34 = vector.load %arg24[%c0_39, %c128_40] : memref<124x384xbf16, #tpu.memory_space<vmem>>, vector<124x128xbf16>
    tpu.vector_store %arg24[%c0_39, %c128_40], %33 {strides = array<i32>} : memref<124x384xbf16, #tpu.memory_space<vmem>>, vector<124x128xbf16>,
    %c2_41 = arith.constant 2 : index
    %c0_42 = arith.constant 0 : index
    %35 = vector.load %arg23[%c2_41, %c0_42] : memref<126x128xf32, #tpu.memory_space<vmem>>, vector<124x128xf32>
    %36 = arith.truncf %35 : vector<124x128xf32> to vector<124x128xbf16>
    %c0_43 = arith.constant 0 : index
    %c256_44 = arith.constant 256 : index
    %37 = vector.load %arg24[%c0_43, %c256_44] : memref<124x384xbf16, #tpu.memory_space<vmem>>, vector<124x128xbf16>
    tpu.vector_store %arg24[%c0_43, %c256_44], %36 {strides = array<i32>} : memref<124x384xbf16, #tpu.memory_space<vmem>>, vector<124x128xbf16>,
    %c0_45 = arith.constant 0 : index
    %c0_46 = arith.constant 0 : index
    %38 = vector.load %arg24[%c0_45, %c0_46] : memref<124x384xbf16, #tpu.memory_space<vmem>>, vector<124x384xbf16>
    %c0_47 = arith.constant 0 : index
    %c0_48 = arith.constant 0 : index
    %39 = vector.load %arg4[%c0_47, %c0_48] : memref<384x128xbf16, #tpu.memory_space<vmem>>, vector<384x128xbf16>
    %cst_49 = arith.constant dense<0.000000e+00> : vector<124x128xf32>
    %40 = tpu.matmul %38, %39, %cst_49 {dimension_numbers = #tpu.dot_dimension_numbers<[1], [0], [0], [1], [0, 0, 1, 1], [], []>} : vector<124x384xbf16>, vector<384x128xbf16>, vector<124x128xf32> -> vector<124x128xf32>
    %c0_50 = arith.constant 0 : index
    %c0_51 = arith.constant 0 : index
    %41 = vector.load %arg5[%c0_50, %c0_51] : memref<1x128xf32, #tpu.memory_space<vmem>>, vector<1x128xf32>
    %42 = vector.broadcast %41 : vector<1x128xf32> to vector<124x128xf32>
    %43 = arith.addf %40, %42 : vector<124x128xf32>
    %c0_52 = arith.constant 0 : index
    %c0_53 = arith.constant 0 : index
    %44 = vector.load %arg25[%c0_52, %c0_53] : memref<124x128xf32, #tpu.memory_space<vmem>>, vector<124x128xf32>
    tpu.vector_store %arg25[%c0_52, %c0_53], %43 {strides = array<i32>} : memref<124x128xf32, #tpu.memory_space<vmem>>, vector<124x128xf32>,
    %c0_54 = arith.constant 0 : index
    %c0_55 = arith.constant 0 : index
    %45 = vector.load %arg25[%c0_54, %c0_55] : memref<124x128xf32, #tpu.memory_space<vmem>>, vector<122x128xf32>
    %c1_56 = arith.constant 1 : index
    %c0_57 = arith.constant 0 : index
    %46 = vector.load %arg25[%c1_56, %c0_57] : memref<124x128xf32, #tpu.memory_space<vmem>>, vector<122x128xf32>
    %47 = arith.maximumf %45, %46 : vector<122x128xf32>
    %c2_58 = arith.constant 2 : index
    %c0_59 = arith.constant 0 : index
    %48 = vector.load %arg25[%c2_58, %c0_59] : memref<124x128xf32, #tpu.memory_space<vmem>>, vector<122x128xf32>
    %49 = arith.maximumf %47, %48 : vector<122x128xf32>
    %c0_60 = arith.constant 0 : index
    %c0_61 = arith.constant 0 : index
    %50 = vector.load %arg25[%c0_60, %c0_61] : memref<124x128xf32, #tpu.memory_space<vmem>>, vector<122x128xf32>
    tpu.vector_store %arg25[%c0_60, %c0_61], %49 {strides = array<i32>} : memref<124x128xf32, #tpu.memory_space<vmem>>, vector<122x128xf32>,
    %c0_62 = arith.constant 0 : index
    %c0_63 = arith.constant 0 : index
    %51 = tpu.strided_load %arg25[%c0_62, %c0_63] {strides = array<i32: 2, 1>} : memref<124x128xf32, #tpu.memory_space<vmem>>, vector<61x128xf32>
    %c0_64 = arith.constant 0 : index
    %c0_65 = arith.constant 0 : index
    %52 = vector.load %arg26[%c0_64, %c0_65] : memref<61x128xf32, #tpu.memory_space<vmem>>, vector<61x128xf32>
    tpu.vector_store %arg26[%c0_64, %c0_65], %51 {strides = array<i32>} : memref<61x128xf32, #tpu.memory_space<vmem>>, vector<61x128xf32>,
    %c0_66 = arith.constant 0 : index
    %c0_67 = arith.constant 0 : index
    %53 = vector.load %arg26[%c0_66, %c0_67] : memref<61x128xf32, #tpu.memory_space<vmem>>, vector<57x128xf32>
    %54 = arith.truncf %53 : vector<57x128xf32> to vector<57x128xbf16>
    %c0_68 = arith.constant 0 : index
    %c0_69 = arith.constant 0 : index
    %55 = vector.load %arg27[%c0_68, %c0_69] : memref<57x640xbf16, #tpu.memory_space<vmem>>, vector<57x128xbf16>
    tpu.vector_store %arg27[%c0_68, %c0_69], %54 {strides = array<i32>} : memref<57x640xbf16, #tpu.memory_space<vmem>>, vector<57x128xbf16>,
    %c1_70 = arith.constant 1 : index
    %c0_71 = arith.constant 0 : index
    %56 = vector.load %arg26[%c1_70, %c0_71] : memref<61x128xf32, #tpu.memory_space<vmem>>, vector<57x128xf32>
    %57 = arith.truncf %56 : vector<57x128xf32> to vector<57x128xbf16>
    %c0_72 = arith.constant 0 : index
    %c128_73 = arith.constant 128 : index
    %58 = vector.load %arg27[%c0_72, %c128_73] : memref<57x640xbf16, #tpu.memory_space<vmem>>, vector<57x128xbf16>
    tpu.vector_store %arg27[%c0_72, %c128_73], %57 {strides = array<i32>} : memref<57x640xbf16, #tpu.memory_space<vmem>>, vector<57x128xbf16>,
    %c2_74 = arith.constant 2 : index
    %c0_75 = arith.constant 0 : index
    %59 = vector.load %arg26[%c2_74, %c0_75] : memref<61x128xf32, #tpu.memory_space<vmem>>, vector<57x128xf32>
    %60 = arith.truncf %59 : vector<57x128xf32> to vector<57x128xbf16>
    %c0_76 = arith.constant 0 : index
    %c256_77 = arith.constant 256 : index
    %61 = vector.load %arg27[%c0_76, %c256_77] : memref<57x640xbf16, #tpu.memory_space<vmem>>, vector<57x128xbf16>
    tpu.vector_store %arg27[%c0_76, %c256_77], %60 {strides = array<i32>} : memref<57x640xbf16, #tpu.memory_space<vmem>>, vector<57x128xbf16>,
    %c3 = arith.constant 3 : index
    %c0_78 = arith.constant 0 : index
    %62 = vector.load %arg26[%c3, %c0_78] : memref<61x128xf32, #tpu.memory_space<vmem>>, vector<57x128xf32>
    %63 = arith.truncf %62 : vector<57x128xf32> to vector<57x128xbf16>
    %c0_79 = arith.constant 0 : index
    %c384 = arith.constant 384 : index
    %64 = vector.load %arg27[%c0_79, %c384] : memref<57x640xbf16, #tpu.memory_space<vmem>>, vector<57x128xbf16>
    tpu.vector_store %arg27[%c0_79, %c384], %63 {strides = array<i32>} : memref<57x640xbf16, #tpu.memory_space<vmem>>, vector<57x128xbf16>,
    %c4 = arith.constant 4 : index
    %c0_80 = arith.constant 0 : index
    %65 = vector.load %arg26[%c4, %c0_80] : memref<61x128xf32, #tpu.memory_space<vmem>>, vector<57x128xf32>
    %66 = arith.truncf %65 : vector<57x128xf32> to vector<57x128xbf16>
    %c0_81 = arith.constant 0 : index
    %c512 = arith.constant 512 : index
    %67 = vector.load %arg27[%c0_81, %c512] : memref<57x640xbf16, #tpu.memory_space<vmem>>, vector<57x128xbf16>
    tpu.vector_store %arg27[%c0_81, %c512], %66 {strides = array<i32>} : memref<57x640xbf16, #tpu.memory_space<vmem>>, vector<57x128xbf16>,
    %c0_82 = arith.constant 0 : index
    %c0_83 = arith.constant 0 : index
    %68 = vector.load %arg27[%c0_82, %c0_83] : memref<57x640xbf16, #tpu.memory_space<vmem>>, vector<57x640xbf16>
    %c0_84 = arith.constant 0 : index
    %c0_85 = arith.constant 0 : index
    %69 = vector.load %arg6[%c0_84, %c0_85] : memref<640x128xbf16, #tpu.memory_space<vmem>>, vector<640x128xbf16>
    %cst_86 = arith.constant dense<0.000000e+00> : vector<57x128xf32>
    %70 = tpu.matmul %68, %69, %cst_86 {dimension_numbers = #tpu.dot_dimension_numbers<[1], [0], [0], [1], [0, 0, 1, 1], [], []>} : vector<57x640xbf16>, vector<640x128xbf16>, vector<57x128xf32> -> vector<57x128xf32>
    %c0_87 = arith.constant 0 : index
    %c0_88 = arith.constant 0 : index
    %71 = vector.load %arg7[%c0_87, %c0_88] : memref<1x128xf32, #tpu.memory_space<vmem>>, vector<1x128xf32>
    %72 = vector.broadcast %71 : vector<1x128xf32> to vector<57x128xf32>
    %73 = arith.addf %70, %72 : vector<57x128xf32>
    %c0_89 = arith.constant 0 : index
    %c0_90 = arith.constant 0 : index
    %74 = vector.load %arg28[%c0_89, %c0_90] : memref<57x128xf32, #tpu.memory_space<vmem>>, vector<57x128xf32>
    tpu.vector_store %arg28[%c0_89, %c0_90], %73 {strides = array<i32>} : memref<57x128xf32, #tpu.memory_space<vmem>>, vector<57x128xf32>,
    %c0_91 = arith.constant 0 : index
    %c0_92 = arith.constant 0 : index
    %75 = vector.load %arg28[%c0_91, %c0_92] : memref<57x128xf32, #tpu.memory_space<vmem>>, vector<53x128xf32>
    %c1_93 = arith.constant 1 : index
    %c0_94 = arith.constant 0 : index
    %76 = vector.load %arg28[%c1_93, %c0_94] : memref<57x128xf32, #tpu.memory_space<vmem>>, vector<53x128xf32>
    %77 = arith.maximumf %75, %76 : vector<53x128xf32>
    %c2_95 = arith.constant 2 : index
    %c0_96 = arith.constant 0 : index
    %78 = vector.load %arg28[%c2_95, %c0_96] : memref<57x128xf32, #tpu.memory_space<vmem>>, vector<53x128xf32>
    %79 = arith.maximumf %77, %78 : vector<53x128xf32>
    %c3_97 = arith.constant 3 : index
    %c0_98 = arith.constant 0 : index
    %80 = vector.load %arg28[%c3_97, %c0_98] : memref<57x128xf32, #tpu.memory_space<vmem>>, vector<53x128xf32>
    %81 = arith.maximumf %79, %80 : vector<53x128xf32>
    %c4_99 = arith.constant 4 : index
    %c0_100 = arith.constant 0 : index
    %82 = vector.load %arg28[%c4_99, %c0_100] : memref<57x128xf32, #tpu.memory_space<vmem>>, vector<53x128xf32>
    %83 = arith.maximumf %81, %82 : vector<53x128xf32>
    %c0_101 = arith.constant 0 : index
    %c0_102 = arith.constant 0 : index
    %84 = vector.load %arg28[%c0_101, %c0_102] : memref<57x128xf32, #tpu.memory_space<vmem>>, vector<53x128xf32>
    tpu.vector_store %arg28[%c0_101, %c0_102], %83 {strides = array<i32>} : memref<57x128xf32, #tpu.memory_space<vmem>>, vector<53x128xf32>,
    %c0_103 = arith.constant 0 : index
    %c0_104 = arith.constant 0 : index
    %85 = tpu.strided_load %arg28[%c0_103, %c0_104] {strides = array<i32: 2, 1>} : memref<57x128xf32, #tpu.memory_space<vmem>>, vector<27x128xf32>
    %c0_105 = arith.constant 0 : index
    %c0_106 = arith.constant 0 : index
    %86 = vector.load %arg29[%c0_105, %c0_106] : memref<27x128xf32, #tpu.memory_space<vmem>>, vector<27x128xf32>
    tpu.vector_store %arg29[%c0_105, %c0_106], %85 {strides = array<i32>} : memref<27x128xf32, #tpu.memory_space<vmem>>, vector<27x128xf32>,
    %c0_107 = arith.constant 0 : index
    %c0_108 = arith.constant 0 : index
    %87 = vector.load %arg29[%c0_107, %c0_108] : memref<27x128xf32, #tpu.memory_space<vmem>>, vector<23x128xf32>
    %88 = arith.truncf %87 : vector<23x128xf32> to vector<23x128xbf16>
    %c0_109 = arith.constant 0 : index
    %c0_110 = arith.constant 0 : index
    %89 = vector.load %arg30[%c0_109, %c0_110] : memref<23x640xbf16, #tpu.memory_space<vmem>>, vector<23x128xbf16>
    tpu.vector_store %arg30[%c0_109, %c0_110], %88 {strides = array<i32>} : memref<23x640xbf16, #tpu.memory_space<vmem>>, vector<23x128xbf16>,
    %c1_111 = arith.constant 1 : index
    %c0_112 = arith.constant 0 : index
    %90 = vector.load %arg29[%c1_111, %c0_112] : memref<27x128xf32, #tpu.memory_space<vmem>>, vector<23x128xf32>
    %91 = arith.truncf %90 : vector<23x128xf32> to vector<23x128xbf16>
    %c0_113 = arith.constant 0 : index
    %c128_114 = arith.constant 128 : index
    %92 = vector.load %arg30[%c0_113, %c128_114] : memref<23x640xbf16, #tpu.memory_space<vmem>>, vector<23x128xbf16>
    tpu.vector_store %arg30[%c0_113, %c128_114], %91 {strides = array<i32>} : memref<23x640xbf16, #tpu.memory_space<vmem>>, vector<23x128xbf16>,
    %c2_115 = arith.constant 2 : index
    %c0_116 = arith.constant 0 : index
    %93 = vector.load %arg29[%c2_115, %c0_116] : memref<27x128xf32, #tpu.memory_space<vmem>>, vector<23x128xf32>
    %94 = arith.truncf %93 : vector<23x128xf32> to vector<23x128xbf16>
    %c0_117 = arith.constant 0 : index
    %c256_118 = arith.constant 256 : index
    %95 = vector.load %arg30[%c0_117, %c256_118] : memref<23x640xbf16, #tpu.memory_space<vmem>>, vector<23x128xbf16>
    tpu.vector_store %arg30[%c0_117, %c256_118], %94 {strides = array<i32>} : memref<23x640xbf16, #tpu.memory_space<vmem>>, vector<23x128xbf16>,
    %c3_119 = arith.constant 3 : index
    %c0_120 = arith.constant 0 : index
    %96 = vector.load %arg29[%c3_119, %c0_120] : memref<27x128xf32, #tpu.memory_space<vmem>>, vector<23x128xf32>
    %97 = arith.truncf %96 : vector<23x128xf32> to vector<23x128xbf16>
    %c0_121 = arith.constant 0 : index
    %c384_122 = arith.constant 384 : index
    %98 = vector.load %arg30[%c0_121, %c384_122] : memref<23x640xbf16, #tpu.memory_space<vmem>>, vector<23x128xbf16>
    tpu.vector_store %arg30[%c0_121, %c384_122], %97 {strides = array<i32>} : memref<23x640xbf16, #tpu.memory_space<vmem>>, vector<23x128xbf16>,
    %c4_123 = arith.constant 4 : index
    %c0_124 = arith.constant 0 : index
    %99 = vector.load %arg29[%c4_123, %c0_124] : memref<27x128xf32, #tpu.memory_space<vmem>>, vector<23x128xf32>
    %100 = arith.truncf %99 : vector<23x128xf32> to vector<23x128xbf16>
    %c0_125 = arith.constant 0 : index
    %c512_126 = arith.constant 512 : index
    %101 = vector.load %arg30[%c0_125, %c512_126] : memref<23x640xbf16, #tpu.memory_space<vmem>>, vector<23x128xbf16>
    tpu.vector_store %arg30[%c0_125, %c512_126], %100 {strides = array<i32>} : memref<23x640xbf16, #tpu.memory_space<vmem>>, vector<23x128xbf16>,
    %c0_127 = arith.constant 0 : index
    %c0_128 = arith.constant 0 : index
    %102 = vector.load %arg30[%c0_127, %c0_128] : memref<23x640xbf16, #tpu.memory_space<vmem>>, vector<23x640xbf16>
    %c0_129 = arith.constant 0 : index
    %c0_130 = arith.constant 0 : index
    %103 = vector.load %arg8[%c0_129, %c0_130] : memref<640x128xbf16, #tpu.memory_space<vmem>>, vector<640x128xbf16>
    %cst_131 = arith.constant dense<0.000000e+00> : vector<23x128xf32>
    %104 = tpu.matmul %102, %103, %cst_131 {dimension_numbers = #tpu.dot_dimension_numbers<[1], [0], [0], [1], [0, 0, 1, 1], [], []>} : vector<23x640xbf16>, vector<640x128xbf16>, vector<23x128xf32> -> vector<23x128xf32>
    %c0_132 = arith.constant 0 : index
    %c0_133 = arith.constant 0 : index
    %105 = vector.load %arg9[%c0_132, %c0_133] : memref<1x128xf32, #tpu.memory_space<vmem>>, vector<1x128xf32>
    %106 = vector.broadcast %105 : vector<1x128xf32> to vector<23x128xf32>
    %107 = arith.addf %104, %106 : vector<23x128xf32>
    %c0_134 = arith.constant 0 : index
    %c0_135 = arith.constant 0 : index
    %108 = vector.load %arg31[%c0_134, %c0_135] : memref<23x128xf32, #tpu.memory_space<vmem>>, vector<23x128xf32>
    tpu.vector_store %arg31[%c0_134, %c0_135], %107 {strides = array<i32>} : memref<23x128xf32, #tpu.memory_space<vmem>>, vector<23x128xf32>,
    %c0_136 = arith.constant 0 : index
    %c0_137 = arith.constant 0 : index
    %109 = vector.load %arg31[%c0_136, %c0_137] : memref<23x128xf32, #tpu.memory_space<vmem>>, vector<19x128xf32>
    %c1_138 = arith.constant 1 : index
    %c0_139 = arith.constant 0 : index
    %110 = vector.load %arg31[%c1_138, %c0_139] : memref<23x128xf32, #tpu.memory_space<vmem>>, vector<19x128xf32>
    %111 = arith.maximumf %109, %110 : vector<19x128xf32>
    %c2_140 = arith.constant 2 : index
    %c0_141 = arith.constant 0 : index
    %112 = vector.load %arg31[%c2_140, %c0_141] : memref<23x128xf32, #tpu.memory_space<vmem>>, vector<19x128xf32>
    %113 = arith.maximumf %111, %112 : vector<19x128xf32>
    %c3_142 = arith.constant 3 : index
    %c0_143 = arith.constant 0 : index
    %114 = vector.load %arg31[%c3_142, %c0_143] : memref<23x128xf32, #tpu.memory_space<vmem>>, vector<19x128xf32>
    %115 = arith.maximumf %113, %114 : vector<19x128xf32>
    %c4_144 = arith.constant 4 : index
    %c0_145 = arith.constant 0 : index
    %116 = vector.load %arg31[%c4_144, %c0_145] : memref<23x128xf32, #tpu.memory_space<vmem>>, vector<19x128xf32>
    %117 = arith.maximumf %115, %116 : vector<19x128xf32>
    %c0_146 = arith.constant 0 : index
    %c0_147 = arith.constant 0 : index
    %118 = vector.load %arg31[%c0_146, %c0_147] : memref<23x128xf32, #tpu.memory_space<vmem>>, vector<19x128xf32>
    tpu.vector_store %arg31[%c0_146, %c0_147], %117 {strides = array<i32>} : memref<23x128xf32, #tpu.memory_space<vmem>>, vector<19x128xf32>,
    %c0_148 = arith.constant 0 : index
    %c0_149 = arith.constant 0 : index
    %119 = tpu.strided_load %arg31[%c0_148, %c0_149] {strides = array<i32: 2, 1>} : memref<23x128xf32, #tpu.memory_space<vmem>>, vector<10x128xf32>
    %c0_150 = arith.constant 0 : index
    %c0_151 = arith.constant 0 : index
    %120 = vector.load %arg32[%c0_150, %c0_151] : memref<10x128xf32, #tpu.memory_space<vmem>>, vector<10x128xf32>
    tpu.vector_store %arg32[%c0_150, %c0_151], %119 {strides = array<i32>} : memref<10x128xf32, #tpu.memory_space<vmem>>, vector<10x128xf32>,
    %c0_152 = arith.constant 0 : index
    %c0_153 = arith.constant 0 : index
    %121 = vector.load %arg11[%c0_152, %c0_153] : memref<1x64xf32, #tpu.memory_space<vmem>>, vector<1x64xf32>
    %c0_154 = arith.constant 0 : index
    %c0_155 = arith.constant 0 : index
    %122 = vector.load %arg32[%c0_154, %c0_155] : memref<10x128xf32, #tpu.memory_space<vmem>>, vector<1x16xf32>
    %123 = arith.truncf %122 : vector<1x16xf32> to vector<1x16xbf16>
    %c0_156 = arith.constant 0 : index
    %c0_157 = arith.constant 0 : index
    %c0_158 = arith.constant 0 : index
    %124 = vector.load %arg10[%c0_156, %c0_157, %c0_158] : memref<10x16x64xbf16, #tpu.memory_space<vmem>>, vector<1x16x64xbf16>
    %125 = vector.shape_cast %124 : vector<1x16x64xbf16> to vector<16x64xbf16>
    %cst_159 = arith.constant dense<0.000000e+00> : vector<1x64xf32>
    %126 = tpu.matmul %123, %125, %cst_159 {dimension_numbers = #tpu.dot_dimension_numbers<[1], [0], [0], [1], [0, 0, 1, 1], [], []>} : vector<1x16xbf16>, vector<16x64xbf16>, vector<1x64xf32> -> vector<1x64xf32>
    %127 = arith.addf %121, %126 : vector<1x64xf32>
    %c1_160 = arith.constant 1 : index
    %c0_161 = arith.constant 0 : index
    %128 = vector.load %arg32[%c1_160, %c0_161] : memref<10x128xf32, #tpu.memory_space<vmem>>, vector<1x16xf32>
    %129 = arith.truncf %128 : vector<1x16xf32> to vector<1x16xbf16>
    %c1_162 = arith.constant 1 : index
    %c0_163 = arith.constant 0 : index
    %c0_164 = arith.constant 0 : index
    %130 = vector.load %arg10[%c1_162, %c0_163, %c0_164] : memref<10x16x64xbf16, #tpu.memory_space<vmem>>, vector<1x16x64xbf16>
    %131 = vector.shape_cast %130 : vector<1x16x64xbf16> to vector<16x64xbf16>
    %cst_165 = arith.constant dense<0.000000e+00> : vector<1x64xf32>
    %132 = tpu.matmul %129, %131, %cst_165 {dimension_numbers = #tpu.dot_dimension_numbers<[1], [0], [0], [1], [0, 0, 1, 1], [], []>} : vector<1x16xbf16>, vector<16x64xbf16>, vector<1x64xf32> -> vector<1x64xf32>
    %133 = arith.addf %127, %132 : vector<1x64xf32>
    %c2_166 = arith.constant 2 : index
    %c0_167 = arith.constant 0 : index
    %134 = vector.load %arg32[%c2_166, %c0_167] : memref<10x128xf32, #tpu.memory_space<vmem>>, vector<1x16xf32>
    %135 = arith.truncf %134 : vector<1x16xf32> to vector<1x16xbf16>
    %c2_168 = arith.constant 2 : index
    %c0_169 = arith.constant 0 : index
    %c0_170 = arith.constant 0 : index
    %136 = vector.load %arg10[%c2_168, %c0_169, %c0_170] : memref<10x16x64xbf16, #tpu.memory_space<vmem>>, vector<1x16x64xbf16>
    %137 = vector.shape_cast %136 : vector<1x16x64xbf16> to vector<16x64xbf16>
    %cst_171 = arith.constant dense<0.000000e+00> : vector<1x64xf32>
    %138 = tpu.matmul %135, %137, %cst_171 {dimension_numbers = #tpu.dot_dimension_numbers<[1], [0], [0], [1], [0, 0, 1, 1], [], []>} : vector<1x16xbf16>, vector<16x64xbf16>, vector<1x64xf32> -> vector<1x64xf32>
    %139 = arith.addf %133, %138 : vector<1x64xf32>
    %c3_172 = arith.constant 3 : index
    %c0_173 = arith.constant 0 : index
    %140 = vector.load %arg32[%c3_172, %c0_173] : memref<10x128xf32, #tpu.memory_space<vmem>>, vector<1x16xf32>
    %141 = arith.truncf %140 : vector<1x16xf32> to vector<1x16xbf16>
    %c3_174 = arith.constant 3 : index
    %c0_175 = arith.constant 0 : index
    %c0_176 = arith.constant 0 : index
    %142 = vector.load %arg10[%c3_174, %c0_175, %c0_176] : memref<10x16x64xbf16, #tpu.memory_space<vmem>>, vector<1x16x64xbf16>
    %143 = vector.shape_cast %142 : vector<1x16x64xbf16> to vector<16x64xbf16>
    %cst_177 = arith.constant dense<0.000000e+00> : vector<1x64xf32>
    %144 = tpu.matmul %141, %143, %cst_177 {dimension_numbers = #tpu.dot_dimension_numbers<[1], [0], [0], [1], [0, 0, 1, 1], [], []>} : vector<1x16xbf16>, vector<16x64xbf16>, vector<1x64xf32> -> vector<1x64xf32>
    %145 = arith.addf %139, %144 : vector<1x64xf32>
    %c4_178 = arith.constant 4 : index
    %c0_179 = arith.constant 0 : index
    %146 = vector.load %arg32[%c4_178, %c0_179] : memref<10x128xf32, #tpu.memory_space<vmem>>, vector<1x16xf32>
    %147 = arith.truncf %146 : vector<1x16xf32> to vector<1x16xbf16>
    %c4_180 = arith.constant 4 : index
    %c0_181 = arith.constant 0 : index
    %c0_182 = arith.constant 0 : index
    %148 = vector.load %arg10[%c4_180, %c0_181, %c0_182] : memref<10x16x64xbf16, #tpu.memory_space<vmem>>, vector<1x16x64xbf16>
    %149 = vector.shape_cast %148 : vector<1x16x64xbf16> to vector<16x64xbf16>
    %cst_183 = arith.constant dense<0.000000e+00> : vector<1x64xf32>
    %150 = tpu.matmul %147, %149, %cst_183 {dimension_numbers = #tpu.dot_dimension_numbers<[1], [0], [0], [1], [0, 0, 1, 1], [], []>} : vector<1x16xbf16>, vector<16x64xbf16>, vector<1x64xf32> -> vector<1x64xf32>
    %151 = arith.addf %145, %150 : vector<1x64xf32>
    %c5 = arith.constant 5 : index
    %c0_184 = arith.constant 0 : index
    %152 = vector.load %arg32[%c5, %c0_184] : memref<10x128xf32, #tpu.memory_space<vmem>>, vector<1x16xf32>
    %153 = arith.truncf %152 : vector<1x16xf32> to vector<1x16xbf16>
    %c5_185 = arith.constant 5 : index
    %c0_186 = arith.constant 0 : index
    %c0_187 = arith.constant 0 : index
    %154 = vector.load %arg10[%c5_185, %c0_186, %c0_187] : memref<10x16x64xbf16, #tpu.memory_space<vmem>>, vector<1x16x64xbf16>
    %155 = vector.shape_cast %154 : vector<1x16x64xbf16> to vector<16x64xbf16>
    %cst_188 = arith.constant dense<0.000000e+00> : vector<1x64xf32>
    %156 = tpu.matmul %153, %155, %cst_188 {dimension_numbers = #tpu.dot_dimension_numbers<[1], [0], [0], [1], [0, 0, 1, 1], [], []>} : vector<1x16xbf16>, vector<16x64xbf16>, vector<1x64xf32> -> vector<1x64xf32>
    %157 = arith.addf %151, %156 : vector<1x64xf32>
    %c6 = arith.constant 6 : index
    %c0_189 = arith.constant 0 : index
    %158 = vector.load %arg32[%c6, %c0_189] : memref<10x128xf32, #tpu.memory_space<vmem>>, vector<1x16xf32>
    %159 = arith.truncf %158 : vector<1x16xf32> to vector<1x16xbf16>
    %c6_190 = arith.constant 6 : index
    %c0_191 = arith.constant 0 : index
    %c0_192 = arith.constant 0 : index
    %160 = vector.load %arg10[%c6_190, %c0_191, %c0_192] : memref<10x16x64xbf16, #tpu.memory_space<vmem>>, vector<1x16x64xbf16>
    %161 = vector.shape_cast %160 : vector<1x16x64xbf16> to vector<16x64xbf16>
    %cst_193 = arith.constant dense<0.000000e+00> : vector<1x64xf32>
    %162 = tpu.matmul %159, %161, %cst_193 {dimension_numbers = #tpu.dot_dimension_numbers<[1], [0], [0], [1], [0, 0, 1, 1], [], []>} : vector<1x16xbf16>, vector<16x64xbf16>, vector<1x64xf32> -> vector<1x64xf32>
    %163 = arith.addf %157, %162 : vector<1x64xf32>
    %c7 = arith.constant 7 : index
    %c0_194 = arith.constant 0 : index
    %164 = vector.load %arg32[%c7, %c0_194] : memref<10x128xf32, #tpu.memory_space<vmem>>, vector<1x16xf32>
    %165 = arith.truncf %164 : vector<1x16xf32> to vector<1x16xbf16>
    %c7_195 = arith.constant 7 : index
    %c0_196 = arith.constant 0 : index
    %c0_197 = arith.constant 0 : index
    %166 = vector.load %arg10[%c7_195, %c0_196, %c0_197] : memref<10x16x64xbf16, #tpu.memory_space<vmem>>, vector<1x16x64xbf16>
    %167 = vector.shape_cast %166 : vector<1x16x64xbf16> to vector<16x64xbf16>
    %cst_198 = arith.constant dense<0.000000e+00> : vector<1x64xf32>
    %168 = tpu.matmul %165, %167, %cst_198 {dimension_numbers = #tpu.dot_dimension_numbers<[1], [0], [0], [1], [0, 0, 1, 1], [], []>} : vector<1x16xbf16>, vector<16x64xbf16>, vector<1x64xf32> -> vector<1x64xf32>
    %169 = arith.addf %163, %168 : vector<1x64xf32>
    %c8 = arith.constant 8 : index
    %c0_199 = arith.constant 0 : index
    %170 = vector.load %arg32[%c8, %c0_199] : memref<10x128xf32, #tpu.memory_space<vmem>>, vector<1x16xf32>
    %171 = arith.truncf %170 : vector<1x16xf32> to vector<1x16xbf16>
    %c8_200 = arith.constant 8 : index
    %c0_201 = arith.constant 0 : index
    %c0_202 = arith.constant 0 : index
    %172 = vector.load %arg10[%c8_200, %c0_201, %c0_202] : memref<10x16x64xbf16, #tpu.memory_space<vmem>>, vector<1x16x64xbf16>
    %173 = vector.shape_cast %172 : vector<1x16x64xbf16> to vector<16x64xbf16>
    %cst_203 = arith.constant dense<0.000000e+00> : vector<1x64xf32>
    %174 = tpu.matmul %171, %173, %cst_203 {dimension_numbers = #tpu.dot_dimension_numbers<[1], [0], [0], [1], [0, 0, 1, 1], [], []>} : vector<1x16xbf16>, vector<16x64xbf16>, vector<1x64xf32> -> vector<1x64xf32>
    %175 = arith.addf %169, %174 : vector<1x64xf32>
    %c9 = arith.constant 9 : index
    %c0_204 = arith.constant 0 : index
    %176 = vector.load %arg32[%c9, %c0_204] : memref<10x128xf32, #tpu.memory_space<vmem>>, vector<1x16xf32>
    %177 = arith.truncf %176 : vector<1x16xf32> to vector<1x16xbf16>
    %c9_205 = arith.constant 9 : index
    %c0_206 = arith.constant 0 : index
    %c0_207 = arith.constant 0 : index
    %178 = vector.load %arg10[%c9_205, %c0_206, %c0_207] : memref<10x16x64xbf16, #tpu.memory_space<vmem>>, vector<1x16x64xbf16>
    %179 = vector.shape_cast %178 : vector<1x16x64xbf16> to vector<16x64xbf16>
    %cst_208 = arith.constant dense<0.000000e+00> : vector<1x64xf32>
    %180 = tpu.matmul %177, %179, %cst_208 {dimension_numbers = #tpu.dot_dimension_numbers<[1], [0], [0], [1], [0, 0, 1, 1], [], []>} : vector<1x16xbf16>, vector<16x64xbf16>, vector<1x64xf32> -> vector<1x64xf32>
    %181 = arith.addf %175, %180 : vector<1x64xf32>
    %c0_209 = arith.constant 0 : index
    %c0_210 = arith.constant 0 : index
    %182 = vector.load %arg12[%c0_209, %c0_210] : memref<64x32xf32, #tpu.memory_space<vmem>>, vector<64x32xf32>
    %cst_211 = arith.constant dense<0.000000e+00> : vector<1x32xf32>
    %183 = tpu.matmul %181, %182, %cst_211 {dimension_numbers = #tpu.dot_dimension_numbers<[1], [0], [0], [1], [0, 0, 1, 1], [], []>} : vector<1x64xf32>, vector<64x32xf32>, vector<1x32xf32> -> vector<1x32xf32>
    %c0_212 = arith.constant 0 : index
    %c0_213 = arith.constant 0 : index
    %184 = vector.load %arg13[%c0_212, %c0_213] : memref<1x32xf32, #tpu.memory_space<vmem>>, vector<1x32xf32>
    %185 = arith.addf %183, %184 : vector<1x32xf32>
    %c0_214 = arith.constant 0 : index
    %c0_215 = arith.constant 0 : index
    %186 = vector.load %arg14[%c0_214, %c0_215] : memref<32x16xf32, #tpu.memory_space<vmem>>, vector<32x16xf32>
    %cst_216 = arith.constant dense<0.000000e+00> : vector<1x16xf32>
    %187 = tpu.matmul %185, %186, %cst_216 {dimension_numbers = #tpu.dot_dimension_numbers<[1], [0], [0], [1], [0, 0, 1, 1], [], []>} : vector<1x32xf32>, vector<32x16xf32>, vector<1x16xf32> -> vector<1x16xf32>
    %c0_217 = arith.constant 0 : index
    %c0_218 = arith.constant 0 : index
    %188 = vector.load %arg15[%c0_217, %c0_218] : memref<1x16xf32, #tpu.memory_space<vmem>>, vector<1x16xf32>
    %189 = arith.addf %187, %188 : vector<1x16xf32>
    %c0_219 = arith.constant 0 : index
    %c0_220 = arith.constant 0 : index
    %190 = vector.load %arg16[%c0_219, %c0_220] : memref<16x4xf32, #tpu.memory_space<vmem>>, vector<16x4xf32>
    %cst_221 = arith.constant dense<0.000000e+00> : vector<1x4xf32>
    %191 = tpu.matmul %189, %190, %cst_221 {dimension_numbers = #tpu.dot_dimension_numbers<[1], [0], [0], [1], [0, 0, 1, 1], [], []>} : vector<1x16xf32>, vector<16x4xf32>, vector<1x4xf32> -> vector<1x4xf32>
    %c0_222 = arith.constant 0 : index
    %c0_223 = arith.constant 0 : index
    %192 = vector.load %arg17[%c0_222, %c0_223] : memref<1x4xf32, #tpu.memory_space<vmem>>, vector<1x4xf32>
    %193 = arith.addf %191, %192 : vector<1x4xf32>
    %c0_224 = arith.constant 0 : index
    %c0_225 = arith.constant 0 : index
    %194 = vector.load %arg18[%c0_224, %c0_225] : memref<4x2xf32, #tpu.memory_space<vmem>>, vector<4x2xf32>
    %cst_226 = arith.constant dense<0.000000e+00> : vector<1x2xf32>
    %195 = tpu.matmul %193, %194, %cst_226 {dimension_numbers = #tpu.dot_dimension_numbers<[1], [0], [0], [1], [0, 0, 1, 1], [], []>} : vector<1x4xf32>, vector<4x2xf32>, vector<1x2xf32> -> vector<1x2xf32>
    %c0_227 = arith.constant 0 : index
    %c0_228 = arith.constant 0 : index
    %196 = vector.load %arg19[%c0_227, %c0_228] : memref<1x2xf32, #tpu.memory_space<vmem>>, vector<1x2xf32>
    %197 = arith.addf %195, %196 : vector<1x2xf32>
    %c0_229 = arith.constant 0 : index
    %c0_230 = arith.constant 0 : index
    %c0_231 = arith.constant 0 : index
    %198 = vector.load %arg20[%c0_229, %c0_230, %c0_231] : memref<1x1x2xf32, #tpu.memory_space<vmem>>, vector<1x1x2xf32>
    %199 = vector.shape_cast %198 : vector<1x1x2xf32> to vector<1x2xf32>
    %200 = vector.shape_cast %197 : vector<1x2xf32> to vector<1x1x2xf32>
    tpu.vector_store %arg20[%c0_229, %c0_230, %c0_231], %200 {strides = array<i32>} : memref<1x1x2xf32, #tpu.memory_space<vmem>>, vector<1x1x2xf32>,
    return
  }
  func.func @transform_0(%arg0: i32) -> (i32, i32, i32) {
    %c0_i32 = arith.constant 0 : i32
    %c0_i32_0 = arith.constant 0 : i32
    %c0_i32_1 = arith.constant 0 : i32
    return %arg0, %c0_i32, %c0_i32_0 : i32, i32, i32
  }
  func.func @transform_1(%arg0: i32) -> (i32, i32) {
    %c0_i32 = arith.constant 0 : i32
    %c0_i32_0 = arith.constant 0 : i32
    %c0_i32_1 = arith.constant 0 : i32
    return %c0_i32, %c0_i32_0 : i32, i32
  }
  func.func @transform_2(%arg0: i32) -> (i32, i32) {
    %c0_i32 = arith.constant 0 : i32
    %c0_i32_0 = arith.constant 0 : i32
    %c0_i32_1 = arith.constant 0 : i32
    return %c0_i32, %c0_i32_0 : i32, i32
  }
  func.func @transform_3(%arg0: i32) -> (i32, i32) {
    %c0_i32 = arith.constant 0 : i32
    %c0_i32_0 = arith.constant 0 : i32
    %c0_i32_1 = arith.constant 0 : i32
    return %c0_i32, %c0_i32_0 : i32, i32
  }
  func.func @transform_4(%arg0: i32) -> (i32, i32) {
    %c0_i32 = arith.constant 0 : i32
    %c0_i32_0 = arith.constant 0 : i32
    %c0_i32_1 = arith.constant 0 : i32
    return %c0_i32, %c0_i32_0 : i32, i32
  }
  func.func @transform_5(%arg0: i32) -> (i32, i32) {
    %c0_i32 = arith.constant 0 : i32
    %c0_i32_0 = arith.constant 0 : i32
    %c0_i32_1 = arith.constant 0 : i32
    return %c0_i32, %c0_i32_0 : i32, i32
  }
  func.func @transform_6(%arg0: i32) -> (i32, i32) {
    %c0_i32 = arith.constant 0 : i32
    %c0_i32_0 = arith.constant 0 : i32
    %c0_i32_1 = arith.constant 0 : i32
    return %c0_i32, %c0_i32_0 : i32, i32
  }
  func.func @transform_7(%arg0: i32) -> (i32, i32) {
    %c0_i32 = arith.constant 0 : i32
    %c0_i32_0 = arith.constant 0 : i32
    %c0_i32_1 = arith.constant 0 : i32
    return %c0_i32, %c0_i32_0 : i32, i32
  }
  func.func @transform_8(%arg0: i32) -> (i32, i32) {
    %c0_i32 = arith.constant 0 : i32
    %c0_i32_0 = arith.constant 0 : i32
    %c0_i32_1 = arith.constant 0 : i32
    return %c0_i32, %c0_i32_0 : i32, i32
  }
  func.func @transform_9(%arg0: i32) -> (i32, i32, i32) {
    %c0_i32 = arith.constant 0 : i32
    %c0_i32_0 = arith.constant 0 : i32
    %c0_i32_1 = arith.constant 0 : i32
    %c0_i32_2 = arith.constant 0 : i32
    return %c0_i32, %c0_i32_0, %c0_i32_1 : i32, i32, i32
  }
  func.func @transform_10(%arg0: i32) -> (i32, i32) {
    %c0_i32 = arith.constant 0 : i32
    %c0_i32_0 = arith.constant 0 : i32
    %c0_i32_1 = arith.constant 0 : i32
    return %c0_i32, %c0_i32_0 : i32, i32
  }
  func.func @transform_11(%arg0: i32) -> (i32, i32) {
    %c0_i32 = arith.constant 0 : i32
    %c0_i32_0 = arith.constant 0 : i32
    %c0_i32_1 = arith.constant 0 : i32
    return %c0_i32, %c0_i32_0 : i32, i32
  }
  func.func @transform_12(%arg0: i32) -> (i32, i32) {
    %c0_i32 = arith.constant 0 : i32
    %c0_i32_0 = arith.constant 0 : i32
    %c0_i32_1 = arith.constant 0 : i32
    return %c0_i32, %c0_i32_0 : i32, i32
  }
  func.func @transform_13(%arg0: i32) -> (i32, i32) {
    %c0_i32 = arith.constant 0 : i32
    %c0_i32_0 = arith.constant 0 : i32
    %c0_i32_1 = arith.constant 0 : i32
    return %c0_i32, %c0_i32_0 : i32, i32
  }
  func.func @transform_14(%arg0: i32) -> (i32, i32) {
    %c0_i32 = arith.constant 0 : i32
    %c0_i32_0 = arith.constant 0 : i32
    %c0_i32_1 = arith.constant 0 : i32
    return %c0_i32, %c0_i32_0 : i32, i32
  }
  func.func @transform_15(%arg0: i32) -> (i32, i32) {
    %c0_i32 = arith.constant 0 : i32
    %c0_i32_0 = arith.constant 0 : i32
    %c0_i32_1 = arith.constant 0 : i32
    return %c0_i32, %c0_i32_0 : i32, i32
  }
  func.func @transform_16(%arg0: i32) -> (i32, i32) {
    %c0_i32 = arith.constant 0 : i32
    %c0_i32_0 = arith.constant 0 : i32
    %c0_i32_1 = arith.constant 0 : i32
    return %c0_i32, %c0_i32_0 : i32, i32
  }
  func.func @transform_17(%arg0: i32) -> (i32, i32) {
    %c0_i32 = arith.constant 0 : i32
    %c0_i32_0 = arith.constant 0 : i32
    %c0_i32_1 = arith.constant 0 : i32
    return %c0_i32, %c0_i32_0 : i32, i32
  }
  func.func @transform_18(%arg0: i32) -> (i32, i32) {
    %c0_i32 = arith.constant 0 : i32
    %c0_i32_0 = arith.constant 0 : i32
    %c0_i32_1 = arith.constant 0 : i32
    return %c0_i32, %c0_i32_0 : i32, i32
  }
  func.func @transform_19(%arg0: i32) -> (i32, i32, i32) {
    %c0_i32 = arith.constant 0 : i32
    %c0_i32_0 = arith.constant 0 : i32
    %c0_i32_1 = arith.constant 0 : i32
    return %arg0, %c0_i32, %c0_i32_0 : i32, i32, i32
  }
}

</mosaic_0001>

<bundles_post_ra>
// kernel: decoder_forward.1
= control target key start
LH: loop header
LB: loop body
LE: loop exit
PB: predicated region body
PF: predicated region fallthrough
CT: control target
= control target key end

     0   :  { %s7871_s0 = inlined_call_operand.vmem [shape: f32[2,256,32], index: 0, kind: input, shape index: {}]   ;;  %s7872_s1 = inlined_call_operand.hbm [shape: bf16[384,128], index: 1, kind: input, shape index: {}]   ;;  %s7873_s2 = inlined_call_operand.hbm [shape: f32[1,128], index: 2, kind: input, shape index: {}]   ;;  %s7874_s3 = inlined_call_operand.hbm [shape: bf16[384,128], index: 3, kind: input, shape index: {}]   ;;  %s7875_s4 = inlined_call_operand.hbm [shape: f32[1,128], index: 4, kind: input, shape index: {}]   ;;  %s7876_s5 = inlined_call_operand.vmem [shape: bf16[640,128], index: 5, kind: input, shape index: {}]   ;;  %s7877_s6 = inlined_call_operand.hbm [shape: f32[1,128], index: 6, kind: input, shape index: {}]   ;;  %s7878_s7 = inlined_call_operand.vmem [shape: bf16[640,128], index: 7, kind: input, shape index: {}]   ;;  %s7879_s8 = inlined_call_operand.hbm [shape: f32[1,128], index: 8, kind: input, shape index: {}]   ;;  %s7880_s9 = inlined_call_operand.hbm [shape: bf16[10,16,64], index: 9, kind: input, shape index: {}]   ;;  %s7881_s10 = inlined_call_operand.hbm [shape: f32[1,64], index: 10, kind: input, shape index: {}]   ;;  %s7882_s11 = inlined_call_operand.vmem [shape: f32[64,32], index: 11, kind: input, shape index: {}]   ;;  %s7883_s12 = inlined_call_operand.hbm [shape: f32[1,32], index: 12, kind: input, shape index: {}]   ;;  %s7884_s13 = inlined_call_operand.vmem [shape: f32[32,16], index: 13, kind: input, shape index: {}]   ;;  %s7885_s14 = inlined_call_operand.hbm [shape: f32[1,16], index: 14, kind: input, shape index: {}]   ;;  %s7886_s15 = inlined_call_operand.vmem [shape: f32[16,4], index: 15, kind: input, shape index: {}]   ;;  %s7887_s16 = inlined_call_operand.hbm [shape: f32[1,4], index: 16, kind: input, shape index: {}]   ;;  %s7888_s17 = inlined_call_operand.vmem [shape: f32[4,2], index: 17, kind: input, shape index: {}]   ;;  %s7889_s18 = inlined_call_operand.hbm [shape: f32[1,2], index: 18, kind: input, shape index: {}]   ;;  %s7890_s19 = inlined_call_operand.hbm [shape: f32[2,1,2], index: 19, kind: output, shape index: {}]  }
   0x1   :  { %7900 = sst [smem:[#allocation50_spill]] %s7871_s0 }
   0x2   :  { %7901 = sst [smem:[#allocation51_spill]] %s7872_s1 }
   0x3   :  { %7902 = sst [smem:[#allocation52_spill]] %s7873_s2 }
   0x4   :  { %7903 = sst [smem:[#allocation53_spill]] %s7874_s3 }
   0x5   :  { %7904 = sst [smem:[#allocation54_spill]] %s7875_s4 }
   0x6   :  { %7905 = sst [smem:[#allocation55_spill]] %s7879_s8 }
   0x7   :  { %7906 = sst [smem:[#allocation56_spill]] %s7881_s10 }
   0x8   :  { %7907 = sst [smem:[#allocation57_spill]] %s7885_s14 }
   0x9   :  { %7908 = sst [smem:[#allocation58_spill]] %s7890_s19 }
   0xa   :  { %24 = vsyncpa [#allocation15], 0 }
   0xb   :  { %25 = vsyncpa [#allocation18], 0 }
   0xc   :  { %26 = vsyncpa [#allocation21], 0 }
   0xd   :  { %27 = vsyncpa [#allocation24], 0 }
   0xe   :  { %28 = vsyncpa [#allocation27], 0 }
   0xf   :  { %29 = vsyncpa [#allocation30], 0 }
  0x10   :  { %30 = vsyncpa [#allocation33], 0 }
  0x11   :  { %31 = vsyncpa [#allocation16], 0 }
  0x12   :  { %33 = vsyncpa [#allocation16 + $0x1], 0  ;;  %s6898_s0 = smov 0   ;;  %s6900_s30 = smov 0  }
  0x13   :  { %s6902_s20 = smov 0   ;;  %s6904_s21 = smov 0  }
  0x14 LB: > { %7909 = sst [smem:[#allocation43_spill]] %s6769_s0  ;;  %s6919_s1 = sadd.s32 4294967295, %s6781_s21   ;;  %s6781_s21 = sphi %s6904_s21, %s7937_s21   ;;  %s6777_s20 = sphi %s6902_s20, %s7939_s20   ;;  %s6773_s30 = sphi %s6900_s30, %s7941_s30   ;;  %s6769_s0 = sphi %s6898_s0, %s7940_s0  }
  0x15   : > { %7910 = sst [smem:[#allocation44_spill]] %s6777_s20  ;;  %s4940_s22 = sadd.s32 4294967294, %s6781_s21  }
  0x16   : > { %7911 = sst [smem:[#allocation45_spill]] %s6781_s21  ;;  %s6923_s2 = sadd.s32 1, %s6781_s21  }
  0x17   : > { %7912 = sst [smem:[#allocation46_spill]] %s6923_s2  ;;  %s450_s23 = sadd.s32 1, %s6777_s20 }
  0x18   : > { %s447_s24 = ssub.s32 %s6781_s21, %s6923_s2  ;;  %p460_p0 = scmp.ne.s32.totalorder %s6777_s20, %s6773_s30 }
  0x19   : > { %p448_p1 = scmp.eq.s32.totalorder %s447_s24, 0  ;;  %p461_p2 = scmp.eq.s32.totalorder %s6919_s1, 1 }
  0x1a   : > { %p466_p3 = scmp.ne.s32.totalorder %s6773_s30, %s6769_s0  ;;  %p467_p4 = scmp.eq.s32.totalorder %s4940_s22, 1 }
  0x1b   : > { %s6934_s25 = scalar_select %p448_p1, %s6777_s20, %s450_s23  }
  0x1c   : > { %p6936_p5 = por %p461_p2, %p460_p0  ;;  %p6940_p6 = por %p467_p4, %p466_p3 }
  0x1d   : > { %7913 = sst [smem:[#allocation47_spill]] %s6934_s25  ;;  %p4941_p7 = scmp.ge.s32.totalorder %s6781_s21, 1 }
  0x1e   : > { %s7914_s3 = scalar_select %p6936_p5, 1, 0 }
  0x1f   : > { %s7916_s26 = scalar_select %p6940_p6, 1, 0 }
  0x20   : > { %7915 = sst [smem:[#allocation48_spill]] %s7914_s3  ;;  %p474_p8 = scmp.lt.s32.totalorder %s6781_s21, 3 }
  0x21   : > { %7917 = sst [smem:[#allocation49_spill]] %s7916_s26  ;;  %p6254_p9 = scmp.eq.s32.totalorder %s6919_s1, 0 }
  0x22   : > { %p6947_p10 = pnand %p4941_p7, %p474_p8  ;;  %s7919_s22 = sld [smem:[#allocation52_spill]] }
  0x23   : > { %s6783_s24 = smov [#allocation17]   ;;  %s7920_s4 = sld [smem:[#allocation54_spill]] }
  0x24   : > { %p6213_p11 = pneg %p6947_p10  ;;  %s502_s25 = sshll.u32 %s6783_s24, 4  ;;  %s503_s25 = int_to_ptr.vmem [resolvable:$true] %s502_s25 }
  0x25   : > { %s7922_s8 = sld [smem:[#allocation55_spill]]  ;;  %s6784_s21 = smov [#allocation20]  }
  0x26   : > { %p6961_p12 = pnand %p6254_p9, %p6213_p11  ;;  %s528_s24 = sshll.u32 %s6784_s21, 4  ;;  %s529_s24 = int_to_ptr.vmem [resolvable:$true] %s528_s24 }
  0x27   : > { %s7923_s10 = sld [smem:[#allocation56_spill]]  ;;  %s6785_s3 = smov [#allocation23]  }
  0x28   : > { %s500_s23 = sshll.u32 %s7919_s22, 4  ;;  %s558_s19 = sshll.u32 %s6785_s3, 4  ;;  %s501_s23 = int_to_ptr.hbm [resolvable:$true] %s500_s23  ;;  %s559_s19 = int_to_ptr.vmem [resolvable:$true] %s558_s19 }
  0x29   : > { %s526_s26 = sshll.u32 %s7920_s4, 4  ;;  %s6786_s28 = smov [#allocation26]   ;;  %s527_s26 = int_to_ptr.hbm [resolvable:$true] %s526_s26 }
  0x2a   : > { %6219 = dma.hbm_to_vmem [thread:$0]  (!%p6961_p12), %s501_s23, 16, %s503_s25, [#allocation18]  }
  0x2b   : > { %s556_s22 = sshll.u32 %s7922_s8, 4  ;;  %s584_s21 = sshll.u32 %s6786_s28, 4  ;;  %s557_s22 = int_to_ptr.hbm [resolvable:$true] %s556_s22  ;;  %s585_s21 = int_to_ptr.vmem [resolvable:$true] %s584_s21 }
  0x2c   : > { %6225 = dma.hbm_to_vmem [thread:$0]  (!%p6961_p12), %s527_s26, 16, %s529_s24, [#allocation21]  }
  0x2d   : > { %s582_s4 = sshll.u32 %s7923_s10, 4  ;;  %s7924_s14 = sld [smem:[#allocation57_spill]]  ;;  %s583_s4 = int_to_ptr.hbm [resolvable:$true] %s582_s4 }
  0x2e   : > { %6231 = dma.hbm_to_vmem [thread:$0]  (!%p6961_p12), %s557_s22, 16, %s559_s19, [#allocation24]  }
  0x2f   : > { %6237 = dma.hbm_to_vmem [thread:$0]  (!%p6961_p12), %s583_s4, 16, %s585_s21, [#allocation27]  }
  0x30   : > { %s7925_s24 = sld [smem:[#allocation51_spill]]  ;;  %s6787_s3 = smov [#allocation29]  }
  0x31   : > { %s614_s2 = sshll.u32 %s6787_s3, 4  ;;  %s6788_s19 = smov [#allocation14]   ;;  %s615_s2 = int_to_ptr.vmem [resolvable:$true] %s614_s2 }
  0x32   : > { %s487_s22 = sshll.u32 %s6788_s19, 4  ;;  %s6789_s8 = smov 64   ;;  %s488_s22 = int_to_ptr.vmem [resolvable:$true] %s487_s22 }
  0x33   : > { %s612_s25 = sshll.u32 %s7924_s14, 4  ;;  %s6790_s28 = smov 4   ;;  %s613_s25 = int_to_ptr.hbm [resolvable:$true] %s612_s25 }
  0x34   : > { %6243 = dma.hbm_to_vmem [thread:$0]  (!%p6961_p12), %s613_s25, 16, %s615_s2, [#allocation30]  }
  0x35   : > { %s7926_s29 = sld [smem:[#allocation53_spill]]  ;;  %s6791_s23 = smov [#allocation19]  }
  0x36   : > { %s485_s20 = sshll.u32 %s7925_s24, 4  ;;  %s513_s24 = sshll.u32 %s6791_s23, 4  ;;  %s486_s20 = int_to_ptr.hbm [resolvable:$true] %s485_s20  ;;  %s514_s24 = int_to_ptr.vmem [resolvable:$true] %s513_s24 }
  0x37   : > { %6216 = dma.hbm_to_vmem [thread:$0]  (!%p6961_p12), %s486_s20, 3072, %s488_s22, [#allocation15], %s6789_s8, %s6789_s8, %s6790_s28  }
  0x38   : > { %s541_s25 = sshll.u32 %s7877_s6, 4  ;;  %s6792_s2 = smov [#allocation22]   ;;  %s542_s25 = int_to_ptr.hbm [resolvable:$true] %s541_s25 }
  0x39   : > { %s543_s19 = sshll.u32 %s6792_s2, 4  ;;  %s567_s22 = sshll.u32 %s7880_s9, 4  ;;  %s544_s19 = int_to_ptr.vmem [resolvable:$true] %s543_s19  ;;  %s568_s22 = int_to_ptr.hbm [resolvable:$true] %s567_s22 }
  0x3a   : > { %6228 = dma.hbm_to_vmem [thread:$0]  (!%p6961_p12), %s542_s25, 16, %s544_s19, [#allocation21]  }
  0x3b   : > { %s511_s26 = sshll.u32 %s7926_s29, 4  ;;  %s597_s29 = sshll.u32 %s7883_s12, 4  ;;  %s512_s26 = int_to_ptr.hbm [resolvable:$true] %s511_s26  ;;  %s598_s29 = int_to_ptr.hbm [resolvable:$true] %s597_s29 }
  0x3c   : > { %6222 = dma.hbm_to_vmem [thread:$0]  (!%p6961_p12), %s512_s26, 3072, %s514_s24, [#allocation18], %s6789_s8, %s6789_s8, %s6790_s28  }
  0x3d   : > { %s6793_s10 = smov [#allocation25]   ;;  %s6794_s26 = smov [#allocation28]  }
  0x3e   : > { %s569_s23 = sshll.u32 %s6793_s10, 4  ;;  %s599_s14 = sshll.u32 %s6794_s26, 4  ;;  %s570_s23 = int_to_ptr.vmem [resolvable:$true] %s569_s23  ;;  %s600_s14 = int_to_ptr.vmem [resolvable:$true] %s599_s14 }
  0x3f   : > { %6234 = dma.hbm_to_vmem [thread:$0]  (!%p6961_p12), %s568_s22, 1280, %s570_s23, [#allocation24], %s6789_s8, %s6789_s8, %s6790_s28  }
  0x40   : > { %s627_s2 = sshll.u32 %s7887_s16, 4  ;;  %s642_s20 = sshll.u32 %s7889_s18, 4  ;;  %s628_s2 = int_to_ptr.hbm [resolvable:$true] %s627_s2  ;;  %s643_s20 = int_to_ptr.hbm [resolvable:$true] %s642_s20 }
  0x41   : > { %6240 = dma.hbm_to_vmem [thread:$0]  (!%p6961_p12), %s598_s29, 16, %s600_s14, [#allocation27]  }
  0x42   : > { %s6795_s4 = smov [#allocation31]   ;;  %s6796_s8 = smov [#allocation32]  }
  0x43   : > { %s629_s21 = sshll.u32 %s6795_s4, 4  ;;  %s644_s28 = sshll.u32 %s6796_s8, 4  ;;  %s630_s21 = int_to_ptr.vmem [resolvable:$true] %s629_s21  ;;  %s645_s28 = int_to_ptr.vmem [resolvable:$true] %s644_s28 }
  0x44   : > { %6246 = dma.hbm_to_vmem [thread:$0]  (!%p6961_p12), %s628_s2, 16, %s630_s21, [#allocation30]  }
  0x45   : > { %6249 = dma.hbm_to_vmem [thread:$0]  (!%p6961_p12), %s643_s20, 16, %s645_s28, [#allocation33]  }
  0x46   : > { %665 = sbr.rel (%p6947_p10) target bundleno = 2080 (0x820), region = 96 }
  0x4b   : > { %6736 = dma.done.wait (%p6254_p9), [#allocation15], 3072  }
  0x4c   : > { %6738 = vsyncadd (%p6254_p9), [#allocation15], 4294964224 }
  0x4d   : > { %6740 = dma.done.wait (%p6254_p9), [#allocation18], 3088  }
  0x4e   : > { %6742 = vsyncadd (%p6254_p9), [#allocation18], 4294964208 }
  0x4f   : > { %6744 = dma.done.wait (%p6254_p9), [#allocation21], 32  }
  0x50   : > { %6746 = vsyncadd (%p6254_p9), [#allocation21], 4294967264 }
  0x51   : > { %6748 = dma.done.wait (%p6254_p9), [#allocation24], 1296  }
  0x52   : > { %6750 = vsyncadd (%p6254_p9), [#allocation24], 4294966000 }
  0x53   : > { %6752 = dma.done.wait (%p6254_p9), [#allocation27], 32  }
  0x54   : > { %6754 = vsyncadd (%p6254_p9), [#allocation27], 4294967264 }
  0x55   : > { %6756 = dma.done.wait (%p6254_p9), [#allocation30], 32  }
  0x56   : > { %6758 = vsyncadd (%p6254_p9), [#allocation30], 4294967264 }
  0x57   : > { %6760 = dma.done.wait (%p6254_p9), [#allocation33], 16  }
  0x58   : > { %6762 = vsyncadd (%p6254_p9), [#allocation33], 4294967280  ;;  %p776_p13 = scmp.lt.s32.totalorder %s6919_s1, 1  ;;  %v6797_v0 = vmov 0   ;;  %v5983_v1 = vld [vmem:[#allocation14 + $0x38] sm:$0xff]  ;;  %v5982_v4 = vld [vmem:[#allocation14 + $0x30] sm:$0xff] }
  0x59   : > { %782 = vst [vmem:[#allocation2] sm:$0xff] %v6797_v0  ;;  %v5991_v2 = vld [vmem:[#allocation14 + $0x78] sm:$0xff]  ;;  %1652 = vmatpush.bf16.msra.mxu0 %v5983_v1  ;;  %v5990_v5 = vld [vmem:[#allocation14 + $0x70] sm:$0xff]  ;;  %s7927_s10 = sld [smem:[#allocation50_spill]]  ;;  %v5981_v7 = vld [vmem:[#allocation14 + $0x28] sm:$0xff]  ;;  %vm910_vm0 = vcmask 257024  }
  0x5a   : > { %784 = vst [vmem:[#allocation2 + $0xc] sm:$0xff] %v6797_v0  ;;  %s777_s0 = scalar_select %p776_p13, %s6919_s1, 1  ;;  %v5999_v3 = vld [vmem:[#allocation14 + $0xb8] sm:$0xff]  ;;  %1741 = vmatpush.bf16.msra.mxu1 %v5991_v2  ;;  %v5998_v6 = vld [vmem:[#allocation14 + $0xb0] sm:$0xff]  ;;  %v5989_v8 = vld [vmem:[#allocation14 + $0x68] sm:$0xff]  ;;  %vm942_vm1 = vcmask 256000  }
  0x5b   : > { %783 = vst [vmem:[#allocation2 + $0x8] sm:$0xf] %v6797_v0  ;;  %1830 = vmatpush.bf16.msra.mxu2 %v5999_v3  ;;  %v5997_v9 = vld [vmem:[#allocation14 + $0xa8] sm:$0xff]  ;;  %v5980_v12 = vld [vmem:[#allocation14 + $0x20] sm:$0xff]  ;;  %v5979_v17 = vld [vmem:[#allocation14 + $0x18] sm:$0xff]  ;;  %vm2995_vm2 = vcmask 1040384  }
  0x5c   : > { %785 = vst [vmem:[#allocation2 + $0x14] sm:$0xf] %v6797_v0  ;;  %s5927_s27 = sshll.u32 %s777_s0, 8  ;;  %v5988_v15 = vld [vmem:[#allocation14 + $0x60] sm:$0xff]  ;;  %v5987_v18 = vld [vmem:[#allocation14 + $0x58] sm:$0xff]  ;;  %v5978_v20 = vld [vmem:[#allocation14 + $0x10] sm:$0xff] }
  0x5d   : > { %786 = vst [vmem:[#allocation2 + $0x18] sm:$0xff] %v6797_v0  ;;  %1653 = vmatpush.bf16.msra.mxu0 %v5982_v4  ;;  %v5996_v16 = vld [vmem:[#allocation14 + $0xa0] sm:$0xff]  ;;  %v5995_v19 = vld [vmem:[#allocation14 + $0x98] sm:$0xff]  ;;  %v5986_v21 = vld [vmem:[#allocation14 + $0x50] sm:$0xff]  ;;  %vm2996_vm3 = vsmask.f32 256 }
  0x5e   : > { %787 = vst [vmem:[#allocation2 + $0x20] sm:$0xf] %v6797_v0  ;;  %1742 = vmatpush.bf16.msra.mxu1 %v5990_v5  ;;  %v5994_v22 = vld [vmem:[#allocation14 + $0x90] sm:$0xff]  ;;  %v5977_v23 = vld [vmem:[#allocation14 + $0x8] sm:$0xff]  ;;  %v5976_v26 = vld [vmem:[#allocation14] sm:$0xff]  ;;  %vm3799_vm5 = vcmask 1043456  }
  0x5f   : > { %788 = vst [vmem:[#allocation2 + $0x24] sm:$0xff] %v6797_v0  ;;  %s7065_s23 = scalar_lea.vmem %s7927_s10, %s5927_s27  ;;  %1831 = vmatpush.bf16.msra.mxu2 %v5998_v6  ;;  %v5985_v24 = vld [vmem:[#allocation14 + $0x48] sm:$0xff]  ;;  %v5984_v27 = vld [vmem:[#allocation14 + $0x40] sm:$0xff]  ;;  %vm7593_vm4 = vmand %vm2995_vm2, %vm2996_vm3  ;;  %vm3800_vm6 = vsmask.f32 3328  ;;  %vm4365_vm8 = vcmask 130048  }
  0x60   : > { %789 = vst [vmem:[#allocation2 + $0x2c] sm:$0xf] %v6797_v0  ;;  %v846_v10 = vld [vmem:[%s7065_s23] sm:$0xff]  ;;  %v847_v11 = vld [vmem:[%s7065_s23 + $0x8] sm:$0xff]  ;;  %v848_v38 = vld [vmem:[%s7065_s23 + $0x10] sm:$0xff]  ;;  %vm4644_vm9 = vcmask 523264  }
  0x61   : > { %790 = vst [vmem:[#allocation2 + $0x30] sm:$0xff] %v6797_v0  ;;  %v878_v13 = vpack.c.bf16 %v846_v10, %v846_v10  ;;  %v879_v14 = vpack.c.bf16 %v847_v11, %v847_v11  ;;  %1654 = vmatpush.bf16.msra.mxu0 %v5981_v7  ;;  %v5993_v25 = vld [vmem:[#allocation14 + $0x88] sm:$0xff]  ;;  %v5992_v30 = vld [vmem:[#allocation14 + $0x80] sm:$0xff]  ;;  %v849_v40 = vld [vmem:[%s7065_s23 + $0x18] sm:$0xff]  ;;  %v880_v43 = vpack.c.bf16 %v848_v38, %v848_v38  ;;  %vm4673_vm10 = vcmask 261120   ;;  %s774_s8 = sand.u32 1, %s6773_s30  }
  0x62   : > { %791 = vst [vmem:[#allocation2 + $0x38] sm:$0xf] %v6797_v0  ;;  %1743 = vmatpush.bf16.msra.mxu1 %v5989_v8  ;;  %v944_v32 = vld [vmem:[%s7065_s23 + $0x1] sm:$0xff]  ;;  %v945_v33 = vld [vmem:[%s7065_s23 + $0x9] sm:$0xff]  ;;  %v946_v42 = vld [vmem:[%s7065_s23 + $0x11] sm:$0xff]  ;;  %v881_v45 = vpack.c.bf16 %v849_v40, %v849_v40  ;;  %vm4725_vm11 = vcmask 31744  }
  0x63   : > { %792 = vst [vmem:[#allocation2 + $0x3c] sm:$0xff] %v6797_v0  ;;  %1832 = vmatpush.bf16.msra.mxu2 %v5997_v9  ;;  %v1040_v34 = vld [vmem:[%s7065_s23 + $0x2] sm:$0xff]  ;;  %v976_v35 = vpack.c.bf16 %v944_v32, %v944_v32  ;;  %v1041_v36 = vld [vmem:[%s7065_s23 + $0xa] sm:$0xff]  ;;  %v977_v37 = vpack.c.bf16 %v945_v33, %v945_v33  ;;  %v947_v44 = vld [vmem:[%s7065_s23 + $0x19] sm:$0xff]  ;;  %v978_v47 = vpack.c.bf16 %v946_v42, %v946_v42  ;;  %s7932_s27 = sld [smem:[#allocation58_spill]]  ;;  %s775_s10 = scalar_lea.vmem [#allocation34], %s774_s8 }
  0x64   : > { %793 = vst [vmem:[#allocation2 + $0x44] sm:$0xf] %v6797_v0  ;;  %v1072_v39 = vpack.c.bf16 %v1040_v34, %v1040_v34  ;;  %v1073_v41 = vpack.c.bf16 %v1041_v36, %v1041_v36  ;;  %v1042_v46 = vld [vmem:[%s7065_s23 + $0x12] sm:$0xff]  ;;  %v1043_v48 = vld [vmem:[%s7065_s23 + $0x1a] sm:$0xff]  ;;  %v979_v49 = vpack.c.bf16 %v947_v44, %v947_v44  ;;  %v851_v52 = vld [vmem:[%s7065_s23 + $0x28] sm:$0xff]  ;;  %vm4753_vm12 = vcmask 8192  }
  0x65   : > { %794 = vst [vmem:[#allocation2 + $0x48] sm:$0xff] %v6797_v0  ;;  %1655 = vmatpush.bf16.msra.mxu0 %v5980_v12  ;;  %v850_v50 = vld [vmem:[%s7065_s23 + $0x20] sm:$0xff]  ;;  %v1074_v51 = vpack.c.bf16 %v1042_v46, %v1042_v46  ;;  %v1075_v53 = vpack.c.bf16 %v1043_v48, %v1043_v48  ;;  %v949_v56 = vld [vmem:[%s7065_s23 + $0x29] sm:$0xff]  ;;  %v883_v58 = vpack.c.bf16 %v851_v52, %v851_v52  ;;  %v853_v10 = vld [vmem:[%s7065_s23 + $0x38] sm:$0xff]  ;;  %s4756_s14 = scalar_lea.sflag [#allocation16], %s774_s8 }
  0x66   : > { %795 = vst [vmem:[#allocation2 + $0x50] sm:$0xf] %v6797_v0  ;;  %1744 = vmatpush.bf16.msra.mxu1 %v5988_v15  ;;  %v948_v54 = vld [vmem:[%s7065_s23 + $0x21] sm:$0xff]  ;;  %v882_v55 = vpack.c.bf16 %v850_v50, %v850_v50  ;;  %v1045_v62 = vld [vmem:[%s7065_s23 + $0x2a] sm:$0xff]  ;;  %v981_v1 = vpack.c.bf16 %v949_v56, %v949_v56  ;;  %v885_v12 = vpack.c.bf16 %v853_v10, %v853_v10  ;;  %v857_v52 = vld [vmem:[%s7065_s23 + $0x58] sm:$0xff] }
  0x67   : > { %796 = vst [vmem:[#allocation2 + $0x54] sm:$0xff] %v6797_v0  ;;  %1833 = vmatpush.bf16.msra.mxu2 %v5996_v16  ;;  %v1044_v59 = vld [vmem:[%s7065_s23 + $0x22] sm:$0xff]  ;;  %v980_v61 = vpack.c.bf16 %v948_v54, %v948_v54  ;;  %v1077_v6 = vpack.c.bf16 %v1045_v62, %v1045_v62  ;;  %v852_v9 = vld [vmem:[%s7065_s23 + $0x30] sm:$0xff]  ;;  %v889_v54 = vpack.c.bf16 %v857_v52, %v857_v52  ;;  %v955_v56 = vld [vmem:[%s7065_s23 + $0x59] sm:$0xff] }
  0x68   : > { %797 = vst [vmem:[#allocation2 + $0x5c] sm:$0xf] %v6797_v0  ;;  %v1076_v3 = vpack.c.bf16 %v1044_v59, %v1044_v59  ;;  %v884_v11 = vpack.c.bf16 %v852_v9, %v852_v9  ;;  %v952_v34 = vld [vmem:[%s7065_s23 + $0x41] sm:$0xff]  ;;  %v1050_v59 = vld [vmem:[%s7065_s23 + $0x52] sm:$0xff]  ;;  %vm7768_vm7 = vmand %vm3799_vm5, %vm3800_vm6 }
  0x69   : > { %798 = vst [vmem:[#allocation2 + $0x60] sm:$0xff] %v6797_v0  ;;  %1656 = vmatpush.bf16.msra.mxu0 %v5979_v17  ;;  %v1046_v17 = vld [vmem:[%s7065_s23 + $0x32] sm:$0xff]  ;;  %v984_v36 = vpack.c.bf16 %v952_v34, %v952_v34  ;;  %v1048_v38 = vld [vmem:[%s7065_s23 + $0x42] sm:$0xff]  ;;  %s4764_s22 = scalar_lea.hbm %s7932_s27, %s6919_s1  ;;  %s6711_s25 = scalar_lea.hbm %s7932_s27, 2 }
  0x6a   : > { %911 = vst.msk [vmem:[#allocation2] sm:$0xf] %vm910_vm0, %v878_v13  ;;  %1745 = vmatpush.bf16.msra.mxu1 %v5987_v18  ;;  %v950_v13 = vld [vmem:[%s7065_s23 + $0x31] sm:$0xff]  ;;  %v1047_v18 = vld [vmem:[%s7065_s23 + $0x3a] sm:$0xff]  ;;  %v1080_v40 = vpack.c.bf16 %v1048_v38, %v1048_v38  ;;  %v859_v9 = vld [vmem:[%s7065_s23 + $0x68] sm:$0xff]  ;;  %s4768_s26 = sshll.u32 %s4764_s22, 4  ;;  %s4769_s26 = int_to_ptr.hbm [resolvable:$true] %s4768_s26 }
  0x6b   : > { %912 = vst.msk [vmem:[#allocation2 + $0xc] sm:$0xf] %vm910_vm0, %v879_v14  ;;  %1834 = vmatpush.bf16.msra.mxu2 %v5995_v19  ;;  %v951_v14 = vld [vmem:[%s7065_s23 + $0x39] sm:$0xff]  ;;  %v982_v15 = vpack.c.bf16 %v950_v13, %v950_v13  ;;  %v1078_v19 = vpack.c.bf16 %v1046_v17, %v1046_v17  ;;  %v957_v13 = vld [vmem:[%s7065_s23 + $0x69] sm:$0xff]  ;;  %v960_v52 = vld [vmem:[%s7065_s23 + $0x81] sm:$0xff]  ;;  %s6705_s24 = sshra.s32 %s4769_s26, 4  ;;  %s6706_s24 = int_to_ptr.hbm [resolvable:$true] %s6705_s24 }
  0x6c   : > { %799 = vst [vmem:[#allocation2 + $0x68] sm:$0xf] %v6797_v0  ;;  %v983_v16 = vpack.c.bf16 %v951_v14, %v951_v14  ;;  %v1053_v17 = vld [vmem:[%s7065_s23 + $0x6a] sm:$0xff]  ;;  %v959_v34 = vld [vmem:[%s7065_s23 + $0x79] sm:$0xff]  ;;  %s6707_s3 = scalar_lea.hbm %s6706_s24, 1  ;;  %p6712_p3 = scmp.lt.s32.totalorder %s6706_s24, %s7932_s27 }
  0x6d   : > { %800 = vst [vmem:[#allocation2 + $0x6c] sm:$0xff] %v6797_v0  ;;  %1657 = vmatpush.bf16.msra.mxu0 %v5978_v20  ;;  %v1079_v20 = vpack.c.bf16 %v1047_v18, %v1047_v18  ;;  %v1055_v38 = vld [vmem:[%s7065_s23 + $0x7a] sm:$0xff]  ;;  %p6708_p0 = scmp.ne.s32.totalorder %s6706_s24, %s6707_s3  ;;  %p6713_p4 = scmp.lt.s32.totalorder %s6711_s25, %s6707_s3 }
  0x6e   : > { %801 = vst [vmem:[#allocation2 + $0x74] sm:$0xf] %v6797_v0  ;;  %1746 = vmatpush.bf16.msra.mxu1 %v5986_v21 }
  0x6f   : > { %802 = vst [vmem:[#allocation2 + $0x78] sm:$0xff] %v6797_v0  ;;  %1835 = vmatpush.bf16.msra.mxu2 %v5994_v22  ;;  %p6709_p1 = pnand %p6708_p0, %p6936_p5  ;;  %p6714_p7 = por %p6713_p4, %p6712_p3 }
  0x70   : > { %803 = vst [vmem:[#allocation2 + $0x80] sm:$0xf] %v6797_v0 }
  0x71   : > { %804 = vst [vmem:[#allocation2 + $0x84] sm:$0xff] %v6797_v0  ;;  %1658 = vmatpush.bf16.msra.mxu0 %v5977_v23  ;;  %v4972_v28 = vld [vmem:[#allocation2] sm:$0xf]  ;;  %p6710_p2 = pneg %p6709_p1 }
  0x72   : > { %805 = vst [vmem:[#allocation2 + $0x8c] sm:$0xf] %v6797_v0  ;;  %1747 = vmatpush.bf16.msra.mxu1 %v5985_v24  ;;  %v5929_v29 = vld [vmem:[#allocation2 + $0x8] sm:$0xf0] }
  0x73   : > { %806 = vst [vmem:[#allocation2 + $0x90] sm:$0xff] %v6797_v0  ;;  %1836 = vmatpush.bf16.msra.mxu2 %v5993_v25  ;;  %v4973_v31 = vor.u32 %v5929_v29, %v4972_v28  ;;  %p6715_p8 = pnand %p6714_p7, %p6710_p2 }
  0x74   : > { %807 = vst [vmem:[#allocation2 + $0x98] sm:$0xf] %v6797_v0 }
  0x75   : > { %808 = vst [vmem:[#allocation2 + $0x9c] sm:$0xff] %v6797_v0  ;;  %1659 = vmatpush.bf16.msra.mxu0 %v5976_v26 }
  0x76   : > { %809 = vst [vmem:[#allocation2 + $0xa4] sm:$0xf] %v6797_v0  ;;  %1748 = vmatpush.bf16.msra.mxu1 %v5984_v27 }
  0x77   : > { %810 = vst [vmem:[#allocation2 + $0xa8] sm:$0xff] %v6797_v0  ;;  %1837 = vmatpush.bf16.msra.mxu2 %v5992_v30  ;;  %v854_v30 = vld [vmem:[%s7065_s23 + $0x40] sm:$0xff] }
  0x78   : > { %811 = vst [vmem:[#allocation2 + $0xb0] sm:$0xf] %v6797_v0  ;;  %1660 = vmatmul.bf16.vlgmr.msra.gmra.mxu0 %v4973_v31  ;;  %v855_v31 = vld [vmem:[%s7065_s23 + $0x48] sm:$0xff]  ;;  %v886_v32 = vpack.c.bf16 %v854_v30, %v854_v30  ;;  %v861_v30 = vld [vmem:[%s7065_s23 + $0x78] sm:$0xff] }
  0x79   : > { %812 = vst [vmem:[#allocation2 + $0xb4] sm:$0xff] %v6797_v0  ;;  %v887_v33 = vpack.c.bf16 %v855_v31, %v855_v31 }
  0x7a   : > { %813 = vst [vmem:[#allocation2 + $0xbc] sm:$0xf] %v6797_v0 }
  0x7b   : > { %814 = vst [vmem:[#allocation2 + $0xc0] sm:$0xff] %v6797_v0 }
  0x7c   : > { %815 = vst [vmem:[#allocation2 + $0xc8] sm:$0xf] %v6797_v0 }
  0x7d   : > { %816 = vst [vmem:[#allocation2 + $0xcc] sm:$0xff] %v6797_v0 }
  0x7e   : > { %817 = vst [vmem:[#allocation2 + $0xd4] sm:$0xf] %v6797_v0 }
  0x7f   : > { %818 = vst [vmem:[#allocation2 + $0xd8] sm:$0xff] %v6797_v0 }
  0x80   : > { %819 = vst [vmem:[#allocation2 + $0xe0] sm:$0xf] %v6797_v0 }
  0x81   : > { %820 = vst [vmem:[#allocation2 + $0xe4] sm:$0xff] %v6797_v0 }
  0x82   : > { %821 = vst [vmem:[#allocation2 + $0xec] sm:$0xf] %v6797_v0 }
  0x83   : > { %822 = vst [vmem:[#allocation2 + $0xf0] sm:$0xff] %v6797_v0 }
  0x84   : > { %823 = vst [vmem:[#allocation2 + $0xf8] sm:$0xf] %v6797_v0 }
  0x85   : > { %824 = vst [vmem:[#allocation2 + $0xfc] sm:$0xff] %v6797_v0 }
  0x86   : > { %825 = vst [vmem:[#allocation2 + $0x104] sm:$0xf] %v6797_v0 }
  0x87   : > { %826 = vst [vmem:[#allocation2 + $0x108] sm:$0xff] %v6797_v0 }
  0x88   : > { %827 = vst [vmem:[#allocation2 + $0x110] sm:$0xf] %v6797_v0 }
  0x89   : > { %828 = vst [vmem:[#allocation2 + $0x114] sm:$0xff] %v6797_v0 }
  0x8a   : > { %829 = vst [vmem:[#allocation2 + $0x11c] sm:$0xf] %v6797_v0 }
  0x8b   : > { %830 = vst [vmem:[#allocation2 + $0x120] sm:$0xff] %v6797_v0 }
  0x8c   : > { %831 = vst [vmem:[#allocation2 + $0x128] sm:$0xf] %v6797_v0 }
  0x8d   : > { %832 = vst [vmem:[#allocation2 + $0x12c] sm:$0xff] %v6797_v0 }
  0x8e   : > { %833 = vst [vmem:[#allocation2 + $0x134] sm:$0xf] %v6797_v0 }
  0x8f   : > { %834 = vst [vmem:[#allocation2 + $0x138] sm:$0xff] %v6797_v0 }
  0x90   : > { %835 = vst [vmem:[#allocation2 + $0x140] sm:$0xf] %v6797_v0 }
  0x91   : > { %836 = vst [vmem:[#allocation2 + $0x144] sm:$0xff] %v6797_v0 }
  0x92   : > { %837 = vst [vmem:[#allocation2 + $0x14c] sm:$0xf] %v6797_v0 }
  0x93   : > { %838 = vst [vmem:[#allocation2 + $0x150] sm:$0xff] %v6797_v0 }
  0x94   : > { %839 = vst [vmem:[#allocation2 + $0x158] sm:$0xf] %v6797_v0 }
  0x95   : > { %840 = vst [vmem:[#allocation2 + $0x15c] sm:$0xff] %v6797_v0 }
  0x96   : > { %841 = vst [vmem:[#allocation2 + $0x164] sm:$0xf] %v6797_v0 }
  0x97   : > { %842 = vst [vmem:[#allocation2 + $0x168] sm:$0xff] %v6797_v0 }
  0x98   : > { %843 = vst [vmem:[#allocation2 + $0x170] sm:$0xf] %v6797_v0 }
  0x99   : > { %844 = vst [vmem:[#allocation2 + $0x174] sm:$0x77] %v6797_v0 }
  0x9a   : > { %845 = vst [vmem:[#allocation2 + $0x17c] sm:$0x7] %v6797_v0 }
  0x9b   : > { %1008 = vst.msk [vmem:[#allocation2 + $0x4] sm:$0xf] %vm910_vm0, %v976_v35  ;;  %v953_v35 = vld [vmem:[%s7065_s23 + $0x49] sm:$0xff] }
  0x9c   : > { %1009 = vst.msk [vmem:[#allocation2 + $0x10] sm:$0xf] %vm910_vm0, %v977_v37  ;;  %v985_v37 = vpack.c.bf16 %v953_v35, %v953_v35 }
  0x9d   : > { %1104 = vst.msk [vmem:[#allocation2 + $0x8] sm:$0xf] %vm910_vm0, %v1072_v39  ;;  %v1049_v39 = vld [vmem:[%s7065_s23 + $0x4a] sm:$0xff] }
  0x9e   : > { %1105 = vst.msk [vmem:[#allocation2 + $0x14] sm:$0xf] %vm910_vm0, %v1073_v41  ;;  %v1081_v41 = vpack.c.bf16 %v1049_v39, %v1049_v39 }
  0x9f   : > { %913 = vst.msk [vmem:[#allocation2 + $0x18] sm:$0xf] %vm910_vm0, %v880_v43 }
  0xa0   : > { %914 = vst.msk [vmem:[#allocation2 + $0x24] sm:$0xf] %vm910_vm0, %v881_v45 }
  0xa1   : > { %1010 = vst.msk [vmem:[#allocation2 + $0x1c] sm:$0xf] %vm910_vm0, %v978_v47 }
  0xa2   : > { %v5928_v57 = vld [vmem:[#allocation2 + $0x4] sm:$0xf]  ;;  %1011 = vst.msk [vmem:[#allocation2 + $0x28] sm:$0xf] %vm910_vm0, %v979_v49 }
  0xa3   : > { %v4974_v60 = vld [vmem:[#allocation2 + $0xc] sm:$0xf0]  ;;  %1106 = vst.msk [vmem:[#allocation2 + $0x20] sm:$0xf] %vm910_vm0, %v1074_v51 }
  0xa4   : > { %v4977_v63 = vor.u32 %v5928_v57, %v4974_v60  ;;  %v4980_v0 = vld [vmem:[#allocation2 + $0x8] sm:$0xf]  ;;  %1107 = vst.msk [vmem:[#allocation2 + $0x2c] sm:$0xf] %vm910_vm0, %v1075_v53  ;;  %v856_v51 = vld [vmem:[%s7065_s23 + $0x50] sm:$0xff]  ;;  %v1051_v60 = vld [vmem:[%s7065_s23 + $0x5a] sm:$0xff] }
  0xa5   : > { %v5930_v2 = vld [vmem:[#allocation2 + $0x10] sm:$0xf0]  ;;  %915 = vst.msk [vmem:[#allocation2 + $0x30] sm:$0xf] %vm910_vm0, %v882_v55  ;;  %v888_v53 = vpack.c.bf16 %v856_v51, %v856_v51  ;;  %v1083_v62 = vpack.c.bf16 %v1051_v60, %v1051_v60  ;;  %v863_v51 = vld [vmem:[%s7065_s23 + $0x88] sm:$0xff] }
  0xa6   : > { %1749 = vmatmul.bf16.vlgmr.msra.gmra.mxu1 %v4977_v63  ;;  %v4981_v4 = vor.u32 %v5930_v2, %v4980_v0  ;;  %v4984_v5 = vld [vmem:[#allocation2 + $0x18] sm:$0xf]  ;;  %916 = vst.msk [vmem:[#allocation2 + $0x3c] sm:$0xf] %vm910_vm0, %v883_v58  ;;  %v987_v58 = vpack.c.bf16 %v955_v56, %v955_v56  ;;  %v992_v56 = vpack.c.bf16 %v960_v52, %v960_v52 }
  0xa7   : > { %v5932_v7 = vld [vmem:[#allocation2 + $0x20] sm:$0xf0]  ;;  %1012 = vst.msk [vmem:[#allocation2 + $0x34] sm:$0xf] %vm910_vm0, %v980_v61  ;;  %v954_v55 = vld [vmem:[%s7065_s23 + $0x51] sm:$0xff]  ;;  %v1082_v61 = vpack.c.bf16 %v1050_v59, %v1050_v59 }
  0xa8   : > { %1838 = vmatmul.bf16.vlgmr.msra.gmra.mxu2 %v4981_v4  ;;  %v4985_v8 = vor.u32 %v5932_v7, %v4984_v5  ;;  %1013 = vst.msk [vmem:[#allocation2 + $0x40] sm:$0xf] %vm910_vm0, %v981_v1  ;;  %v5931_v21 = vld [vmem:[#allocation2 + $0x1c] sm:$0xf]  ;;  %v986_v57 = vpack.c.bf16 %v954_v55, %v954_v55  ;;  %v961_v55 = vld [vmem:[%s7065_s23 + $0x89] sm:$0xff] }
  0xa9   : > { %1108 = vst.msk [vmem:[#allocation2 + $0x38] sm:$0xf] %vm910_vm0, %v1076_v3  ;;  %v4986_v22 = vld [vmem:[#allocation2 + $0x24] sm:$0xf0]  ;;  %v993_v59 = vpack.c.bf16 %v961_v55, %v961_v55 }
  0xaa   : > { %1665 = vmatmul.bf16.gmra.mxu0 %v4985_v8  ;;  %1109 = vst.msk [vmem:[#allocation2 + $0x44] sm:$0xf] %vm910_vm0, %v1077_v6  ;;  %v4992_v23 = vld [vmem:[#allocation2 + $0x20] sm:$0xf]  ;;  %v4989_v25 = vor.u32 %v5931_v21, %v4986_v22 }
  0xab   : > { %917 = vst.msk [vmem:[#allocation2 + $0x48] sm:$0xf] %vm910_vm0, %v884_v11  ;;  %v5933_v24 = vld [vmem:[#allocation2 + $0x28] sm:$0xf0]  ;;  %v858_v8 = vld [vmem:[%s7065_s23 + $0x60] sm:$0xff]  ;;  %v891_v11 = vpack.c.bf16 %v859_v9, %v859_v9  ;;  %v962_v9 = vld [vmem:[%s7065_s23 + $0x91] sm:$0xff] }
  0xac   : > { %918 = vst.msk [vmem:[#allocation2 + $0x54] sm:$0xf] %vm910_vm0, %v885_v12  ;;  %v4996_v26 = vld [vmem:[#allocation2 + $0x30] sm:$0xf]  ;;  %v4993_v28 = vor.u32 %v5933_v24, %v4992_v23  ;;  %v890_v10 = vpack.c.bf16 %v858_v8, %v858_v8  ;;  %v956_v12 = vld [vmem:[%s7065_s23 + $0x61] sm:$0xff]  ;;  %v865_v8 = vld [vmem:[%s7065_s23 + $0x98] sm:$0xff] }
  0xad   : > { %1014 = vst.msk [vmem:[#allocation2 + $0x4c] sm:$0xf] %vm910_vm0, %v982_v15  ;;  %v5935_v27 = vld [vmem:[#allocation2 + $0x38] sm:$0xf0]  ;;  %v988_v14 = vpack.c.bf16 %v956_v12, %v956_v12  ;;  %v989_v15 = vpack.c.bf16 %v957_v13, %v957_v13  ;;  %v994_v13 = vpack.c.bf16 %v962_v9, %v962_v9 }
  0xae   : > { %1015 = vst.msk [vmem:[#allocation2 + $0x58] sm:$0xf] %vm910_vm0, %v983_v16  ;;  %v4997_v29 = vor.u32 %v5935_v27, %v4996_v26  ;;  %v5934_v42 = vld [vmem:[#allocation2 + $0x34] sm:$0xf]  ;;  %v1052_v16 = vld [vmem:[%s7065_s23 + $0x62] sm:$0xff]  ;;  %v963_v12 = vld [vmem:[%s7065_s23 + $0x99] sm:$0xff] }
  0xaf   : > { %1110 = vst.msk [vmem:[#allocation2 + $0x50] sm:$0xf] %vm910_vm0, %v1078_v19  ;;  %v4998_v43 = vld [vmem:[#allocation2 + $0x3c] sm:$0xf0]  ;;  %v1084_v18 = vpack.c.bf16 %v1052_v16, %v1052_v16  ;;  %v1085_v19 = vpack.c.bf16 %v1053_v17, %v1053_v17  ;;  %v995_v16 = vpack.c.bf16 %v963_v12, %v963_v12 }
  0xb0   : > { %1111 = vst.msk [vmem:[#allocation2 + $0x5c] sm:$0xf] %vm910_vm0, %v1079_v20  ;;  %v5004_v44 = vld [vmem:[#allocation2 + $0x38] sm:$0xf]  ;;  %v5001_v46 = vor.u32 %v5934_v42, %v4998_v43 }
  0xb1   : > { %919 = vst.msk [vmem:[#allocation2 + $0x60] sm:$0xf] %vm910_vm0, %v886_v32  ;;  %v5936_v45 = vld [vmem:[#allocation2 + $0x40] sm:$0xf0]  ;;  %v893_v32 = vpack.c.bf16 %v861_v30, %v861_v30  ;;  %v867_v30 = vld [vmem:[%s7065_s23 + $0xa8] sm:$0xff] }
  0xb2   : > { %920 = vst.msk [vmem:[#allocation2 + $0x6c] sm:$0xf] %vm910_vm0, %v887_v33  ;;  %v5008_v47 = vld [vmem:[#allocation2 + $0x48] sm:$0xf]  ;;  %v5005_v49 = vor.u32 %v5936_v45, %v5004_v44  ;;  %v958_v33 = vld [vmem:[%s7065_s23 + $0x71] sm:$0xff] }
  0xb3   : > { %1016 = vst.msk [vmem:[#allocation2 + $0x64] sm:$0xf] %vm910_vm0, %v984_v36  ;;  %v5938_v48 = vld [vmem:[#allocation2 + $0x50] sm:$0xf0]  ;;  %v990_v35 = vpack.c.bf16 %v958_v33, %v958_v33  ;;  %v991_v36 = vpack.c.bf16 %v959_v34, %v959_v34  ;;  %v899_v33 = vpack.c.bf16 %v867_v30, %v867_v30  ;;  %v965_v34 = vld [vmem:[%s7065_s23 + $0xa9] sm:$0xff] }
  0xb4   : > { %1017 = vst.msk [vmem:[#allocation2 + $0x70] sm:$0xf] %vm910_vm0, %v985_v37  ;;  %v5009_v50 = vor.u32 %v5938_v48, %v5008_v47  ;;  %v5937_v63 = vld [vmem:[#allocation2 + $0x4c] sm:$0xf]  ;;  %v1054_v37 = vld [vmem:[%s7065_s23 + $0x72] sm:$0xff] }
  0xb5   : > { %1112 = vst.msk [vmem:[#allocation2 + $0x68] sm:$0xf] %vm910_vm0, %v1080_v40  ;;  %v5010_v0 = vld [vmem:[#allocation2 + $0x54] sm:$0xf0]  ;;  %v1086_v39 = vpack.c.bf16 %v1054_v37, %v1054_v37  ;;  %v1087_v40 = vpack.c.bf16 %v1055_v38, %v1055_v38  ;;  %v1061_v37 = vld [vmem:[%s7065_s23 + $0xaa] sm:$0xff] }
  0xb6   : > { %1754 = vmatmul.bf16.gmra.mxu1 %v4989_v25  ;;  %1113 = vst.msk [vmem:[#allocation2 + $0x74] sm:$0xf] %vm910_vm0, %v1081_v41  ;;  %v5016_v1 = vld [vmem:[#allocation2 + $0x50] sm:$0xf]  ;;  %v5013_v3 = vor.u32 %v5937_v63, %v5010_v0 }
  0xb7   : > { %921 = vst.msk [vmem:[#allocation2 + $0x78] sm:$0xf] %vm910_vm0, %v888_v53  ;;  %v5939_v2 = vld [vmem:[#allocation2 + $0x58] sm:$0xf0] }
  0xb8   : > { %1843 = vmatmul.bf16.gmra.mxu2 %v4993_v28  ;;  %922 = vst.msk [vmem:[#allocation2 + $0x84] sm:$0xf] %vm910_vm0, %v889_v54  ;;  %v5020_v4 = vld [vmem:[#allocation2 + $0x60] sm:$0xf]  ;;  %v5017_v6 = vor.u32 %v5939_v2, %v5016_v1  ;;  %v895_v54 = vpack.c.bf16 %v863_v51, %v863_v51 }
  0xb9   : > { %1018 = vst.msk [vmem:[#allocation2 + $0x7c] sm:$0xf] %vm910_vm0, %v986_v57  ;;  %v5941_v5 = vld [vmem:[#allocation2 + $0x68] sm:$0xf0]  ;;  %v1056_v57 = vld [vmem:[%s7065_s23 + $0x82] sm:$0xff] }
  0xba   : > { %1670 = vmatmul.bf16.gmra.mxu0 %v4997_v29  ;;  %1019 = vst.msk [vmem:[#allocation2 + $0x88] sm:$0xf] %vm910_vm0, %v987_v58  ;;  %v5021_v7 = vor.u32 %v5941_v5, %v5020_v4  ;;  %v5940_v20 = vld [vmem:[#allocation2 + $0x64] sm:$0xf]  ;;  %v860_v29 = vld [vmem:[%s7065_s23 + $0x70] sm:$0xff]  ;;  %v1088_v60 = vpack.c.bf16 %v1056_v57, %v1056_v57 }
  0xbb   : > { %1114 = vst.msk [vmem:[#allocation2 + $0x80] sm:$0xf] %vm910_vm0, %v1082_v61  ;;  %v5022_v21 = vld [vmem:[#allocation2 + $0x6c] sm:$0xf0]  ;;  %v892_v31 = vpack.c.bf16 %v860_v29, %v860_v29  ;;  %v866_v29 = vld [vmem:[%s7065_s23 + $0xa0] sm:$0xff] }
  0xbc   : > { %1115 = vst.msk [vmem:[#allocation2 + $0x8c] sm:$0xf] %vm910_vm0, %v1083_v62  ;;  %v5028_v22 = vld [vmem:[#allocation2 + $0x68] sm:$0xf]  ;;  %v5025_v24 = vor.u32 %v5940_v20, %v5022_v21 }
  0xbd   : > { %923 = vst.msk [vmem:[#allocation2 + $0x90] sm:$0xf] %vm910_vm0, %v890_v10  ;;  %v5942_v23 = vld [vmem:[#allocation2 + $0x70] sm:$0xf0]  ;;  %v1057_v58 = vld [vmem:[%s7065_s23 + $0x8a] sm:$0xff] }
  0xbe   : > { %924 = vst.msk [vmem:[#allocation2 + $0x9c] sm:$0xf] %vm910_vm0, %v891_v11  ;;  %v5032_v25 = vld [vmem:[#allocation2 + $0x78] sm:$0xf]  ;;  %v5029_v27 = vor.u32 %v5942_v23, %v5028_v22  ;;  %v1089_v63 = vpack.c.bf16 %v1057_v58, %v1057_v58  ;;  %v897_v11 = vpack.c.bf16 %v865_v8, %v865_v8  ;;  %v868_v58 = vld [vmem:[%s7065_s23 + $0xb0] sm:$0xff] }
  0xbf   : > { %1020 = vst.msk [vmem:[#allocation2 + $0x94] sm:$0xf] %vm910_vm0, %v988_v14  ;;  %v5944_v26 = vld [vmem:[#allocation2 + $0x80] sm:$0xf0]  ;;  %v1058_v14 = vld [vmem:[%s7065_s23 + $0x92] sm:$0xff] }
  0xc0   : > { %1021 = vst.msk [vmem:[#allocation2 + $0xa0] sm:$0xf] %vm910_vm0, %v989_v15  ;;  %v5033_v28 = vor.u32 %v5944_v26, %v5032_v25  ;;  %v5943_v41 = vld [vmem:[#allocation2 + $0x7c] sm:$0xf]  ;;  %v1090_v17 = vpack.c.bf16 %v1058_v14, %v1058_v14 }
  0xc1   : > { %1116 = vst.msk [vmem:[#allocation2 + $0x98] sm:$0xf] %vm910_vm0, %v1084_v18  ;;  %v5034_v42 = vld [vmem:[#allocation2 + $0x84] sm:$0xf0]  ;;  %v1059_v15 = vld [vmem:[%s7065_s23 + $0x9a] sm:$0xff] }
  0xc2   : > { %1117 = vst.msk [vmem:[#allocation2 + $0xa4] sm:$0xf] %vm910_vm0, %v1085_v19  ;;  %v5040_v43 = vld [vmem:[#allocation2 + $0x80] sm:$0xf]  ;;  %v5037_v45 = vor.u32 %v5943_v41, %v5034_v42  ;;  %v1091_v20 = vpack.c.bf16 %v1059_v15, %v1059_v15  ;;  %v6030_v14 = vld [vmem:[#allocation19 + $0x30] sm:$0xff] }
  0xc3   : > { %925 = vst.msk [vmem:[#allocation2 + $0xa8] sm:$0xf] %vm910_vm0, %v892_v31  ;;  %v5945_v44 = vld [vmem:[#allocation2 + $0x88] sm:$0xf0]  ;;  %v964_v31 = vld [vmem:[%s7065_s23 + $0xa1] sm:$0xff] }
  0xc4   : > { %926 = vst.msk [vmem:[#allocation2 + $0xb4] sm:$0xf] %vm910_vm0, %v893_v32  ;;  %v5041_v48 = vor.u32 %v5945_v44, %v5040_v43  ;;  %v898_v32 = vpack.c.bf16 %v866_v29, %v866_v29  ;;  %v1093_v43 = vpack.c.bf16 %v1061_v37, %v1061_v37  ;;  %v7248_v44 = vld [vmem:[#allocation17] ss:$0 sm:$0xff] }
  0xc5   : > { %1022 = vst.msk [vmem:[#allocation2 + $0xac] sm:$0xf] %vm910_vm0, %v990_v35  ;;  %v5947_v47 = vld [vmem:[#allocation2 + $0x98] sm:$0xf0]  ;;  %v996_v35 = vpack.c.bf16 %v964_v31, %v964_v31  ;;  %v870_v31 = vld [vmem:[%s7065_s23 + $0xc0] sm:$0xff] }
  0xc6   : > { %1759 = vmatmul.bf16.gmra.mxu1 %v5001_v46  ;;  %1023 = vst.msk [vmem:[#allocation2 + $0xb8] sm:$0xf] %vm910_vm0, %v991_v36  ;;  %v5044_v46 = vld [vmem:[#allocation2 + $0x90] sm:$0xf]  ;;  %v5946_v61 = vld [vmem:[#allocation2 + $0x94] sm:$0xf] }
  0xc7   : > { %1118 = vst.msk [vmem:[#allocation2 + $0xb0] sm:$0xf] %vm910_vm0, %v1086_v39  ;;  %v5046_v62 = vld [vmem:[#allocation2 + $0x9c] sm:$0xf0]  ;;  %v997_v39 = vpack.c.bf16 %v965_v34, %v965_v34  ;;  %v902_v34 = vpack.c.bf16 %v870_v31, %v870_v31  ;;  %v1066_v31 = vld [vmem:[%s7065_s23 + $0xd2] sm:$0xff] }
  0xc8   : > { %1848 = vmatmul.bf16.gmra.mxu2 %v5005_v49  ;;  %1119 = vst.msk [vmem:[#allocation2 + $0xbc] sm:$0xf] %vm910_vm0, %v1087_v40  ;;  %v5045_v49 = vor.u32 %v5947_v47, %v5044_v46  ;;  %v5052_v0 = vld [vmem:[#allocation2 + $0x98] sm:$0xf]  ;;  %v5049_v2 = vor.u32 %v5946_v61, %v5046_v62  ;;  %v1060_v36 = vld [vmem:[%s7065_s23 + $0xa2] sm:$0xff]  ;;  %v900_v62 = vpack.c.bf16 %v868_v58, %v868_v58 }
  0xc9   : > { %928 = vst.msk [vmem:[#allocation2 + $0xcc] sm:$0xf] %vm910_vm0, %v895_v54  ;;  %v5948_v1 = vld [vmem:[#allocation2 + $0xa0] sm:$0xf0]  ;;  %v1092_v40 = vpack.c.bf16 %v1060_v36, %v1060_v36  ;;  %v969_v36 = vld [vmem:[%s7065_s23 + $0xc9] sm:$0xff] }
  0xca   : > { %1675 = vmatmul.bf16.gmra.mxu0 %v5009_v50  ;;  %v862_v50 = vld [vmem:[%s7065_s23 + $0x80] sm:$0xff]  ;;  %1024 = vst.msk [vmem:[#allocation2 + $0xc4] sm:$0xf] %vm910_vm0, %v992_v56  ;;  %v5053_v5 = vor.u32 %v5948_v1, %v5052_v0  ;;  %v1062_v1 = vld [vmem:[%s7065_s23 + $0xb2] sm:$0xff] }
  0xcb   : > { %v894_v53 = vpack.c.bf16 %v862_v50, %v862_v50  ;;  %1025 = vst.msk [vmem:[#allocation2 + $0xd0] sm:$0xf] %vm910_vm0, %v993_v59  ;;  %v5950_v4 = vld [vmem:[#allocation2 + $0xb0] sm:$0xf0]  ;;  %v869_v59 = vld [vmem:[%s7065_s23 + $0xb8] sm:$0xff] }
  0xcc   : > { %1120 = vst.msk [vmem:[#allocation2 + $0xc8] sm:$0xf] %vm910_vm0, %v1088_v60  ;;  %v5949_v18 = vld [vmem:[#allocation2 + $0xac] sm:$0xf]  ;;  %v966_v60 = vld [vmem:[%s7065_s23 + $0xb1] sm:$0xff]  ;;  %v967_v0 = vld [vmem:[%s7065_s23 + $0xb9] sm:$0xff] }
  0xcd   : > { %927 = vst.msk [vmem:[#allocation2 + $0xc0] sm:$0xf] %vm910_vm0, %v894_v53  ;;  %v5058_v19 = vld [vmem:[#allocation2 + $0xb4] sm:$0xf0] }
  0xce   : > { %1121 = vst.msk [vmem:[#allocation2 + $0xd4] sm:$0xf] %vm910_vm0, %v1089_v63  ;;  %v5064_v21 = vld [vmem:[#allocation2 + $0xb0] sm:$0xf]  ;;  %v5061_v23 = vor.u32 %v5949_v18, %v5058_v19  ;;  %v901_v63 = vpack.c.bf16 %v869_v59, %v869_v59 }
  0xcf   : > { %930 = vst.msk [vmem:[#allocation2 + $0xe4] sm:$0xf] %vm910_vm0, %v897_v11  ;;  %v5951_v22 = vld [vmem:[#allocation2 + $0xb8] sm:$0xf0] }
  0xd0   : > { %1026 = vst.msk [vmem:[#allocation2 + $0xdc] sm:$0xf] %vm910_vm0, %v994_v13  ;;  %v5953_v26 = vld [vmem:[#allocation2 + $0xc8] sm:$0xf0] }
  0xd1   : > { %1027 = vst.msk [vmem:[#allocation2 + $0xe8] sm:$0xf] %vm910_vm0, %v995_v16  ;;  %v5952_v41 = vld [vmem:[#allocation2 + $0xc4] sm:$0xf] }
  0xd2   : > { %1122 = vst.msk [vmem:[#allocation2 + $0xe0] sm:$0xf] %vm910_vm0, %v1090_v17  ;;  %v5070_v42 = vld [vmem:[#allocation2 + $0xcc] sm:$0xf0] }
  0xd3   : > { %1123 = vst.msk [vmem:[#allocation2 + $0xec] sm:$0xf] %vm910_vm0, %v1091_v20  ;;  %v5073_v47 = vor.u32 %v5952_v41, %v5070_v42  ;;  %v1064_v41 = vld [vmem:[%s7065_s23 + $0xc2] sm:$0xff] }
  0xd4   : > { %v5068_v25 = vld [vmem:[#allocation2 + $0xc0] sm:$0xf]  ;;  %931 = vst.msk [vmem:[#allocation2 + $0xf0] sm:$0xf] %vm910_vm0, %v898_v32  ;;  %v871_v32 = vld [vmem:[%s7065_s23 + $0xc8] sm:$0xff] }
  0xd5   : > { %932 = vst.msk [vmem:[#allocation2 + $0xfc] sm:$0xf] %vm910_vm0, %v899_v33  ;;  %v5954_v46 = vld [vmem:[#allocation2 + $0xd0] sm:$0xf0] }
  0xd6   : > { %1764 = vmatmul.bf16.gmra.mxu1 %v5013_v3  ;;  %v5056_v3 = vld [vmem:[#allocation2 + $0xa8] sm:$0xf]  ;;  %1028 = vst.msk [vmem:[#allocation2 + $0xf4] sm:$0xf] %vm910_vm0, %v996_v35  ;;  %v5956_v50 = vld [vmem:[#allocation2 + $0xe0] sm:$0xf0] }
  0xd7   : > { %1029 = vst.msk [vmem:[#allocation2 + $0x100] sm:$0xf] %vm910_vm0, %v997_v39  ;;  %v968_v35 = vld [vmem:[%s7065_s23 + $0xc1] sm:$0xff]  ;;  %v903_v39 = vpack.c.bf16 %v871_v32, %v871_v32 }
  0xd8   : > { %1853 = vmatmul.bf16.gmra.mxu2 %v5017_v6  ;;  %v5057_v6 = vor.u32 %v5950_v4, %v5056_v3  ;;  %1124 = vst.msk [vmem:[#allocation2 + $0xf8] sm:$0xf] %vm910_vm0, %v1092_v40  ;;  %v998_v3 = vpack.c.bf16 %v966_v60, %v966_v60  ;;  %v1063_v4 = vld [vmem:[%s7065_s23 + $0xba] sm:$0xff]  ;;  %v5082_v8 = vld [vmem:[#allocation2 + $0xe4] sm:$0xf0]  ;;  %v1000_v40 = vpack.c.bf16 %v968_v35, %v968_v35 }
  0xd9   : > { %1125 = vst.msk [vmem:[#allocation2 + $0x104] sm:$0xf] %vm910_vm0, %v1093_v43  ;;  %v5088_v11 = vld [vmem:[#allocation2 + $0xe0] sm:$0xf]  ;;  %v1095_v12 = vpack.c.bf16 %v1063_v4, %v1063_v4 }
  0xda   : > { %1680 = vmatmul.bf16.gmra.mxu0 %v5021_v7  ;;  %v864_v7 = vld [vmem:[%s7065_s23 + $0x90] sm:$0xff]  ;;  %933 = vst.msk [vmem:[#allocation2 + $0x108] sm:$0xf] %vm910_vm0, %v900_v62  ;;  %v5957_v13 = vld [vmem:[#allocation2 + $0xe8] sm:$0xf0] }
  0xdb   : > { %v896_v10 = vpack.c.bf16 %v864_v7, %v864_v7  ;;  %v5955_v7 = vld [vmem:[#allocation2 + $0xdc] sm:$0xf]  ;;  %934 = vst.msk [vmem:[#allocation2 + $0x114] sm:$0xf] %vm910_vm0, %v901_v63  ;;  %v5092_v19 = vld [vmem:[#allocation2 + $0xf0] sm:$0xf] }
  0xdc   : > { %1030 = vst.msk [vmem:[#allocation2 + $0x10c] sm:$0xf] %vm910_vm0, %v998_v3  ;;  %v5085_v16 = vor.u32 %v5955_v7, %v5082_v8  ;;  %v5959_v20 = vld [vmem:[#allocation2 + $0xf8] sm:$0xf0]  ;;  %v6025_v3 = vld [vmem:[#allocation19 + $0x8] sm:$0xff] }
  0xdd   : > { %929 = vst.msk [vmem:[#allocation2 + $0xd8] sm:$0xf] %vm910_vm0, %v896_v10  ;;  %v1094_v10 = vpack.c.bf16 %v1062_v1, %v1062_v1 }
  0xde   : > { %1127 = vst.msk [vmem:[#allocation2 + $0x11c] sm:$0xf] %vm910_vm0, %v1095_v12 }
  0xdf   : > { %1126 = vst.msk [vmem:[#allocation2 + $0x110] sm:$0xf] %vm910_vm0, %v1094_v10  ;;  %v6024_v10 = vld [vmem:[#allocation19] sm:$0xff] }
  0xe0   : > { %935 = vst.msk [vmem:[#allocation2 + $0x120] sm:$0xf] %vm910_vm0, %v902_v34  ;;  %v1067_v34 = vld [vmem:[%s7065_s23 + $0xda] sm:$0xff] }
  0xe1   : > { %936 = vst.msk [vmem:[#allocation2 + $0x12c] sm:$0xf] %vm910_vm0, %v903_v39 }
  0xe2   : > { %1032 = vst.msk [vmem:[#allocation2 + $0x124] sm:$0xf] %vm910_vm0, %v1000_v40  ;;  %v5962_v62 = vld [vmem:[#allocation2 + $0x110] sm:$0xf0] }
  0xe6   : > { %1769 = vmatmul.bf16.gmra.mxu1 %v5025_v24 }
  0xe8   : > { %1858 = vmatmul.bf16.gmra.mxu2 %v5029_v27  ;;  %v5065_v27 = vor.u32 %v5951_v22, %v5064_v21 }
  0xea   : > { %1685 = vmatmul.bf16.gmra.mxu0 %v5033_v28  ;;  %v5069_v28 = vor.u32 %v5953_v26, %v5068_v25  ;;  %v5093_v25 = vor.u32 %v5959_v20, %v5092_v19  ;;  %v970_v19 = vld [vmem:[%s7065_s23 + $0xd1] sm:$0xff] }
  0xf5   : > { %v1661_v24 = vpop.f32.mrf.mxu0 }
  0xf6   : > { %1774 = vmatmul.bf16.gmra.mxu1 %v5037_v45  ;;  %v5076_v45 = vld [vmem:[#allocation2 + $0xc8] sm:$0xf]  ;;  %v1662_v51 = vadd.f32 %v7248_v44, %v1661_v24  ;;  %v6029_v24 = vld [vmem:[#allocation19 + $0x28] sm:$0xff] }
  0xf7   : > { %v5077_v52 = vor.u32 %v5954_v46, %v5076_v45  ;;  %v5958_v45 = vld [vmem:[#allocation2 + $0xf4] sm:$0xf]  ;;  %v1065_v46 = vld [vmem:[%s7065_s23 + $0xca] sm:$0xff] }
  0xf8   : > { %1863 = vmatmul.bf16.gmra.mxu2 %v5041_v48 }
  0xfa   : > { %1690 = vmatmul.bf16.gmra.mxu0 %v5045_v49  ;;  %v5080_v49 = vld [vmem:[#allocation2 + $0xd8] sm:$0xf] }
  0xfb   : > { %v5081_v53 = vor.u32 %v5956_v50, %v5080_v49  ;;  %v1001_v50 = vpack.c.bf16 %v969_v36, %v969_v36 }
  0xfd   : > { %v1663_v38 = vpop.f32.mrf.mxu0  ;;  %1033 = vst.msk [vmem:[#allocation2 + $0x130] sm:$0xf] %vm910_vm0, %v1001_v50 }
 0x106   : > { %1779 = vmatmul.bf16.gmra.mxu1 %v5049_v2  ;;  %v6031_v2 = vld [vmem:[#allocation19 + $0x38] sm:$0xff] }
 0x107   : > { %2690 = vmatpush.bf16.msra.mxu3 %v6031_v2 }
 0x108   : > { %1868 = vmatmul.bf16.gmra.mxu2 %v5053_v5  ;;  %v1664_v5 = vadd.f32 %v7248_v44, %v1663_v38  ;;  %v6027_v38 = vld [vmem:[#allocation19 + $0x18] sm:$0xff] }
 0x10a   : > { %1695 = vmatmul.bf16.gmra.mxu0 %v5057_v6  ;;  %v999_v6 = vpack.c.bf16 %v967_v0, %v967_v0 }
 0x10b   : > { %2691 = vmatpush.bf16.msra.mxu3 %v6030_v14  ;;  %v872_v14 = vld [vmem:[%s7065_s23 + $0xd0] sm:$0xff] }
 0x10c   : > { %1031 = vst.msk [vmem:[#allocation2 + $0x118] sm:$0xf] %vm910_vm0, %v999_v6 }
 0x10f   : > { %2692 = vmatpush.bf16.msra.mxu3 %v6029_v24  ;;  %v971_v24 = vld [vmem:[%s7065_s23 + $0xd9] sm:$0xff] }
 0x116   : > { %1784 = vmatmul.bf16.gmra.mxu1 %v5061_v23  ;;  %v5089_v23 = vor.u32 %v5957_v13, %v5088_v11 }
 0x118   : > { %1873 = vmatmul.bf16.gmra.mxu2 %v5065_v27 }
 0x11a   : > { %1700 = vmatmul.bf16.gmra.mxu0 %v5069_v28  ;;  %v6028_v28 = vld [vmem:[#allocation19 + $0x20] sm:$0xff] }
 0x11b   : > { %2693 = vmatpush.bf16.msra.mxu3 %v6028_v28 }
 0x11f   : > { %2694 = vmatpush.bf16.msra.mxu3 %v6027_v38 }
 0x123   : > { %v1750_v48 = vpop.f32.mrf.mxu1 }
 0x124   : > { %v1751_v55 = vadd.f32 %v1750_v48, %v1662_v51  ;;  %v5094_v48 = vld [vmem:[#allocation2 + $0xfc] sm:$0xf0] }
 0x125   : > { %v5097_v58 = vor.u32 %v5958_v45, %v5094_v48  ;;  %v1098_v45 = vpack.c.bf16 %v1066_v31, %v1066_v31  ;;  %v1099_v48 = vpack.c.bf16 %v1067_v34, %v1067_v34 }
 0x126   : > { %1789 = vmatmul.bf16.gmra.mxu1 %v5073_v47 }
 0x127   : > { %v1666_v54 = vpop.f32.mrf.mxu0  ;;  %1130 = vst.msk [vmem:[#allocation2 + $0x140] sm:$0xf] %vm910_vm0, %v1098_v45  ;;  %v876_v45 = vld [vmem:[%s7065_s23 + $0xf0] sm:$0xff] }
 0x128   : > { %1878 = vmatmul.bf16.gmra.mxu2 %v5077_v52  ;;  %v1667_v22 = vadd.f32 %v7248_v44, %v1666_v54  ;;  %v5100_v52 = vld [vmem:[#allocation2 + $0xf8] sm:$0xf]  ;;  %v5960_v54 = vld [vmem:[#allocation2 + $0x100] sm:$0xf0]  ;;  %1131 = vst.msk [vmem:[#allocation2 + $0x14c] sm:$0xf] %vm910_vm0, %v1099_v48 }
 0x129   : > { %v5101_v1 = vor.u32 %v5960_v54, %v5100_v52  ;;  %v877_v48 = vld [vmem:[%s7065_s23 + $0xf8] sm:$0x3f] }
 0x12a   : > { %1705 = vmatmul.bf16.gmra.mxu0 %v5081_v53  ;;  %v1096_v53 = vpack.c.bf16 %v1064_v41, %v1064_v41 }
 0x12b   : > { %v1839_v56 = vpop.f32.mrf.mxu2  ;;  %v1752_v57 = vpop.f32.mrf.mxu1 }
 0x12c   : > { %v7258_v61 = vadd.f32 %v1839_v56, %v1751_v55  ;;  %v1753_v15 = vadd.f32 %v1752_v57, %v1664_v5  ;;  %v1097_v55 = vpack.c.bf16 %v1065_v46, %v1065_v46  ;;  %v6026_v56 = vld [vmem:[#allocation19 + $0x10] sm:$0xff]  ;;  %1128 = vst.msk [vmem:[#allocation2 + $0x128] sm:$0xf] %vm910_vm0, %v1096_v53 }
 0x12d   : > { %2695 = vmatpush.bf16.msra.mxu3 %v6026_v56 }
 0x12e   : > { %1919 = vst [vmem:[#allocation3] sm:$0xff] %v7258_v61 }
 0x12f   : > { %v1668_v9 = vpop.f32.mrf.mxu0  ;;  %1129 = vst.msk [vmem:[#allocation2 + $0x134] sm:$0xf] %vm910_vm0, %v1097_v55 }
 0x130   : > { %v1669_v43 = vadd.f32 %v7248_v44, %v1668_v9 }
 0x131   : > { %2696 = vmatpush.bf16.msra.mxu3 %v6025_v3  ;;  %v5964_v3 = vld [vmem:[#allocation2 + $0x124] sm:$0xf] }
 0x133   : > { %v1841_v17 = vpop.f32.mrf.mxu2  ;;  %v1755_v18 = vpop.f32.mrf.mxu1 }
 0x134   : > { %v7270_v21 = vadd.f32 %v1841_v17, %v1753_v15  ;;  %v1756_v27 = vadd.f32 %v1755_v18, %v1667_v22  ;;  %v873_v15 = vld [vmem:[%s7065_s23 + $0xd8] sm:$0xff]  ;;  %v904_v17 = vpack.c.bf16 %v872_v14, %v872_v14  ;;  %v5961_v22 = vld [vmem:[#allocation2 + $0x10c] sm:$0xf] }
 0x135   : > { %2697 = vmatpush.bf16.msra.mxu3 %v6024_v10  ;;  %v905_v18 = vpack.c.bf16 %v873_v15, %v873_v15  ;;  %v1069_v15 = vld [vmem:[%s7065_s23 + $0xea] sm:$0xff] }
 0x136   : > { %1920 = vst [vmem:[#allocation3 + $0x8] sm:$0xff] %v7270_v21  ;;  %1794 = vmatmul.bf16.gmra.mxu1 %v5085_v16 }
 0x137   : > { %v1671_v26 = vpop.f32.mrf.mxu0  ;;  %937 = vst.msk [vmem:[#allocation2 + $0x138] sm:$0xf] %vm910_vm0, %v904_v17 }
 0x138   : > { %1883 = vmatmul.bf16.gmra.mxu2 %v5089_v23  ;;  %v1672_v0 = vadd.f32 %v7248_v44, %v1671_v26  ;;  %v5106_v23 = vld [vmem:[#allocation2 + $0x114] sm:$0xf0]  ;;  %938 = vst.msk [vmem:[#allocation2 + $0x144] sm:$0xf] %vm910_vm0, %v905_v18 }
 0x139   : > { %v5109_v36 = vor.u32 %v5961_v22, %v5106_v23 }
 0x13a   : > { %1710 = vmatmul.bf16.gmra.mxu0 %v5093_v25  ;;  %v1002_v25 = vpack.c.bf16 %v970_v19, %v970_v19 }
 0x13b   : > { %v1844_v29 = vpop.f32.mrf.mxu2  ;;  %v1757_v30 = vpop.f32.mrf.mxu1 }
 0x13c   : > { %v7277_v33 = vadd.f32 %v1844_v29, %v1756_v27  ;;  %v1758_v57 = vadd.f32 %v1757_v30, %v1669_v43  ;;  %v5112_v27 = vld [vmem:[#allocation2 + $0x110] sm:$0xf]  ;;  %v5963_v30 = vld [vmem:[#allocation2 + $0x118] sm:$0xf0]  ;;  %1034 = vst.msk [vmem:[#allocation2 + $0x13c] sm:$0xf] %vm910_vm0, %v1002_v25 }
 0x13d   : > { %v1983_v37 = vld [vmem:[#allocation3 + $0x1] sm:$0xff]  ;;  %v5113_v41 = vor.u32 %v5963_v30, %v5112_v27  ;;  %v5965_v43 = vld [vmem:[#allocation2 + $0x128] sm:$0xf0]  ;;  %v1101_v27 = vpack.c.bf16 %v1069_v15, %v1069_v15 }
 0x13e   : > { %v2015_v42 = vmax.f32 %v7258_v61, %v1983_v37  ;;  %1921 = vst [vmem:[#allocation3 + $0x10] sm:$0xff] %v7277_v33  ;;  %v2047_v47 = vld [vmem:[#allocation3 + $0x2] sm:$0xff] }
 0x13f   : > { %v1673_v49 = vpop.f32.mrf.mxu0  ;;  %v5104_v61 = vld [vmem:[#allocation2 + $0x108] sm:$0xf]  ;;  %v6047_v37 = vld [vmem:[#allocation19 + $0xb8] sm:$0xff]  ;;  %1133 = vst.msk [vmem:[#allocation2 + $0x164] sm:$0xf] %vm910_vm0, %v1101_v27 }
 0x140   : > { %v2079_v51 = vmax.f32 %v2015_v42, %v2047_v47  ;;  %v5105_v5 = vor.u32 %v5962_v62, %v5104_v61  ;;  %v5116_v42 = vld [vmem:[#allocation2 + $0x120] sm:$0xf]  ;;  %2788 = vmatpush.bf16.msrb.mxu0 %v6047_v37  ;;  %v5968_v22 = vld [vmem:[#allocation2 + $0x140] sm:$0xf0] }
 0x141   : > { %v6044_v15 = vld [vmem:[#allocation19 + $0xa0] sm:$0xff] }
 0x142   : > { %2111 = vst [vmem:[#allocation3] sm:$0xff] %v2079_v51  ;;  %v5117_v51 = vor.u32 %v5965_v43, %v5116_v42  ;;  %v6046_v43 = vld [vmem:[#allocation19 + $0xb0] sm:$0xff] }
 0x143   : > { %v1846_v59 = vpop.f32.mrf.mxu2  ;;  %v1760_v60 = vpop.f32.mrf.mxu1 }
 0x144   : > { %v7290_v63 = vadd.f32 %v1846_v59, %v1758_v57  ;;  %v1761_v9 = vadd.f32 %v1760_v60, %v1672_v0  ;;  %v874_v59 = vld [vmem:[%s7065_s23 + $0xe0] sm:$0xff]  ;;  %v875_v60 = vld [vmem:[%s7065_s23 + $0xe8] sm:$0xff]  ;;  %2789 = vmatpush.bf16.msrb.mxu0 %v6046_v43 }
 0x145   : > { %v1984_v2 = vld [vmem:[#allocation3 + $0x9] sm:$0xff]  ;;  %v906_v62 = vpack.c.bf16 %v874_v59, %v874_v59  ;;  %v972_v0 = vld [vmem:[%s7065_s23 + $0xe1] sm:$0xff]  ;;  %v975_v59 = vld [vmem:[%s7065_s23 + $0xf9] sm:$0x3f] }
 0x146   : > { %v2016_v4 = vmax.f32 %v7270_v21, %v1984_v2  ;;  %1922 = vst [vmem:[#allocation3 + $0x18] sm:$0xff] %v7290_v63  ;;  %1799 = vmatmul.bf16.gmra.mxu1 %v5097_v58  ;;  %v2048_v6 = vld [vmem:[#allocation3 + $0xa] sm:$0xff]  ;;  %v1674_v21 = vadd.f32 %v7248_v44, %v1673_v49 }
 0x147   : > { %v1676_v7 = vpop.f32.mrf.mxu0  ;;  %939 = vst.msk [vmem:[#allocation2 + $0x150] sm:$0xf] %vm910_vm0, %v906_v62  ;;  %v6045_v62 = vld [vmem:[#allocation19 + $0xa8] sm:$0xff] }
 0x148   : > { %v2080_v8 = vmax.f32 %v2016_v4, %v2048_v6  ;;  %1888 = vmatmul.bf16.gmra.mxu2 %v5101_v1  ;;  %v1677_v47 = vadd.f32 %v7248_v44, %v1676_v7  ;;  %v5118_v4 = vld [vmem:[#allocation2 + $0x12c] sm:$0xf0]  ;;  %v1004_v6 = vpack.c.bf16 %v972_v0, %v972_v0  ;;  %2790 = vmatpush.bf16.msrb.mxu0 %v6045_v62 }
 0x149   : > { %v5121_v17 = vor.u32 %v5964_v3, %v5118_v4  ;;  %v6041_v43 = vld [vmem:[#allocation19 + $0x88] sm:$0xff] }
 0x14a   : > { %2112 = vst [vmem:[#allocation3 + $0x8] sm:$0xff] %v2080_v8  ;;  %1715 = vmatmul.bf16.gmra.mxu0 %v5105_v5  ;;  %v973_v5 = vld [vmem:[%s7065_s23 + $0xe9] sm:$0xff] }
 0x14b   : > { %v1849_v11 = vpop.f32.mrf.mxu2  ;;  %v1762_v12 = vpop.f32.mrf.mxu1  ;;  %v5124_v8 = vld [vmem:[#allocation2 + $0x128] sm:$0xf]  ;;  %v1005_v14 = vpack.c.bf16 %v973_v5, %v973_v5  ;;  %1036 = vst.msk [vmem:[#allocation2 + $0x154] sm:$0xf] %vm910_vm0, %v1004_v6 }
 0x14c   : > { %v7297_v13 = vadd.f32 %v1849_v11, %v1761_v9  ;;  %v1763_v35 = vadd.f32 %v1762_v12, %v1674_v21  ;;  %v5966_v11 = vld [vmem:[#allocation2 + $0x130] sm:$0xf0]  ;;  %v1068_v12 = vld [vmem:[%s7065_s23 + $0xe2] sm:$0xff]  ;;  %v5128_v21 = vld [vmem:[#allocation2 + $0x138] sm:$0xf]  ;;  %2791 = vmatpush.bf16.msrb.mxu0 %v6044_v15 }
 0x14d   : > { %v1985_v16 = vld [vmem:[#allocation3 + $0x11] sm:$0xff]  ;;  %v1100_v23 = vpack.c.bf16 %v1068_v12, %v1068_v12  ;;  %1037 = vst.msk [vmem:[#allocation2 + $0x160] sm:$0xf] %vm910_vm0, %v1005_v14  ;;  %v5129_v30 = vor.u32 %v5968_v22, %v5128_v21 }
 0x14e   : > { %v2017_v20 = vmax.f32 %v7277_v33, %v1985_v16  ;;  %1923 = vst [vmem:[#allocation3 + $0x20] sm:$0xff] %v7297_v13  ;;  %v2049_v26 = vld [vmem:[#allocation3 + $0x12] sm:$0xff]  ;;  %v1003_v33 = vpack.c.bf16 %v971_v24, %v971_v24 }
 0x14f   : > { %v1678_v28 = vpop.f32.mrf.mxu0  ;;  %1132 = vst.msk [vmem:[#allocation2 + $0x158] sm:$0xf] %vm910_vm0, %v1100_v23 }
 0x150   : > { %v2081_v29 = vmax.f32 %v2017_v20, %v2049_v26  ;;  %1035 = vst.msk [vmem:[#allocation2 + $0x148] sm:$0xf] %vm910_vm0, %v1003_v33  ;;  %v1679_v2 = vadd.f32 %v7248_v44, %v1678_v28  ;;  %v5125_v26 = vor.u32 %v5966_v11, %v5124_v8 }
 0x151   : > { %v2143_v32 = vld [vmem:[#allocation3] ss:$2 sm:$0xff] }
 0x152   : > { %2113 = vst [vmem:[#allocation3 + $0x10] sm:$0xff] %v2081_v29  ;;  %v2206_v38 = vpack.c.bf16 %v2143_v32, %v2143_v32 }
 0x153   : > { %v1851_v39 = vpop.f32.mrf.mxu2  ;;  %v1765_v40 = vpop.f32.mrf.mxu1  ;;  %2174 = vst [vmem:[#allocation4] sm:$0xff] %v2143_v32 }
 0x154   : > { %v7311_v46 = vadd.f32 %v1851_v39, %v1763_v35  ;;  %2222 = vst [vmem:[#allocation5] sm:$0xf] %v2206_v38  ;;  %v1766_v55 = vadd.f32 %v1765_v40, %v1677_v47  ;;  %v5967_v47 = vld [vmem:[#allocation2 + $0x13c] sm:$0xf] }
 0x155   : > { %v1986_v49 = vld [vmem:[#allocation3 + $0x19] sm:$0xff] }
 0x156   : > { %v2018_v50 = vmax.f32 %v7290_v63, %v1986_v49  ;;  %1924 = vst [vmem:[#allocation3 + $0x28] sm:$0xff] %v7311_v46  ;;  %1804 = vmatmul.bf16.gmra.mxu1 %v5109_v36  ;;  %v2050_v52 = vld [vmem:[#allocation3 + $0x1a] sm:$0xff]  ;;  %v907_v63 = vpack.c.bf16 %v875_v60, %v875_v60  ;;  %v908_v49 = vpack.c.bf16 %v876_v45, %v876_v45 }
 0x157   : > { %v1681_v53 = vpop.f32.mrf.mxu0  ;;  %v5148_v45 = vld [vmem:[#allocation2 + $0x158] sm:$0xf] }
 0x158   : > { %v2082_v54 = vmax.f32 %v2018_v50, %v2050_v52  ;;  %1893 = vmatmul.bf16.gmra.mxu2 %v5113_v41  ;;  %940 = vst.msk [vmem:[#allocation2 + $0x15c] sm:$0xf] %vm910_vm0, %v907_v63  ;;  %v1682_v25 = vadd.f32 %v7248_v44, %v1681_v53  ;;  %v5130_v52 = vld [vmem:[#allocation2 + $0x144] sm:$0xf0]  ;;  %v909_v53 = vpack.c.bf16 %v877_v48, %v877_v48  ;;  %v1070_v63 = vld [vmem:[%s7065_s23 + $0xf2] sm:$0xff] }
 0x159   : > { %941 = vst.msk [vmem:[#allocation2 + $0x168] sm:$0xf] %vm910_vm0, %v908_v49  ;;  %v5133_v4 = vor.u32 %v5967_v47, %v5130_v52  ;;  %v1102_v11 = vpack.c.bf16 %v1070_v63, %v1070_v63 }
 0x15a   : > { %2114 = vst [vmem:[#allocation3 + $0x18] sm:$0xff] %v2082_v54  ;;  %1720 = vmatmul.bf16.gmra.mxu0 %v5117_v51  ;;  %v974_v54 = vld [vmem:[%s7065_s23 + $0xf1] sm:$0xff] }
 0x15b   : > { %v1854_v56 = vpop.f32.mrf.mxu2  ;;  %v1767_v57 = vpop.f32.mrf.mxu1  ;;  %v5260_v38 = vld [vmem:[#allocation5] sm:$0xf]  ;;  %943 = vst.msk [vmem:[#allocation2 + $0x174] sm:$0x7] %vm942_vm1, %v909_v53 }
 0x15c   : > { %v7319_v58 = vadd.f32 %v1854_v56, %v1766_v55  ;;  %v1768_v16 = vadd.f32 %v1767_v57, %v1679_v2  ;;  %v5136_v56 = vld [vmem:[#allocation2 + $0x140] sm:$0xf]  ;;  %v1071_v2 = vld [vmem:[%s7065_s23 + $0xfa] sm:$0x3f]  ;;  %1134 = vst.msk [vmem:[#allocation2 + $0x170] sm:$0xf] %vm910_vm0, %v1102_v11 }
 0x15d   : > { %v1987_v61 = vld [vmem:[#allocation3 + $0x21] sm:$0xff]  ;;  %s4766_s23 = sshll.u32 %s775_s10, 4  ;;  %s4767_s23 = int_to_ptr.vmem [resolvable:$true] %s4766_s23 }
 0x15e   : > { %v2019_v1 = vmax.f32 %v7297_v13, %v1987_v61  ;;  %1925 = vst [vmem:[#allocation3 + $0x30] sm:$0xff] %v7319_v58  ;;  %v2051_v7 = vld [vmem:[#allocation3 + $0x22] sm:$0xff]  ;;  %v5969_v61 = vld [vmem:[#allocation2 + $0x148] sm:$0xf0] }
 0x15f   : > { %v1683_v9 = vpop.f32.mrf.mxu0  ;;  %v5137_v14 = vor.u32 %v5969_v61, %v5136_v56 }
 0x160   : > { %v2083_v10 = vmax.f32 %v2019_v1, %v2051_v7  ;;  %v1684_v51 = vadd.f32 %v7248_v44, %v1683_v9  ;;  %v1007_v1 = vpack.c.bf16 %v975_v59, %v975_v59  ;;  %v5140_v9 = vld [vmem:[#allocation2 + $0x150] sm:$0xf]  ;;  %v5152_v52 = vld [vmem:[#allocation2 + $0x168] sm:$0xf] }
 0x161   : > { %v2145_v13 = vld [vmem:[#allocation3 + $0x10] ss:$2 sm:$0xff] }
 0x162   : > { %2115 = vst [vmem:[#allocation3 + $0x20] sm:$0xff] %v2083_v10  ;;  %v2207_v18 = vpack.c.bf16 %v2145_v13, %v2145_v13  ;;  %v5971_v10 = vld [vmem:[#allocation2 + $0x158] sm:$0xf0]  ;;  %v5974_v53 = vld [vmem:[#allocation2 + $0x170] sm:$0x70] }
 0x163   : > { %v1856_v19 = vpop.f32.mrf.mxu2  ;;  %v1770_v20 = vpop.f32.mrf.mxu1  ;;  %2175 = vst [vmem:[#allocation4 + $0x8] sm:$0xff] %v2145_v13 }
 0x164   : > { %v7333_v24 = vadd.f32 %v1856_v19, %v1768_v16  ;;  %2223 = vst [vmem:[#allocation5 + $0xc] sm:$0xf] %v2207_v18  ;;  %v1771_v34 = vadd.f32 %v1770_v20, %v1682_v25  ;;  %v1103_v16 = vpack.c.bf16 %v1071_v2, %v1071_v2  ;;  %v5141_v20 = vor.u32 %v5971_v10, %v5140_v9 }
 0x165   : > { %v1988_v28 = vld [vmem:[#allocation3 + $0x29] sm:$0xff]  ;;  %1039 = vst.msk [vmem:[#allocation2 + $0x178] sm:$0x7] %vm942_vm1, %v1007_v1 }
 0x166   : > { %v2020_v29 = vmax.f32 %v7311_v46, %v1988_v28  ;;  %1926 = vst [vmem:[#allocation3 + $0x38] sm:$0xff] %v7333_v24  ;;  %1809 = vmatmul.bf16.gmra.mxu1 %v5121_v17  ;;  %v2052_v31 = vld [vmem:[#allocation3 + $0x2a] sm:$0xff] }
 0x167   : > { %v1686_v32 = vpop.f32.mrf.mxu0  ;;  %1135 = vst.msk [vmem:[#allocation2 + $0x17c] sm:$0x7] %vm942_vm1, %v1103_v16 }
 0x168   : > { %v2084_v33 = vmax.f32 %v2020_v29, %v2052_v31  ;;  %1898 = vmatmul.bf16.gmra.mxu2 %v5125_v26  ;;  %v1687_v13 = vadd.f32 %v7248_v44, %v1686_v32  ;;  %v6043_v26 = vld [vmem:[#allocation19 + $0x98] sm:$0xff] }
 0x169   : > { %2792 = vmatpush.bf16.msrb.mxu0 %v6043_v26 }
 0x16a   : > { %2116 = vst [vmem:[#allocation3 + $0x28] sm:$0xff] %v2084_v33  ;;  %1725 = vmatmul.bf16.gmra.mxu0 %v5129_v30  ;;  %v2286_v35 = vld [vmem:[#allocation4 + $0x2] sm:$0xff]  ;;  %v6042_v33 = vld [vmem:[#allocation19 + $0x90] sm:$0xff] }
 0x16b   : > { %v1859_v36 = vpop.f32.mrf.mxu2  ;;  %v1772_v37 = vpop.f32.mrf.mxu1  ;;  %v6001_v39 = vld [vmem:[#allocation5 + $0x8] sm:$0xf0]  ;;  %v2302_v40 = vpack.c.bf16 %v2286_v35, %v2286_v35  ;;  %v2238_v6 = vld [vmem:[#allocation4 + $0x1] sm:$0xff] }
 0x16c   : > { %v7341_v41 = vadd.f32 %v1859_v36, %v1771_v34  ;;  %v5261_v42 = vor.u32 %v6001_v39, %v5260_v38  ;;  %v1773_v3 = vadd.f32 %v1772_v37, %v1684_v51  ;;  %v2254_v18 = vpack.c.bf16 %v2238_v6, %v2238_v6  ;;  %v5970_v37 = vld [vmem:[#allocation2 + $0x154] sm:$0xf]  ;;  %v5142_v39 = vld [vmem:[#allocation2 + $0x15c] sm:$0xf0]  ;;  %v5154_v16 = vld [vmem:[#allocation2 + $0x174] sm:$0x70] }
 0x16d   : > { %v1989_v46 = vld [vmem:[#allocation3 + $0x31] sm:$0xff]  ;;  %2318 = vst [vmem:[#allocation5 + $0x8] sm:$0xf] %v2302_v40  ;;  %2793 = vmatpush.bf16.msrb.mxu0 %v6042_v33  ;;  %v5145_v49 = vor.u32 %v5970_v37, %v5142_v39 }
 0x16e   : > { %v2021_v50 = vmax.f32 %v7319_v58, %v1989_v46  ;;  %1927 = vst [vmem:[#allocation3 + $0x40] sm:$0xff] %v7341_v41  ;;  %2698 = vmatmul.bf16.vlgmr.msra.gmra.mxu3 %v5261_v42  ;;  %v2053_v55 = vld [vmem:[#allocation3 + $0x32] sm:$0xff]  ;;  %v1006_v58 = vpack.c.bf16 %v974_v54, %v974_v54  ;;  %v5972_v46 = vld [vmem:[#allocation2 + $0x160] sm:$0xf0] }
 0x16f   : > { %v7349_v57 = vpop.f32.mrf.mxu0  ;;  %2270 = vst [vmem:[#allocation5 + $0x4] sm:$0xf] %v2254_v18  ;;  %v5149_v56 = vor.u32 %v5972_v46, %v5148_v45 }
 0x170   : > { %v2085_v60 = vmax.f32 %v2021_v50, %v2053_v55  ;;  %1038 = vst.msk [vmem:[#allocation2 + $0x16c] sm:$0xf] %vm910_vm0, %v1006_v58  ;;  %v1689_v36 = vadd.f32 %v7248_v44, %v7349_v57  ;;  %v6040_v57 = vld [vmem:[#allocation19 + $0x80] sm:$0xff] }
 0x171   : > { %v2147_v0 = vld [vmem:[#allocation3 + $0x20] ss:$2 sm:$0xff]  ;;  %2794 = vmatpush.bf16.msrb.mxu0 %v6041_v43 }
 0x172   : > { %2117 = vst [vmem:[#allocation3 + $0x30] sm:$0xff] %v2085_v60  ;;  %v2208_v5 = vpack.c.bf16 %v2147_v0, %v2147_v0  ;;  %v5153_v60 = vor.u32 %v5974_v53, %v5152_v52 }
 0x173   : > { %v1861_v7 = vpop.f32.mrf.mxu2  ;;  %v1775_v8 = vpop.f32.mrf.mxu1  ;;  %2176 = vst [vmem:[#allocation4 + $0x10] sm:$0xff] %v2147_v0 }
 0x174   : > { %v7357_v12 = vadd.f32 %v1861_v7, %v1773_v3  ;;  %2224 = vst [vmem:[#allocation5 + $0x18] sm:$0xf] %v2208_v5  ;;  %v1776_v25 = vadd.f32 %v1775_v8, %v1687_v13 }
 0x175   : > { %v1990_v17 = vld [vmem:[#allocation3 + $0x39] sm:$0xff]  ;;  %2795 = vmatpush.bf16.msrb.mxu0 %v6040_v57 }
 0x176   : > { %v2022_v19 = vmax.f32 %v7333_v24, %v1990_v17  ;;  %1928 = vst [vmem:[#allocation3 + $0x48] sm:$0xff] %v7357_v12  ;;  %1814 = vmatmul.bf16.gmra.mxu1 %v5133_v4  ;;  %v2054_v21 = vld [vmem:[#allocation3 + $0x3a] sm:$0xff] }
 0x177   : > { %v1691_v22 = vpop.f32.mrf.mxu0 }
 0x178   : > { %v2086_v23 = vmax.f32 %v2022_v19, %v2054_v21  ;;  %1903 = vmatmul.bf16.gmra.mxu2 %v5137_v14  ;;  %v1692_v55 = vadd.f32 %v7248_v44, %v1691_v22  ;;  %v5973_v14 = vld [vmem:[#allocation2 + $0x16c] sm:$0xf]  ;;  %v5160_v19 = vld [vmem:[#allocation2 + $0x170] sm:$0xf] }
 0x17a   : > { %2118 = vst [vmem:[#allocation3 + $0x38] sm:$0xff] %v2086_v23  ;;  %1730 = vmatmul.bf16.gmra.mxu0 %v5141_v20  ;;  %v2287_v27 = vld [vmem:[#allocation4 + $0xa] sm:$0xff]  ;;  %v5975_v20 = vld [vmem:[#allocation2 + $0x178] sm:$0x70]  ;;  %v5157_v23 = vor.u32 %v5973_v14, %v5154_v16 }
 0x17b   : > { %v2239_v24 = vld [vmem:[#allocation4 + $0x9] sm:$0xff]  ;;  %v1864_v28 = vpop.f32.mrf.mxu2  ;;  %v1777_v29 = vpop.f32.mrf.mxu1  ;;  %v2303_v30 = vpack.c.bf16 %v2287_v27, %v2287_v27  ;;  %v5272_v5 = vld [vmem:[#allocation5 + $0x18] sm:$0xf] }
 0x17c   : > { %v2255_v31 = vpack.c.bf16 %v2239_v24, %v2239_v24  ;;  %v7365_v32 = vadd.f32 %v1864_v28, %v1776_v25  ;;  %v1778_v48 = vadd.f32 %v1777_v29, %v1689_v36  ;;  %v5161_v29 = vor.u32 %v5975_v20, %v5160_v19 }
 0x17d   : > { %v1991_v34 = vld [vmem:[#allocation3 + $0x41] sm:$0xff]  ;;  %2319 = vst [vmem:[#allocation5 + $0x14] sm:$0xf] %v2303_v30 }
 0x17e   : > { %v2023_v35 = vmax.f32 %v7341_v41, %v1991_v34  ;;  %1929 = vst [vmem:[#allocation3 + $0x50] sm:$0xff] %v7365_v32  ;;  %v2055_v38 = vld [vmem:[#allocation3 + $0x42] sm:$0xff] }
 0x17f   : > { %v1693_v40 = vpop.f32.mrf.mxu0  ;;  %2271 = vst [vmem:[#allocation5 + $0x10] sm:$0xf] %v2255_v31 }
 0x180   : > { %v2087_v42 = vmax.f32 %v2023_v35, %v2055_v38  ;;  %v1694_v13 = vadd.f32 %v7248_v44, %v1693_v40  ;;  %v5268_v35 = vld [vmem:[#allocation5 + $0x8] sm:$0xf] }
 0x181   : > { %v2149_v47 = vld [vmem:[#allocation3 + $0x30] ss:$2 sm:$0xff] }
 0x182   : > { %2119 = vst [vmem:[#allocation3 + $0x40] sm:$0xff] %v2087_v42  ;;  %v2209_v41 = vpack.c.bf16 %v2149_v47, %v2149_v47 }
 0x183   : > { %v1866_v50 = vpop.f32.mrf.mxu2  ;;  %v1780_v51 = vpop.f32.mrf.mxu1  ;;  %2177 = vst [vmem:[#allocation4 + $0x18] sm:$0xff] %v2149_v47 }
 0x184   : > { %v7371_v54 = vadd.f32 %v1866_v50, %v1778_v48  ;;  %2225 = vst [vmem:[#allocation5 + $0x24] sm:$0xf] %v2209_v41  ;;  %v1781_v0 = vadd.f32 %v1780_v51, %v1692_v55  ;;  %v6002_v31 = vld [vmem:[#allocation5 + $0x10] sm:$0xf0] }
 0x185   : > { %v1992_v59 = vld [vmem:[#allocation3 + $0x49] sm:$0xff]  ;;  %v5269_v38 = vor.u32 %v6002_v31, %v5268_v35 }
 0x186   : > { %v2024_v58 = vmax.f32 %v7357_v12, %v1992_v59  ;;  %1930 = vst [vmem:[#allocation3 + $0x58] sm:$0xff] %v7371_v54  ;;  %1819 = vmatmul.bf16.gmra.mxu1 %v5145_v49  ;;  %v2056_v61 = vld [vmem:[#allocation3 + $0x4a] sm:$0xff] }
 0x187   : > { %v1696_v62 = vpop.f32.mrf.mxu0 }
 0x188   : > { %v2088_v63 = vmax.f32 %v2024_v58, %v2056_v61  ;;  %1908 = vmatmul.bf16.gmra.mxu2 %v5149_v56  ;;  %v1697_v28 = vadd.f32 %v7248_v44, %v1696_v62 }
 0x18a   : > { %2120 = vst [vmem:[#allocation3 + $0x48] sm:$0xff] %v2088_v63  ;;  %1735 = vmatmul.bf16.gmra.mxu0 %v5153_v60  ;;  %v2288_v1 = vld [vmem:[#allocation4 + $0x12] sm:$0xff] }
 0x18b   : > { %v2240_v2 = vld [vmem:[#allocation4 + $0x11] sm:$0xff]  ;;  %v1869_v3 = vpop.f32.mrf.mxu2  ;;  %v1782_v4 = vpop.f32.mrf.mxu1  ;;  %v6004_v6 = vld [vmem:[#allocation5 + $0x20] sm:$0xf0]  ;;  %v2304_v7 = vpack.c.bf16 %v2288_v1, %v2288_v1 }
 0x18c   : > { %v2256_v8 = vpack.c.bf16 %v2240_v2, %v2240_v2  ;;  %v1870_v9 = vadd.f32 %v1869_v3, %v1781_v0  ;;  %v5273_v10 = vor.u32 %v6004_v6, %v5272_v5  ;;  %v1783_v22 = vadd.f32 %v1782_v4, %v1694_v13 }
 0x18d   : > { %v1993_v11 = vld [vmem:[#allocation3 + $0x51] sm:$0xff]  ;;  %2320 = vst [vmem:[#allocation5 + $0x20] sm:$0xf] %v2304_v7 }
 0x18e   : > { %v2025_v12 = vmax.f32 %v7365_v32, %v1993_v11  ;;  %1931 = vst [vmem:[#allocation3 + $0x60] sm:$0xff] %v1870_v9  ;;  %2703 = vmatmul.bf16.gmra.mxu3 %v5273_v10  ;;  %v2057_v15 = vld [vmem:[#allocation3 + $0x52] sm:$0xff] }
 0x18f   : > { %v1698_v17 = vpop.f32.mrf.mxu0  ;;  %2272 = vst [vmem:[#allocation5 + $0x1c] sm:$0xf] %v2256_v8 }
 0x190   : > { %v2089_v18 = vmax.f32 %v2025_v12, %v2057_v15  ;;  %v1699_v41 = vadd.f32 %v7248_v44, %v1698_v17 }
 0x191   : > { %v2151_v21 = vld [vmem:[#allocation3 + $0x40] ss:$2 sm:$0xff] }
 0x192   : > { %2121 = vst [vmem:[#allocation3 + $0x50] sm:$0xff] %v2089_v18  ;;  %v2210_v25 = vpack.c.bf16 %v2151_v21, %v2151_v21 }
 0x193   : > { %v1871_v26 = vpop.f32.mrf.mxu2  ;;  %v1785_v27 = vpop.f32.mrf.mxu1  ;;  %2178 = vst [vmem:[#allocation4 + $0x20] sm:$0xff] %v2151_v21 }
 0x194   : > { %v1872_v24 = vadd.f32 %v1871_v26, %v1783_v22  ;;  %2226 = vst [vmem:[#allocation5 + $0x30] sm:$0xf] %v2210_v25  ;;  %v1786_v37 = vadd.f32 %v1785_v27, %v1697_v28  ;;  %v5280_v1 = vld [vmem:[#allocation5 + $0x20] sm:$0xf] }
 0x195   : > { %v1994_v30 = vld [vmem:[#allocation3 + $0x59] sm:$0xff] }
 0x196   : > { %v2026_v32 = vmax.f32 %v7371_v54, %v1994_v30  ;;  %1932 = vst [vmem:[#allocation3 + $0x68] sm:$0xff] %v1872_v24  ;;  %1824 = vmatmul.bf16.gmra.mxu1 %v5157_v23  ;;  %v2058_v33 = vld [vmem:[#allocation3 + $0x5a] sm:$0xff] }
 0x197   : > { %v1701_v34 = vpop.f32.mrf.mxu0 }
 0x198   : > { %v2090_v36 = vmax.f32 %v2026_v32, %v2058_v33  ;;  %1913 = vmatmul.bf16.gmra.mxu2 %v5161_v29  ;;  %v1702_v58 = vadd.f32 %v7248_v44, %v1701_v34 }
 0x19a   : > { %2122 = vst [vmem:[#allocation3 + $0x58] sm:$0xff] %v2090_v36  ;;  %2796 = vmatmul.bf16.vlgmr.msrb.gmra.mxu0 %v5269_v38  ;;  %v2289_v39 = vld [vmem:[#allocation4 + $0x1a] sm:$0xff] }
 0x19b   : > { %v2241_v40 = vld [vmem:[#allocation4 + $0x19] sm:$0xff]  ;;  %v1874_v42 = vpop.f32.mrf.mxu2  ;;  %v1787_v43 = vpop.f32.mrf.mxu1  ;;  %v2305_v45 = vpack.c.bf16 %v2289_v39, %v2289_v39 }
 0x19c   : > { %v2257_v46 = vpack.c.bf16 %v2241_v40, %v2241_v40  ;;  %v1875_v47 = vadd.f32 %v1874_v42, %v1786_v37  ;;  %v1788_v54 = vadd.f32 %v1787_v43, %v1699_v41 }
 0x19d   : > { %v1995_v48 = vld [vmem:[#allocation3 + $0x61] sm:$0xff]  ;;  %2321 = vst [vmem:[#allocation5 + $0x2c] sm:$0xf] %v2305_v45 }
 0x19e   : > { %v2027_v49 = vmax.f32 %v1870_v9, %v1995_v48  ;;  %1933 = vst [vmem:[#allocation3 + $0x70] sm:$0xff] %v1875_v47  ;;  %v2059_v50 = vld [vmem:[#allocation3 + $0x62] sm:$0xff]  ;;  %v5284_v9 = vld [vmem:[#allocation5 + $0x30] sm:$0xf] }
 0x19f   : > { %v1703_v51 = vpop.f32.mrf.mxu0  ;;  %2273 = vst [vmem:[#allocation5 + $0x28] sm:$0xf] %v2257_v46 }
 0x1a0   : > { %v2091_v52 = vmax.f32 %v2027_v49, %v2059_v50  ;;  %v1704_v17 = vadd.f32 %v7248_v44, %v1703_v51 }
 0x1a1   : > { %v2153_v53 = vld [vmem:[#allocation3 + $0x50] ss:$2 sm:$0xff] }
 0x1a2   : > { %2123 = vst [vmem:[#allocation3 + $0x60] sm:$0xff] %v2091_v52  ;;  %v2211_v55 = vpack.c.bf16 %v2153_v53, %v2153_v53 }
 0x1a3   : > { %v1876_v56 = vpop.f32.mrf.mxu2  ;;  %v1790_v57 = vpop.f32.mrf.mxu1  ;;  %2179 = vst [vmem:[#allocation4 + $0x28] sm:$0xff] %v2153_v53 }
 0x1a4   : > { %v1877_v59 = vadd.f32 %v1876_v56, %v1788_v54  ;;  %2227 = vst [vmem:[#allocation5 + $0x3c] sm:$0xf] %v2211_v55  ;;  %v6005_v61 = vld [vmem:[#allocation5 + $0x28] sm:$0xf0]  ;;  %v1791_v3 = vadd.f32 %v1790_v57, %v1702_v58 }
 0x1a5   : > { %v1996_v60 = vld [vmem:[#allocation3 + $0x69] sm:$0xff]  ;;  %v5281_v4 = vor.u32 %v6005_v61, %v5280_v1 }
 0x1a6   : > { %v2028_v62 = vmax.f32 %v1872_v24, %v1996_v60  ;;  %1934 = vst [vmem:[#allocation3 + $0x78] sm:$0xff] %v1877_v59  ;;  %v2060_v63 = vld [vmem:[#allocation3 + $0x6a] sm:$0xff] }
 0x1a7   : > { %v1706_v0 = vpop.f32.mrf.mxu0 }
 0x1a8   : > { %v2092_v2 = vmax.f32 %v2028_v62, %v2060_v63  ;;  %v1707_v24 = vadd.f32 %v7248_v44, %v1706_v0  ;;  %v7384_v44 = vld [vmem:[#allocation17] ss:$0 sm:$0xff] }
 0x1a9   : > { %v6039_v0 = vld [vmem:[#allocation19 + $0x78] sm:$0xff] }
 0x1aa   : > { %2124 = vst [vmem:[#allocation3 + $0x68] sm:$0xff] %v2092_v2  ;;  %2801 = vmatmul.bf16.gmra.mxu0 %v5281_v4  ;;  %v2290_v5 = vld [vmem:[#allocation4 + $0x22] sm:$0xff]  ;;  %2739 = vmatpush.bf16.msrb.mxu3 %v6039_v0 }
 0x1ab   : > { %v2242_v6 = vld [vmem:[#allocation4 + $0x21] sm:$0xff]  ;;  %v1879_v7 = vpop.f32.mrf.mxu2  ;;  %v1792_v8 = vpop.f32.mrf.mxu1  ;;  %v6007_v10 = vld [vmem:[#allocation5 + $0x38] sm:$0xf0]  ;;  %v2306_v11 = vpack.c.bf16 %v2290_v5, %v2290_v5 }
 0x1ac   : > { %v2258_v12 = vpack.c.bf16 %v2242_v6, %v2242_v6  ;;  %v1880_v13 = vadd.f32 %v1879_v7, %v1791_v3  ;;  %v5285_v14 = vor.u32 %v6007_v10, %v5284_v9  ;;  %v1793_v22 = vadd.f32 %v1792_v8, %v1704_v17 }
 0x1ad   : > { %v1997_v15 = vld [vmem:[#allocation3 + $0x71] sm:$0xff]  ;;  %2322 = vst [vmem:[#allocation5 + $0x38] sm:$0xf] %v2306_v11 }
 0x1ae   : > { %v2029_v16 = vmax.f32 %v1875_v47, %v1997_v15  ;;  %1935 = vst [vmem:[#allocation3 + $0x80] sm:$0xff] %v1880_v13  ;;  %2708 = vmatmul.bf16.gmra.mxu3 %v5285_v14  ;;  %v2061_v18 = vld [vmem:[#allocation3 + $0x72] sm:$0xff] }
 0x1af   : > { %v1708_v19 = vpop.f32.mrf.mxu0  ;;  %2274 = vst [vmem:[#allocation5 + $0x34] sm:$0xf] %v2258_v12 }
 0x1b0   : > { %v2093_v20 = vmax.f32 %v2029_v16, %v2061_v18  ;;  %v1709_v45 = vadd.f32 %v7384_v44, %v1708_v19 }
 0x1b1   : > { %v2155_v21 = vld [vmem:[#allocation3 + $0x60] ss:$2 sm:$0xff] }
 0x1b2   : > { %2125 = vst [vmem:[#allocation3 + $0x70] sm:$0xff] %v2093_v20  ;;  %v2212_v23 = vpack.c.bf16 %v2155_v21, %v2155_v21 }
 0x1b3   : > { %v1881_v25 = vpop.f32.mrf.mxu2  ;;  %v1795_v26 = vpop.f32.mrf.mxu1  ;;  %2180 = vst [vmem:[#allocation4 + $0x30] sm:$0xff] %v2155_v21 }
 0x1b4   : > { %v1882_v27 = vadd.f32 %v1881_v25, %v1793_v22  ;;  %2228 = vst [vmem:[#allocation5 + $0x48] sm:$0xf] %v2212_v23  ;;  %v1796_v33 = vadd.f32 %v1795_v26, %v1707_v24  ;;  %v5292_v55 = vld [vmem:[#allocation5 + $0x38] sm:$0xf] }
 0x1b5   : > { %v1998_v28 = vld [vmem:[#allocation3 + $0x79] sm:$0xff] }
 0x1b6   : > { %v2030_v29 = vmax.f32 %v1877_v59, %v1998_v28  ;;  %1936 = vst [vmem:[#allocation3 + $0x88] sm:$0xff] %v1882_v27  ;;  %v2062_v30 = vld [vmem:[#allocation3 + $0x7a] sm:$0xff] }
 0x1b7   : > { %v1711_v31 = vpop.f32.mrf.mxu0 }
 0x1b8   : > { %v2094_v32 = vmax.f32 %v2030_v29, %v2062_v30  ;;  %v1712_v54 = vadd.f32 %v7384_v44, %v1711_v31  ;;  %v6038_v31 = vld [vmem:[#allocation19 + $0x70] sm:$0xff] }
 0x1b9   : > { %2740 = vmatpush.bf16.msrb.mxu3 %v6038_v31 }
 0x1ba   : > { %2126 = vst [vmem:[#allocation3 + $0x78] sm:$0xff] %v2094_v32  ;;  %v2291_v34 = vld [vmem:[#allocation4 + $0x2a] sm:$0xff] }
 0x1bb   : > { %v2243_v35 = vld [vmem:[#allocation4 + $0x29] sm:$0xff]  ;;  %v1884_v36 = vpop.f32.mrf.mxu2  ;;  %v1797_v37 = vpop.f32.mrf.mxu1  ;;  %v2307_v38 = vpack.c.bf16 %v2291_v34, %v2291_v34 }
 0x1bc   : > { %v2259_v39 = vpack.c.bf16 %v2243_v35, %v2243_v35  ;;  %v1885_v40 = vadd.f32 %v1884_v36, %v1796_v33  ;;  %v1798_v41 = vadd.f32 %v1797_v37, %v1709_v45  ;;  %v5296_v5 = vld [vmem:[#allocation5 + $0x48] sm:$0xf] }
 0x1bd   : > { %v1999_v42 = vld [vmem:[#allocation3 + $0x81] sm:$0xff]  ;;  %2323 = vst [vmem:[#allocation5 + $0x44] sm:$0xf] %v2307_v38 }
 0x1be   : > { %v2031_v43 = vmax.f32 %v1880_v13, %v1999_v42  ;;  %1937 = vst [vmem:[#allocation3 + $0x90] sm:$0xff] %v1885_v40  ;;  %v2063_v46 = vld [vmem:[#allocation3 + $0x82] sm:$0xff] }
 0x1bf   : > { %v1713_v47 = vpop.f32.mrf.mxu0  ;;  %2275 = vst [vmem:[#allocation5 + $0x40] sm:$0xf] %v2259_v39 }
 0x1c0   : > { %v2095_v48 = vmax.f32 %v2031_v43, %v2063_v46  ;;  %v1714_v13 = vadd.f32 %v7384_v44, %v1713_v47 }
 0x1c1   : > { %v2157_v49 = vld [vmem:[#allocation3 + $0x70] ss:$2 sm:$0xff] }
 0x1c2   : > { %2127 = vst [vmem:[#allocation3 + $0x80] sm:$0xff] %v2095_v48  ;;  %v2213_v50 = vpack.c.bf16 %v2157_v49, %v2157_v49 }
 0x1c3   : > { %v1886_v51 = vpop.f32.mrf.mxu2  ;;  %v1800_v52 = vpop.f32.mrf.mxu1  ;;  %2181 = vst [vmem:[#allocation4 + $0x38] sm:$0xff] %v2157_v49 }
 0x1c4   : > { %v1887_v53 = vadd.f32 %v1886_v51, %v1798_v41  ;;  %v6008_v56 = vld [vmem:[#allocation5 + $0x40] sm:$0xf0]  ;;  %2229 = vst [vmem:[#allocation5 + $0x54] sm:$0xf] %v2213_v50  ;;  %v1801_v63 = vadd.f32 %v1800_v52, %v1712_v54 }
 0x1c5   : > { %v2000_v57 = vld [vmem:[#allocation3 + $0x89] sm:$0xff]  ;;  %v5293_v59 = vor.u32 %v6008_v56, %v5292_v55 }
 0x1c6   : > { %v2032_v58 = vmax.f32 %v1882_v27, %v2000_v57  ;;  %1938 = vst [vmem:[#allocation3 + $0x98] sm:$0xff] %v1887_v53  ;;  %v2064_v60 = vld [vmem:[#allocation3 + $0x8a] sm:$0xff] }
 0x1c7   : > { %2806 = vmatmul.bf16.gmra.mxu0 %v5293_v59  ;;  %v1716_v61 = vpop.f32.mrf.mxu0 }
 0x1c8   : > { %v2096_v62 = vmax.f32 %v2032_v58, %v2064_v60  ;;  %v1717_v23 = vadd.f32 %v7384_v44, %v1716_v61  ;;  %v6037_v61 = vld [vmem:[#allocation19 + $0x68] sm:$0xff] }
 0x1c9   : > { %2741 = vmatpush.bf16.msrb.mxu3 %v6037_v61 }
 0x1ca   : > { %2128 = vst [vmem:[#allocation3 + $0x88] sm:$0xff] %v2096_v62  ;;  %v2292_v1 = vld [vmem:[#allocation4 + $0x32] sm:$0xff] }
 0x1cb   : > { %v2244_v2 = vld [vmem:[#allocation4 + $0x31] sm:$0xff]  ;;  %v1889_v3 = vpop.f32.mrf.mxu2  ;;  %v1802_v4 = vpop.f32.mrf.mxu1  ;;  %v2308_v7 = vpack.c.bf16 %v2292_v1, %v2292_v1 }
 0x1cc   : > { %v6010_v6 = vld [vmem:[#allocation5 + $0x50] sm:$0xf0]  ;;  %v2260_v8 = vpack.c.bf16 %v2244_v2, %v2244_v2  ;;  %v1890_v9 = vadd.f32 %v1889_v3, %v1801_v63  ;;  %v1803_v18 = vadd.f32 %v1802_v4, %v1714_v13 }
 0x1cd   : > { %v5297_v10 = vor.u32 %v6010_v6, %v5296_v5  ;;  %v2001_v11 = vld [vmem:[#allocation3 + $0x91] sm:$0xff]  ;;  %2324 = vst [vmem:[#allocation5 + $0x50] sm:$0xf] %v2308_v7 }
 0x1ce   : > { %v2033_v12 = vmax.f32 %v1885_v40, %v2001_v11  ;;  %1939 = vst [vmem:[#allocation3 + $0xa0] sm:$0xff] %v1890_v9  ;;  %v2065_v14 = vld [vmem:[#allocation3 + $0x92] sm:$0xff] }
 0x1cf   : > { %2713 = vmatmul.bf16.gmra.mxu3 %v5297_v10  ;;  %v1718_v15 = vpop.f32.mrf.mxu0  ;;  %2276 = vst [vmem:[#allocation5 + $0x4c] sm:$0xf] %v2260_v8 }
 0x1d0   : > { %v2097_v16 = vmax.f32 %v2033_v12, %v2065_v14  ;;  %v1719_v40 = vadd.f32 %v7384_v44, %v1718_v15 }
 0x1d1   : > { %v2159_v17 = vld [vmem:[#allocation3 + $0x80] ss:$2 sm:$0xff] }
 0x1d2   : > { %2129 = vst [vmem:[#allocation3 + $0x90] sm:$0xff] %v2097_v16  ;;  %v2214_v19 = vpack.c.bf16 %v2159_v17, %v2159_v17 }
 0x1d3   : > { %v1891_v20 = vpop.f32.mrf.mxu2  ;;  %v1805_v21 = vpop.f32.mrf.mxu1  ;;  %2182 = vst [vmem:[#allocation4 + $0x40] sm:$0xff] %v2159_v17 }
 0x1d4   : > { %v1892_v22 = vadd.f32 %v1891_v20, %v1803_v18  ;;  %2230 = vst [vmem:[#allocation5 + $0x60] sm:$0xf] %v2214_v19  ;;  %v1806_v29 = vadd.f32 %v1805_v21, %v1717_v23  ;;  %v5304_v52 = vld [vmem:[#allocation5 + $0x50] sm:$0xf] }
 0x1d5   : > { %v2002_v25 = vld [vmem:[#allocation3 + $0x99] sm:$0xff] }
 0x1d6   : > { %v2034_v26 = vmax.f32 %v1887_v53, %v2002_v25  ;;  %1940 = vst [vmem:[#allocation3 + $0xa8] sm:$0xff] %v1892_v22  ;;  %v2066_v27 = vld [vmem:[#allocation3 + $0x9a] sm:$0xff] }
 0x1d7   : > { %v1721_v24 = vpop.f32.mrf.mxu0 }
 0x1d8   : > { %v2098_v28 = vmax.f32 %v2034_v26, %v2066_v27  ;;  %v1722_v51 = vadd.f32 %v7384_v44, %v1721_v24  ;;  %v6036_v24 = vld [vmem:[#allocation19 + $0x60] sm:$0xff] }
 0x1d9   : > { %2742 = vmatpush.bf16.msrb.mxu3 %v6036_v24  ;;  %v6034_v24 = vld [vmem:[#allocation19 + $0x50] sm:$0xff] }
 0x1da   : > { %2130 = vst [vmem:[#allocation3 + $0x98] sm:$0xff] %v2098_v28  ;;  %v2293_v30 = vld [vmem:[#allocation4 + $0x3a] sm:$0xff] }
 0x1db   : > { %v2245_v32 = vld [vmem:[#allocation4 + $0x39] sm:$0xff]  ;;  %v1894_v33 = vpop.f32.mrf.mxu2  ;;  %v1807_v34 = vpop.f32.mrf.mxu1  ;;  %v2309_v35 = vpack.c.bf16 %v2293_v30, %v2293_v30 }
 0x1dc   : > { %v2261_v36 = vpack.c.bf16 %v2245_v32, %v2245_v32  ;;  %v1895_v37 = vadd.f32 %v1894_v33, %v1806_v29  ;;  %v1808_v47 = vadd.f32 %v1807_v34, %v1719_v40  ;;  %v5308_v2 = vld [vmem:[#allocation5 + $0x60] sm:$0xf] }
 0x1dd   : > { %v2003_v38 = vld [vmem:[#allocation3 + $0xa1] sm:$0xff]  ;;  %2325 = vst [vmem:[#allocation5 + $0x5c] sm:$0xf] %v2309_v35 }
 0x1de   : > { %v2035_v39 = vmax.f32 %v1890_v9, %v2003_v38  ;;  %1941 = vst [vmem:[#allocation3 + $0xb0] sm:$0xff] %v1895_v37  ;;  %v2067_v42 = vld [vmem:[#allocation3 + $0xa2] sm:$0xff] }
 0x1df   : > { %v1723_v43 = vpop.f32.mrf.mxu0  ;;  %2277 = vst [vmem:[#allocation5 + $0x58] sm:$0xf] %v2261_v36 }
 0x1e0   : > { %v2099_v45 = vmax.f32 %v2035_v39, %v2067_v42  ;;  %v1724_v10 = vadd.f32 %v7384_v44, %v1723_v43 }
 0x1e1   : > { %v2161_v46 = vld [vmem:[#allocation3 + $0x90] ss:$2 sm:$0xff] }
 0x1e2   : > { %2131 = vst [vmem:[#allocation3 + $0xa0] sm:$0xff] %v2099_v45  ;;  %v2215_v48 = vpack.c.bf16 %v2161_v46, %v2161_v46 }
 0x1e3   : > { %v1896_v49 = vpop.f32.mrf.mxu2  ;;  %v1810_v41 = vpop.f32.mrf.mxu1  ;;  %2183 = vst [vmem:[#allocation4 + $0x48] sm:$0xff] %v2161_v46 }
 0x1e4   : > { %v1897_v50 = vadd.f32 %v1896_v49, %v1808_v47  ;;  %v6011_v53 = vld [vmem:[#allocation5 + $0x58] sm:$0xf0]  ;;  %2231 = vst [vmem:[#allocation5 + $0x6c] sm:$0xf] %v2215_v48  ;;  %v1811_v58 = vadd.f32 %v1810_v41, %v1722_v51 }
 0x1e5   : > { %v2004_v54 = vld [vmem:[#allocation3 + $0xa9] sm:$0xff]  ;;  %v5305_v55 = vor.u32 %v6011_v53, %v5304_v52 }
 0x1e6   : > { %v2036_v56 = vmax.f32 %v1892_v22, %v2004_v54  ;;  %1942 = vst [vmem:[#allocation3 + $0xb8] sm:$0xff] %v1897_v50  ;;  %v2068_v57 = vld [vmem:[#allocation3 + $0xaa] sm:$0xff] }
 0x1e7   : > { %2811 = vmatmul.bf16.gmra.mxu0 %v5305_v55  ;;  %v1726_v60 = vpop.f32.mrf.mxu0 }
 0x1e8   : > { %v2100_v59 = vmax.f32 %v2036_v56, %v2068_v57  ;;  %v1727_v20 = vadd.f32 %v7384_v44, %v1726_v60  ;;  %v6035_v57 = vld [vmem:[#allocation19 + $0x58] sm:$0xff] }
 0x1e9   : > { %2743 = vmatpush.bf16.msrb.mxu3 %v6035_v57 }
 0x1ea   : > { %2132 = vst [vmem:[#allocation3 + $0xa8] sm:$0xff] %v2100_v59  ;;  %v2294_v62 = vld [vmem:[#allocation4 + $0x42] sm:$0xff] }
 0x1eb   : > { %v2246_v63 = vld [vmem:[#allocation4 + $0x41] sm:$0xff]  ;;  %v1899_v0 = vpop.f32.mrf.mxu2  ;;  %v1812_v1 = vpop.f32.mrf.mxu1  ;;  %v6013_v3 = vld [vmem:[#allocation5 + $0x68] sm:$0xf0]  ;;  %v2310_v4 = vpack.c.bf16 %v2294_v62, %v2294_v62 }
 0x1ec   : > { %v2262_v5 = vpack.c.bf16 %v2246_v63, %v2246_v63  ;;  %v1900_v6 = vadd.f32 %v1899_v0, %v1811_v58  ;;  %v5309_v7 = vor.u32 %v6013_v3, %v5308_v2  ;;  %v1813_v14 = vadd.f32 %v1812_v1, %v1724_v10 }
 0x1ed   : > { %v2005_v8 = vld [vmem:[#allocation3 + $0xb1] sm:$0xff]  ;;  %2326 = vst [vmem:[#allocation5 + $0x68] sm:$0xf] %v2310_v4  ;;  %2744 = vmatpush.bf16.msrb.mxu3 %v6034_v24 }
 0x1ee   : > { %v2037_v9 = vmax.f32 %v1895_v37, %v2005_v8  ;;  %1943 = vst [vmem:[#allocation3 + $0xc0] sm:$0xff] %v1900_v6  ;;  %2718 = vmatmul.bf16.gmra.mxu3 %v5309_v7  ;;  %v2069_v11 = vld [vmem:[#allocation3 + $0xb2] sm:$0xff] }
 0x1ef   : > { %2278 = vst [vmem:[#allocation5 + $0x64] sm:$0xf] %v2262_v5  ;;  %v1728_v15 = vpop.f32.mrf.mxu0 }
 0x1f0   : > { %v2101_v12 = vmax.f32 %v2037_v9, %v2069_v11  ;;  %v1729_v37 = vadd.f32 %v7384_v44, %v1728_v15 }
 0x1f1   : > { %v2163_v13 = vld [vmem:[#allocation3 + $0xa0] ss:$2 sm:$0xff] }
 0x1f2   : > { %2133 = vst [vmem:[#allocation3 + $0xb0] sm:$0xff] %v2101_v12  ;;  %v2216_v16 = vpack.c.bf16 %v2163_v13, %v2163_v13 }
 0x1f3   : > { %v1901_v17 = vpop.f32.mrf.mxu2  ;;  %v1815_v18 = vpop.f32.mrf.mxu1  ;;  %2184 = vst [vmem:[#allocation4 + $0x50] sm:$0xff] %v2163_v13 }
 0x1f4   : > { %v1902_v19 = vadd.f32 %v1901_v17, %v1813_v14  ;;  %2232 = vst [vmem:[#allocation5 + $0x78] sm:$0xf] %v2216_v16  ;;  %v1816_v26 = vadd.f32 %v1815_v18, %v1727_v20  ;;  %v5316_v49 = vld [vmem:[#allocation5 + $0x68] sm:$0xf] }
 0x1f5   : > { %v2006_v21 = vld [vmem:[#allocation3 + $0xb9] sm:$0xff] }
 0x1f6   : > { %v2038_v22 = vmax.f32 %v1897_v50, %v2006_v21  ;;  %1944 = vst [vmem:[#allocation3 + $0xc8] sm:$0xff] %v1902_v19  ;;  %v2070_v23 = vld [vmem:[#allocation3 + $0xba] sm:$0xff] }
 0x1f7   : > { %v1731_v35 = vpop.f32.mrf.mxu0 }
 0x1f8   : > { %v2102_v25 = vmax.f32 %v2038_v22, %v2070_v23  ;;  %v1732_v48 = vadd.f32 %v7384_v44, %v1731_v35 }
 0x1fa   : > { %2134 = vst [vmem:[#allocation3 + $0xb8] sm:$0xff] %v2102_v25  ;;  %v2295_v27 = vld [vmem:[#allocation4 + $0x4a] sm:$0xff] }
 0x1fb   : > { %v2247_v28 = vld [vmem:[#allocation4 + $0x49] sm:$0xff]  ;;  %v1904_v29 = vpop.f32.mrf.mxu2  ;;  %v1817_v30 = vpop.f32.mrf.mxu1  ;;  %v2311_v31 = vpack.c.bf16 %v2295_v27, %v2295_v27  ;;  %v5320_v61 = vld [vmem:[#allocation5 + $0x78] sm:$0xf] }
 0x1fc   : > { %v2263_v32 = vpack.c.bf16 %v2247_v28, %v2247_v28  ;;  %v1905_v33 = vadd.f32 %v1904_v29, %v1816_v26  ;;  %v1818_v42 = vadd.f32 %v1817_v30, %v1729_v37 }
 0x1fd   : > { %v2007_v34 = vld [vmem:[#allocation3 + $0xc1] sm:$0xff]  ;;  %2327 = vst [vmem:[#allocation5 + $0x74] sm:$0xf] %v2311_v31  ;;  %v6033_v31 = vld [vmem:[#allocation19 + $0x48] sm:$0xff] }
 0x1fe   : > { %v2039_v36 = vmax.f32 %v1900_v6, %v2007_v34  ;;  %1945 = vst [vmem:[#allocation3 + $0xd0] sm:$0xff] %v1905_v33  ;;  %v2071_v38 = vld [vmem:[#allocation3 + $0xc2] sm:$0xff]  ;;  %2745 = vmatpush.bf16.msrb.mxu3 %v6033_v31  ;;  %v5262_v31 = vld [vmem:[#allocation5 + $0xc] sm:$0xf0] }
 0x1ff   : > { %2279 = vst [vmem:[#allocation5 + $0x70] sm:$0xf] %v2263_v32  ;;  %v1733_v54 = vpop.f32.mrf.mxu0 }
 0x200   : > { %v2103_v39 = vmax.f32 %v2039_v36, %v2071_v38  ;;  %v1734_v6 = vadd.f32 %v7384_v44, %v1733_v54 }
 0x201   : > { %v2165_v40 = vld [vmem:[#allocation3 + $0xb0] ss:$2 sm:$0xff] }
 0x202   : > { %2135 = vst [vmem:[#allocation3 + $0xc0] sm:$0xff] %v2103_v39  ;;  %v2217_v43 = vpack.c.bf16 %v2165_v40, %v2165_v40 }
 0x203   : > { %v1906_v45 = vpop.f32.mrf.mxu2  ;;  %v1820_v46 = vpop.f32.mrf.mxu1  ;;  %2185 = vst [vmem:[#allocation4 + $0x58] sm:$0xff] %v2165_v40 }
 0x204   : > { %v1907_v47 = vadd.f32 %v1906_v45, %v1818_v42  ;;  %v6014_v41 = vld [vmem:[#allocation5 + $0x70] sm:$0xf0]  ;;  %2233 = vst [vmem:[#allocation5 + $0x84] sm:$0xf] %v2217_v43  ;;  %v1821_v56 = vadd.f32 %v1820_v46, %v1732_v48 }
 0x205   : > { %v2008_v50 = vld [vmem:[#allocation3 + $0xc9] sm:$0xff]  ;;  %v5317_v51 = vor.u32 %v6014_v41, %v5316_v49 }
 0x206   : > { %v2040_v52 = vmax.f32 %v1902_v19, %v2008_v50  ;;  %1946 = vst [vmem:[#allocation3 + $0xd8] sm:$0xff] %v1907_v47  ;;  %v2072_v53 = vld [vmem:[#allocation3 + $0xca] sm:$0xff] }
 0x207   : > { %2816 = vmatmul.bf16.gmra.mxu0 %v5317_v51  ;;  %v1736_v9 = vpop.f32.mrf.mxu0 }
 0x208   : > { %v2104_v55 = vmax.f32 %v2040_v52, %v2072_v53  ;;  %v1737_v15 = vadd.f32 %v7384_v44, %v1736_v9  ;;  %v6083_v9 = vld [vmem:[%s7876_s5 + $0x78] sm:$0xff] }
 0x209   : > { %3586 = vmatpush.bf16.msrb.mxu2 %v6083_v9 }
 0x20a   : > { %2136 = vst [vmem:[#allocation3 + $0xc8] sm:$0xff] %v2104_v55  ;;  %v2296_v59 = vld [vmem:[#allocation4 + $0x52] sm:$0xff] }
 0x20b   : > { %v2248_v58 = vld [vmem:[#allocation4 + $0x51] sm:$0xff]  ;;  %v1909_v60 = vpop.f32.mrf.mxu2  ;;  %v6016_v62 = vld [vmem:[#allocation5 + $0x80] sm:$0xf0]  ;;  %v2312_v63 = vpack.c.bf16 %v2296_v59, %v2296_v59  ;;  %v1822_v4 = vpop.f32.mrf.mxu1 }
 0x20c   : > { %v2264_v0 = vpack.c.bf16 %v2248_v58, %v2248_v58  ;;  %v1910_v1 = vadd.f32 %v1909_v60, %v1821_v56  ;;  %v5321_v2 = vor.u32 %v6016_v62, %v5320_v61  ;;  %v1823_v11 = vadd.f32 %v1822_v4, %v1734_v6 }
 0x20d   : > { %v2009_v3 = vld [vmem:[#allocation3 + $0xd1] sm:$0xff]  ;;  %2328 = vst [vmem:[#allocation5 + $0x80] sm:$0xf] %v2312_v63  ;;  %v6032_v63 = vld [vmem:[#allocation19 + $0x40] sm:$0xff] }
 0x20e   : > { %v2041_v5 = vmax.f32 %v1905_v33, %v2009_v3  ;;  %1947 = vst [vmem:[#allocation3 + $0xe0] sm:$0xff] %v1910_v1  ;;  %2723 = vmatmul.bf16.gmra.mxu3 %v5321_v2  ;;  %v2073_v7 = vld [vmem:[#allocation3 + $0xd2] sm:$0xff] }
 0x20f   : > { %2280 = vst [vmem:[#allocation5 + $0x7c] sm:$0xf] %v2264_v0  ;;  %v1738_v26 = vpop.f32.mrf.mxu0  ;;  %2746 = vmatpush.bf16.msrb.mxu3 %v6032_v63 }
 0x210   : > { %v2105_v8 = vmax.f32 %v2041_v5, %v2073_v7  ;;  %v1739_v33 = vadd.f32 %v7384_v44, %v1738_v26 }
 0x211   : > { %v2167_v10 = vld [vmem:[#allocation3 + $0xc0] ss:$2 sm:$0xff] }
 0x212   : > { %2137 = vst [vmem:[#allocation3 + $0xd0] sm:$0xff] %v2105_v8  ;;  %v2218_v12 = vpack.c.bf16 %v2167_v10, %v2167_v10 }
 0x213   : > { %v1911_v13 = vpop.f32.mrf.mxu2  ;;  %2186 = vst [vmem:[#allocation4 + $0x60] sm:$0xff] %v2167_v10  ;;  %v1825_v19 = vpop.f32.mrf.mxu1  ;;  %v6075_v10 = vld [vmem:[%s7876_s5 + $0x38] sm:$0xff] }
 0x214   : > { %v1912_v14 = vadd.f32 %v1911_v13, %v1823_v11  ;;  %2234 = vst [vmem:[#allocation5 + $0x90] sm:$0xf] %v2218_v12  ;;  %v1826_v21 = vadd.f32 %v1825_v19, %v1737_v15  ;;  %v5328_v43 = vld [vmem:[#allocation5 + $0x80] sm:$0xf]  ;;  %3557 = vmatpush.bf16.msrb.mxu1 %v6075_v10 }
 0x215   : > { %v2010_v16 = vld [vmem:[#allocation3 + $0xd9] sm:$0xff] }
 0x216   : > { %v2042_v17 = vmax.f32 %v1907_v47, %v2010_v16  ;;  %1948 = vst [vmem:[#allocation3 + $0xe8] sm:$0xff] %v1912_v14  ;;  %v2074_v18 = vld [vmem:[#allocation3 + $0xda] sm:$0xff] }
 0x218   : > { %v2106_v20 = vmax.f32 %v2042_v17, %v2074_v18 }
 0x21a   : > { %2138 = vst [vmem:[#allocation3 + $0xd8] sm:$0xff] %v2106_v20  ;;  %v2297_v22 = vld [vmem:[#allocation4 + $0x5a] sm:$0xff] }
 0x21b   : > { %v2249_v23 = vld [vmem:[#allocation4 + $0x59] sm:$0xff]  ;;  %v1914_v25 = vpop.f32.mrf.mxu2  ;;  %v2313_v27 = vpack.c.bf16 %v2297_v22, %v2297_v22  ;;  %v1827_v36 = vpop.f32.mrf.mxu1  ;;  %v5332_v51 = vld [vmem:[#allocation5 + $0x90] sm:$0xf] }
 0x21c   : > { %v2265_v28 = vpack.c.bf16 %v2249_v23, %v2249_v23  ;;  %v1915_v29 = vadd.f32 %v1914_v25, %v1826_v21  ;;  %v1828_v38 = vadd.f32 %v1827_v36, %v1739_v33  ;;  %v6074_v36 = vld [vmem:[%s7876_s5 + $0x30] sm:$0xff] }
 0x21d   : > { %v2011_v30 = vld [vmem:[#allocation3 + $0xe1] sm:$0xff]  ;;  %2329 = vst [vmem:[#allocation5 + $0x8c] sm:$0xf] %v2313_v27  ;;  %3558 = vmatpush.bf16.msrb.mxu1 %v6074_v36 }
 0x21e   : > { %v2043_v32 = vmax.f32 %v1910_v1, %v2011_v30  ;;  %1949 = vst [vmem:[#allocation3 + $0xf0] sm:$0xff] %v1915_v29  ;;  %v2075_v34 = vld [vmem:[#allocation3 + $0xe2] sm:$0xff] }
 0x21f   : > { %2281 = vst [vmem:[#allocation5 + $0x88] sm:$0xf] %v2265_v28 }
 0x220   : > { %v2107_v35 = vmax.f32 %v2043_v32, %v2075_v34  ;;  %v6000_v32 = vld [vmem:[#allocation5 + $0x4] sm:$0xf] }
 0x221   : > { %v2169_v37 = vld [vmem:[#allocation3 + $0xd0] ss:$2 sm:$0xff]  ;;  %v5265_v33 = vor.u32 %v6000_v32, %v5262_v31 }
 0x222   : > { %2139 = vst [vmem:[#allocation3 + $0xe0] sm:$0xff] %v2107_v35  ;;  %v2219_v39 = vpack.c.bf16 %v2169_v37, %v2169_v37  ;;  %v6082_v35 = vld [vmem:[%s7876_s5 + $0x70] sm:$0xff] }
 0x223   : > { %v1916_v40 = vpop.f32.mrf.mxu2  ;;  %2187 = vst [vmem:[#allocation4 + $0x68] sm:$0xff] %v2169_v37  ;;  %3587 = vmatpush.bf16.msrb.mxu2 %v6082_v35  ;;  %v6070_v31 = vld [vmem:[%s7876_s5 + $0x10] sm:$0xff] }
 0x224   : > { %v1917_v42 = vadd.f32 %v1916_v40, %v1828_v38  ;;  %v6017_v45 = vld [vmem:[#allocation5 + $0x88] sm:$0xf0]  ;;  %2235 = vst [vmem:[#allocation5 + $0x9c] sm:$0xf] %v2219_v39  ;;  %v5274_v38 = vld [vmem:[#allocation5 + $0x24] sm:$0xf0] }
 0x225   : > { %v2012_v46 = vld [vmem:[#allocation3 + $0xe9] sm:$0xff]  ;;  %v5329_v47 = vor.u32 %v6017_v45, %v5328_v43  ;;  %v6003_v39 = vld [vmem:[#allocation5 + $0x1c] sm:$0xf]  ;;  %v5286_v45 = vld [vmem:[#allocation5 + $0x3c] sm:$0xf0] }
 0x226   : > { %v2044_v48 = vmax.f32 %v1912_v14, %v2012_v46  ;;  %1950 = vst [vmem:[#allocation3 + $0xf8] sm:$0x3f] %v1917_v42  ;;  %v2076_v44 = vld [vmem:[#allocation3 + $0xea] sm:$0xff]  ;;  %v5277_v40 = vor.u32 %v6003_v39, %v5274_v38  ;;  %v6006_v46 = vld [vmem:[#allocation5 + $0x34] sm:$0xf] }
 0x227   : > { %2821 = vmatmul.bf16.gmra.mxu0 %v5329_v47  ;;  %v5289_v47 = vor.u32 %v6006_v46, %v5286_v45 }
 0x228   : > { %v2108_v49 = vmax.f32 %v2044_v48, %v2076_v44  ;;  %v6081_v48 = vld [vmem:[%s7876_s5 + $0x68] sm:$0xff] }
 0x229   : > { %v6073_v44 = vld [vmem:[%s7876_s5 + $0x28] sm:$0xff]  ;;  %3588 = vmatpush.bf16.msrb.mxu2 %v6081_v48 }
 0x22a   : > { %2140 = vst [vmem:[#allocation3 + $0xe8] sm:$0xff] %v2108_v49  ;;  %v2298_v41 = vld [vmem:[#allocation4 + $0x62] sm:$0xff]  ;;  %3559 = vmatpush.bf16.msrb.mxu1 %v6073_v44 }
 0x22b   : > { %v2250_v50 = vld [vmem:[#allocation4 + $0x61] sm:$0xff]  ;;  %v6019_v52 = vld [vmem:[#allocation5 + $0x98] sm:$0xf0]  ;;  %v2314_v53 = vpack.c.bf16 %v2298_v41, %v2298_v41 }
 0x22c   : > { %v2266_v54 = vpack.c.bf16 %v2250_v50, %v2250_v50  ;;  %v5333_v55 = vor.u32 %v6019_v52, %v5332_v51  ;;  %v5298_v50 = vld [vmem:[#allocation5 + $0x54] sm:$0xf0]  ;;  %v6009_v51 = vld [vmem:[#allocation5 + $0x4c] sm:$0xf] }
 0x22d   : > { %v1982_v56 = vld [vmem:[#allocation3 + $0xf8] sm:$0xf]  ;;  %2330 = vst [vmem:[#allocation5 + $0x98] sm:$0xf] %v2314_v53  ;;  %v5301_v52 = vor.u32 %v6009_v51, %v5298_v50 }
 0x22e   : > { %v2013_v57 = vld [vmem:[#allocation3 + $0xf1] sm:$0xff]  ;;  %v2014_v59 = vld [vmem:[#allocation3 + $0xf9] sm:$0xf]  ;;  %2728 = vmatmul.bf16.gmra.mxu3 %v5333_v55  ;;  %2282 = vst [vmem:[#allocation5 + $0x94] sm:$0xf] %v2266_v54 }
 0x22f   : > { %v2045_v58 = vmax.f32 %v1915_v29, %v2013_v57  ;;  %v2046_v60 = vmax.f32 %v1982_v56, %v2014_v59  ;;  %v2077_v61 = vld [vmem:[#allocation3 + $0xf2] sm:$0xff]  ;;  %v2078_v62 = vld [vmem:[#allocation3 + $0xfa] sm:$0xf]  ;;  %v7405_v29 = vpop.f32.mrf.mxu3  ;;  %v6012_v56 = vld [vmem:[#allocation5 + $0x64] sm:$0xf] }
 0x230   : > { %v5310_v54 = vld [vmem:[#allocation5 + $0x6c] sm:$0xf0]  ;;  %v6080_v59 = vld [vmem:[%s7876_s5 + $0x60] sm:$0xff] }
 0x231   : > { %v2109_v0 = vmax.f32 %v2045_v58, %v2077_v61  ;;  %v2110_v1 = vmax.f32 %v2046_v60, %v2078_v62  ;;  %v2171_v2 = vld [vmem:[#allocation3 + $0xe0] ss:$2 sm:$0xff]  ;;  %v5313_v57 = vor.u32 %v6012_v56, %v5310_v54  ;;  %3589 = vmatpush.bf16.msrb.mxu2 %v6080_v59  ;;  %v6015_v62 = vld [vmem:[#allocation5 + $0x7c] sm:$0xf] }
 0x232   : > { %v2220_v3 = vpack.c.bf16 %v2171_v2, %v2171_v2  ;;  %2188 = vst [vmem:[#allocation4 + $0x70] sm:$0xff] %v2171_v2  ;;  %v6072_v58 = vld [vmem:[%s7876_s5 + $0x20] sm:$0xff]  ;;  %v5322_v61 = vld [vmem:[#allocation5 + $0x84] sm:$0xf0] }
 0x233   : > { %2141 = vst [vmem:[#allocation3 + $0xf0] sm:$0xff] %v2109_v0  ;;  %3560 = vmatpush.bf16.msrb.mxu1 %v6072_v58  ;;  %v5325_v63 = vor.u32 %v6015_v62, %v5322_v61 }
 0x234   : > { %2142 = vst [vmem:[#allocation3 + $0xf8] sm:$0xf] %v2110_v1  ;;  %v5340_v20 = vld [vmem:[#allocation5 + $0x98] sm:$0xf] }
 0x235   : > { %2236 = vst [vmem:[#allocation5 + $0xa8] sm:$0xf] %v2220_v3  ;;  %v6018_v3 = vld [vmem:[#allocation5 + $0x94] sm:$0xf] }
 0x237   : > { %v7407_v34 = vpop.f32.mrf.mxu3 }
 0x239   : > { %v2299_v5 = vld [vmem:[#allocation4 + $0x6a] sm:$0xff] }
 0x23a   : > { %v2251_v6 = vld [vmem:[#allocation4 + $0x69] sm:$0xff]  ;;  %v2315_v7 = vpack.c.bf16 %v2299_v5, %v2299_v5  ;;  %v6079_v5 = vld [vmem:[%s7876_s5 + $0x58] sm:$0xff] }
 0x23b   : > { %v2173_v4 = vld [vmem:[#allocation3 + $0xf0] ss:$2 sm:$0x3f]  ;;  %v2267_v8 = vpack.c.bf16 %v2251_v6, %v2251_v6  ;;  %3590 = vmatpush.bf16.msrb.mxu2 %v6079_v5  ;;  %v6077_v5 = vld [vmem:[%s7876_s5 + $0x48] sm:$0xff] }
 0x23c   : > { %2189 = vst [vmem:[#allocation4 + $0x78] sm:$0x3f] %v2173_v4  ;;  %v5344_v25 = vld [vmem:[#allocation5 + $0xa8] sm:$0xf] }
 0x23d   : > { %2331 = vst [vmem:[#allocation5 + $0xa4] sm:$0xf] %v2315_v7  ;;  %v6071_v7 = vld [vmem:[%s7876_s5 + $0x18] sm:$0xff] }
 0x23e   : > { %2283 = vst [vmem:[#allocation5 + $0xa0] sm:$0xf] %v2267_v8  ;;  %3561 = vmatpush.bf16.msrb.mxu1 %v6071_v7 }
 0x23f   : > { %v7415_v37 = vpop.f32.mrf.mxu3 }
 0x242   : > { %3562 = vmatpush.bf16.msrb.mxu1 %v6070_v31 }
 0x243   : > { %v2205_v11 = vld [vmem:[#allocation4 + $0x78] sm:$0xf] }
 0x244   : > { %v2300_v12 = vld [vmem:[#allocation4 + $0x72] sm:$0xff]  ;;  %v2301_v13 = vld [vmem:[#allocation4 + $0x7a] sm:$0xf]  ;;  %v2221_v14 = vpack.c.bf16 %v2205_v11, %v2205_v11  ;;  %v6020_v21 = vld [vmem:[#allocation5 + $0xa0] sm:$0xf0] }
 0x245   : > { %v2316_v15 = vpack.c.bf16 %v2300_v12, %v2300_v12  ;;  %v2317_v16 = vpack.c.bf16 %v2301_v13, %v2301_v13  ;;  %v2252_v17 = vld [vmem:[#allocation4 + $0x71] sm:$0xff]  ;;  %v2253_v18 = vld [vmem:[#allocation4 + $0x79] sm:$0xf]  ;;  %v5341_v23 = vor.u32 %v6020_v21, %v5340_v20  ;;  %v5334_v2 = vld [vmem:[#allocation5 + $0x9c] sm:$0xf0]  ;;  %v2797_v12 = vpop.f32.mrf.mxu0 }
 0x246   : > { %v2268_v19 = vpack.c.bf16 %v2252_v17, %v2252_v17  ;;  %2237 = vst [vmem:[#allocation5 + $0xb4] sm:$0x3] %v2221_v14  ;;  %v2269_v22 = vpack.c.bf16 %v2253_v18, %v2253_v18  ;;  %v5337_v4 = vor.u32 %v6018_v3, %v5334_v2  ;;  %v6091_v2 = vld [vmem:[%s7876_s5 + $0xb8] sm:$0xff] }
 0x247   : > { %2332 = vst [vmem:[#allocation5 + $0xb0] sm:$0xf] %v2316_v15  ;;  %2826 = vmatmul.bf16.gmra.mxu0 %v5341_v23  ;;  %v7417_v42 = vpop.f32.mrf.mxu3  ;;  %3615 = vmatpush.bf16.msra.mxu3 %v6091_v2 }
 0x248   : > { %2333 = vst [vmem:[#allocation5 + $0xbc] sm:$0x3] %v2317_v16  ;;  %v7461_v16 = vld [vmem:[#allocation20] ss:$0 sm:$0xff] }
 0x249   : > { %2284 = vst [vmem:[#allocation5 + $0xac] sm:$0xf] %v2268_v19  ;;  %v2700_v17 = vadd.f32 %v7461_v16, %v7405_v29  ;;  %v2707_v38 = vadd.f32 %v7461_v16, %v7417_v42 }
 0x24a   : > { %2285 = vst [vmem:[#allocation5 + $0xb8] sm:$0x3] %v2269_v22  ;;  %v2702_v22 = vadd.f32 %v7461_v16, %v7407_v34 }
 0x24d   : > { %v6022_v26 = vld [vmem:[#allocation5 + $0xb0] sm:$0x30]  ;;  %v2799_v14 = vpop.f32.mrf.mxu0 }
 0x24e   : > { %v5345_v27 = vor.u32 %v6022_v26, %v5344_v25  ;;  %v5352_v24 = vld [vmem:[#allocation5 + $0xb0] sm:$0xf] }
 0x24f   : > { %v6023_v28 = vld [vmem:[#allocation5 + $0xb8] sm:$0x30]  ;;  %v7419_v43 = vpop.f32.mrf.mxu3  ;;  %v6078_v26 = vld [vmem:[%s7876_s5 + $0x50] sm:$0xff] }
 0x250   : > { %2733 = vmatmul.bf16.gmra.mxu3 %v5345_v27  ;;  %v5353_v30 = vor.u32 %v6023_v28, %v5352_v24  ;;  %v6021_v9 = vld [vmem:[#allocation5 + $0xac] sm:$0xf]  ;;  %3591 = vmatpush.bf16.msrb.mxu2 %v6078_v26  ;;  %v2705_v28 = vadd.f32 %v7461_v16, %v7415_v37  ;;  %v2710_v50 = vadd.f32 %v7461_v16, %v7419_v43  ;;  %v6088_v26 = vld [vmem:[%s7876_s5 + $0xa0] sm:$0xff] }
 0x251   : > { %v5346_v10 = vld [vmem:[#allocation5 + $0xb4] sm:$0x30]  ;;  %v6069_v43 = vld [vmem:[%s7876_s5 + $0x8] sm:$0xff] }
 0x252   : > { %v5349_v11 = vor.u32 %v6021_v9, %v5346_v10  ;;  %3563 = vmatpush.bf16.msrb.mxu1 %v6069_v43  ;;  %v6090_v10 = vld [vmem:[%s7876_s5 + $0xb0] sm:$0xff]  ;;  %v6084_v43 = vld [vmem:[%s7876_s5 + $0x80] sm:$0xff] }
 0x253   : > { %3616 = vmatpush.bf16.msra.mxu3 %v6090_v10 }
 0x254   : > { %3592 = vmatpush.bf16.msrb.mxu2 %v6077_v5 }
 0x255   : > { %v2802_v18 = vpop.f32.mrf.mxu0 }
 0x257   : > { %2831 = vmatmul.bf16.gmra.mxu0 %v5353_v30  ;;  %v7427_v49 = vpop.f32.mrf.mxu3 }
 0x258   : > { %v2712_v61 = vadd.f32 %v7461_v16, %v7427_v49 }
 0x25d   : > { %v2804_v27 = vpop.f32.mrf.mxu0 }
 0x25f   : > { %v7429_v41 = vpop.f32.mrf.mxu3 }
 0x260   : > { %2747 = vmatmul.bf16.vlgmr.msrb.gmra.mxu3 %v5265_v33 }
 0x265   : > { %v2807_v33 = vpop.f32.mrf.mxu0 }
 0x267   : > { %v7431_v53 = vpop.f32.mrf.mxu3 }
 0x26d   : > { %v2809_v48 = vpop.f32.mrf.mxu0 }
 0x270   : > { %2752 = vmatmul.bf16.gmra.mxu3 %v5277_v40 }
 0x271   : > { %v7433_v55 = vpop.f32.mrf.mxu3 }
 0x275   : > { %v2812_v59 = vpop.f32.mrf.mxu0 }
 0x279   : > { %v7441_v60 = vpop.f32.mrf.mxu3 }
 0x280   : > { %2757 = vmatmul.bf16.gmra.mxu3 %v5289_v47 }
 0x290   : > { %2762 = vmatmul.bf16.gmra.mxu3 %v5301_v52 }
 0x291   : > { %v7443_v0 = vpop.f32.mrf.mxu3 }
 0x299   : > { %v7445_v1 = vpop.f32.mrf.mxu3 }
 0x2a0   : > { %2767 = vmatmul.bf16.gmra.mxu3 %v5313_v57 }
 0x2b0   : > { %2772 = vmatmul.bf16.gmra.mxu3 %v5325_v63 }
 0x2b1   : > { %v7450_v6 = vpop.f32.mrf.mxu3 }
 0x2b9   : > { %v7455_v8 = vpop.f32.mrf.mxu3 }
 0x2c0   : > { %2777 = vmatmul.bf16.gmra.mxu3 %v5337_v4 }
 0x2d0   : > { %2782 = vmatmul.bf16.gmra.mxu3 %v5349_v11 }
 0x2d3   : > { %v7457_v13 = vpop.f32.mrf.mxu3 }
 0x2db   : > { %v7459_v15 = vpop.f32.mrf.mxu3 }
 0x2e3   : > { %v2748_v19 = vpop.f32.mrf.mxu3 }
 0x2e4   : > { %v2749_v20 = vadd.f32 %v2748_v19, %v2700_v17  ;;  %v2715_v17 = vadd.f32 %v7461_v16, %v7429_v41  ;;  %v2814_v19 = vpop.f32.mrf.mxu0 }
 0x2e6   : > { %v2798_v21 = vadd.f32 %v2797_v12, %v2749_v20  ;;  %v6068_v12 = vld [vmem:[%s7876_s5] sm:$0xff] }
 0x2e7   : > { %3564 = vmatpush.bf16.msrb.mxu1 %v6068_v12 }
 0x2e8   : > { %2837 = vst [vmem:[#allocation6] sm:$0xff] %v2798_v21 }
 0x2eb   : > { %v2750_v23 = vpop.f32.mrf.mxu3 }
 0x2ec   : > { %v2751_v25 = vadd.f32 %v2750_v23, %v2702_v22 }
 0x2ee   : > { %v2800_v24 = vadd.f32 %v2799_v14, %v2751_v25 }
 0x2f0   : > { %2838 = vst [vmem:[#allocation6 + $0x8] sm:$0xff] %v2800_v24 }
 0x2f3   : > { %v2753_v29 = vpop.f32.mrf.mxu3 }
 0x2f4   : > { %v2754_v30 = vadd.f32 %v2753_v29, %v2705_v28  ;;  %v2817_v29 = vpop.f32.mrf.mxu0 }
 0x2f6   : > { %v2803_v32 = vadd.f32 %v2802_v18, %v2754_v30 }
 0x2f7   : > { %v2869_v34 = vld [vmem:[#allocation6 + $0x1] sm:$0xff] }
 0x2f8   : > { %v2885_v35 = vmax.f32 %v2798_v21, %v2869_v34  ;;  %2839 = vst [vmem:[#allocation6 + $0x10] sm:$0xff] %v2803_v32  ;;  %v2901_v36 = vld [vmem:[#allocation6 + $0x2] sm:$0xff] }
 0x2f9   : > { %v6089_v21 = vld [vmem:[%s7876_s5 + $0xa8] sm:$0xff] }
 0x2fa   : > { %v2917_v39 = vmax.f32 %v2885_v35, %v2901_v36  ;;  %3617 = vmatpush.bf16.msra.mxu3 %v6089_v21 }
 0x2fb   : > { %v2755_v40 = vpop.f32.mrf.mxu3 }
 0x2fc   : > { %2933 = vst [vmem:[#allocation6] sm:$0xff] %v2917_v39  ;;  %v2756_v37 = vadd.f32 %v2755_v40, %v2707_v38  ;;  %v2720_v40 = vadd.f32 %v7461_v16, %v7433_v55 }
 0x2fe   : > { %v2805_v45 = vadd.f32 %v2804_v27, %v2756_v37  ;;  %3618 = vmatpush.bf16.msra.mxu3 %v6088_v26 }
 0x2ff   : > { %v2870_v46 = vld [vmem:[#allocation6 + $0x9] sm:$0xff] }
 0x300   : > { %v2886_v47 = vmax.f32 %v2800_v24, %v2870_v46  ;;  %2840 = vst [vmem:[#allocation6 + $0x18] sm:$0xff] %v2805_v45  ;;  %v2902_v44 = vld [vmem:[#allocation6 + $0xa] sm:$0xff]  ;;  %v2717_v24 = vadd.f32 %v7461_v16, %v7431_v53 }
 0x301   : > { %v6086_v53 = vld [vmem:[%s7876_s5 + $0x90] sm:$0xff]  ;;  %v6085_v46 = vld [vmem:[%s7876_s5 + $0x88] sm:$0xff] }
 0x302   : > { %v2918_v51 = vmax.f32 %v2886_v47, %v2902_v44 }
 0x303   : > { %v2758_v52 = vpop.f32.mrf.mxu3 }
 0x304   : > { %2934 = vst [vmem:[#allocation6 + $0x8] sm:$0xff] %v2918_v51  ;;  %v2759_v54 = vadd.f32 %v2758_v52, %v2710_v50  ;;  %v2819_v51 = vpop.f32.mrf.mxu0 }
 0x306   : > { %v2808_v56 = vadd.f32 %v2807_v33, %v2759_v54 }
 0x307   : > { %v2871_v57 = vld [vmem:[#allocation6 + $0x11] sm:$0xff] }
 0x308   : > { %v2887_v42 = vmax.f32 %v2803_v32, %v2871_v57  ;;  %2841 = vst [vmem:[#allocation6 + $0x20] sm:$0xff] %v2808_v56  ;;  %v2903_v58 = vld [vmem:[#allocation6 + $0x12] sm:$0xff] }
 0x309   : > { %v6087_v32 = vld [vmem:[%s7876_s5 + $0x98] sm:$0xff] }
 0x30a   : > { %v2919_v62 = vmax.f32 %v2887_v42, %v2903_v58  ;;  %3619 = vmatpush.bf16.msra.mxu3 %v6087_v32 }
 0x30b   : > { %v2760_v63 = vpop.f32.mrf.mxu3  ;;  %v2949_v3 = vld [vmem:[#allocation6] ss:$2 sm:$0xff] }
 0x30c   : > { %2935 = vst [vmem:[#allocation6 + $0x10] sm:$0xff] %v2919_v62  ;;  %v2761_v4 = vadd.f32 %v2760_v63, %v2712_v61  ;;  %v2980_v7 = vpack.c.bf16 %v2949_v3, %v2949_v3  ;;  %v6076_v62 = vld [vmem:[%s7876_s5 + $0x40] sm:$0xff] }
 0x30d   : > { %2964 = vst [vmem:[#allocation7] sm:$0xff] %v2949_v3  ;;  %3593 = vmatpush.bf16.msrb.mxu2 %v6076_v62 }
 0x30e   : > { %v2810_v49 = vadd.f32 %v2809_v48, %v2761_v4  ;;  %2988 = vst [vmem:[#allocation8] sm:$0xf] %v2980_v7  ;;  %3620 = vmatpush.bf16.msra.mxu3 %v6086_v53  ;;  %v2722_v4 = vadd.f32 %v7461_v16, %v7441_v60  ;;  %v2725_v60 = vadd.f32 %v7461_v16, %v7443_v0 }
 0x30f   : > { %v2872_v9 = vld [vmem:[#allocation6 + $0x19] sm:$0xff]  ;;  %v2727_v0 = vadd.f32 %v7461_v16, %v7445_v1 }
 0x310   : > { %v2888_v11 = vmax.f32 %v2805_v45, %v2872_v9  ;;  %2842 = vst [vmem:[#allocation6 + $0x28] sm:$0xff] %v2810_v49  ;;  %v2904_v14 = vld [vmem:[#allocation6 + $0x1a] sm:$0xff] }
 0x312   : > { %v2920_v18 = vmax.f32 %v2888_v11, %v2904_v14  ;;  %3621 = vmatpush.bf16.msra.mxu3 %v6085_v46  ;;  %v2822_v11 = vpop.f32.mrf.mxu0 }
 0x313   : > { %v2763_v20 = vpop.f32.mrf.mxu3 }
 0x314   : > { %2936 = vst [vmem:[#allocation6 + $0x18] sm:$0xff] %v2920_v18  ;;  %v2764_v22 = vadd.f32 %v2763_v20, %v2715_v17 }
 0x315   : > { %v5452_v52 = vld [vmem:[#allocation8] sm:$0xf] }
 0x316   : > { %v2813_v23 = vadd.f32 %v2812_v59, %v2764_v22  ;;  %3622 = vmatpush.bf16.msra.mxu3 %v6084_v43 }
 0x317   : > { %v2873_v25 = vld [vmem:[#allocation6 + $0x21] sm:$0xff] }
 0x318   : > { %v2889_v27 = vmax.f32 %v2808_v56, %v2873_v25  ;;  %2843 = vst [vmem:[#allocation6 + $0x30] sm:$0xff] %v2813_v23  ;;  %v2905_v41 = vld [vmem:[#allocation6 + $0x22] sm:$0xff] }
 0x31a   : > { %v2921_v28 = vmax.f32 %v2889_v27, %v2905_v41 }
 0x31b   : > { %v2765_v30 = vpop.f32.mrf.mxu3  ;;  %v2951_v31 = vld [vmem:[#allocation6 + $0x10] ss:$2 sm:$0xff] }
 0x31c   : > { %2937 = vst [vmem:[#allocation6 + $0x20] sm:$0xff] %v2921_v28  ;;  %v2766_v33 = vadd.f32 %v2765_v30, %v2717_v24  ;;  %v2981_v34 = vpack.c.bf16 %v2951_v31, %v2951_v31 }
 0x31d   : > { %2965 = vst [vmem:[#allocation7 + $0x8] sm:$0xff] %v2951_v31 }
 0x31e   : > { %v2815_v35 = vadd.f32 %v2814_v19, %v2766_v33  ;;  %2989 = vst [vmem:[#allocation8 + $0x14] sm:$0xf] %v2981_v34 }
 0x31f   : > { %v2874_v36 = vld [vmem:[#allocation6 + $0x29] sm:$0xff] }
 0x320   : > { %v2890_v38 = vmax.f32 %v2810_v49, %v2874_v36  ;;  %2844 = vst [vmem:[#allocation6 + $0x38] sm:$0xff] %v2815_v35  ;;  %v2906_v39 = vld [vmem:[#allocation6 + $0x2a] sm:$0xff] }
 0x322   : > { %v2922_v37 = vmax.f32 %v2890_v38, %v2906_v39 }
 0x323   : > { %v2768_v45 = vpop.f32.mrf.mxu3 }
 0x324   : > { %2938 = vst [vmem:[#allocation6 + $0x28] sm:$0xff] %v2922_v37  ;;  %v2769_v47 = vadd.f32 %v2768_v45, %v2720_v40  ;;  %v3001_v48 = vld [vmem:[#allocation7 + $0x1] sm:$0xff] }
 0x325   : > { %v3027_v44 = vld [vmem:[#allocation7 + $0x2] sm:$0xff]  ;;  %v6050_v54 = vld [vmem:[#allocation8 + $0x10] sm:$0xf0]  ;;  %v3009_v56 = vpack.c.bf16 %v3001_v48, %v3001_v48 }
 0x326   : > { %v3053_v50 = vld [vmem:[#allocation7 + $0x3] sm:$0xff]  ;;  %v3035_v57 = vpack.c.bf16 %v3027_v44, %v3027_v44  ;;  %v2818_v59 = vadd.f32 %v2817_v29, %v2769_v47  ;;  %v5453_v55 = vor.u32 %v6050_v54, %v5452_v52  ;;  %v2824_v29 = vpop.f32.mrf.mxu0  ;;  %v2730_v52 = vadd.f32 %v7461_v16, %v7450_v6 }
 0x327   : > { %v3079_v42 = vld [vmem:[#allocation7 + $0x4] sm:$0xff]  ;;  %v3061_v58 = vpack.c.bf16 %v3053_v50, %v3053_v50  ;;  %v2875_v61 = vld [vmem:[#allocation6 + $0x31] sm:$0xff]  ;;  %3017 = vst [vmem:[#allocation8 + $0x4] sm:$0xf] %v3009_v56 }
 0x328   : > { %v3087_v63 = vpack.c.bf16 %v3079_v42, %v3079_v42  ;;  %v2891_v2 = vmax.f32 %v2813_v23, %v2875_v61  ;;  %2845 = vst [vmem:[#allocation6 + $0x40] sm:$0xff] %v2818_v59  ;;  %3565 = vmatmul.bf16.vlgmr.msrb.gmra.mxu1 %v5453_v55  ;;  %v2907_v3 = vld [vmem:[#allocation6 + $0x32] sm:$0xff] }
 0x329   : > { %3043 = vst [vmem:[#allocation8 + $0x8] sm:$0xf] %v3035_v57 }
 0x32a   : > { %v2923_v5 = vmax.f32 %v2891_v2, %v2907_v3  ;;  %3069 = vst [vmem:[#allocation8 + $0xc] sm:$0xf] %v3061_v58 }
 0x32b   : > { %v2770_v7 = vpop.f32.mrf.mxu3  ;;  %v2953_v49 = vld [vmem:[#allocation6 + $0x20] ss:$2 sm:$0xff]  ;;  %3095 = vst [vmem:[#allocation8 + $0x10] sm:$0xf] %v3087_v63 }
 0x32c   : > { %2939 = vst [vmem:[#allocation6 + $0x30] sm:$0xff] %v2923_v5  ;;  %v2771_v9 = vadd.f32 %v2770_v7, %v2722_v4  ;;  %v2982_v10 = vpack.c.bf16 %v2953_v49, %v2953_v49 }
 0x32d   : > { %2966 = vst [vmem:[#allocation7 + $0x10] sm:$0xff] %v2953_v49 }
 0x32e   : > { %v2820_v12 = vadd.f32 %v2819_v51, %v2771_v9  ;;  %2990 = vst [vmem:[#allocation8 + $0x28] sm:$0xf] %v2982_v10  ;;  %v6048_v40 = vld [vmem:[#allocation8 + $0x4] sm:$0xf]  ;;  %v2827_v45 = vpop.f32.mrf.mxu0  ;;  %v2732_v10 = vadd.f32 %v7461_v16, %v7455_v8  ;;  %v2735_v8 = vadd.f32 %v7461_v16, %v7457_v13 }
 0x32f   : > { %v2876_v14 = vld [vmem:[#allocation6 + $0x39] sm:$0xff] }
 0x330   : > { %v2892_v17 = vmax.f32 %v2815_v35, %v2876_v14  ;;  %2846 = vst [vmem:[#allocation6 + $0x48] sm:$0xff] %v2820_v12  ;;  %v2908_v18 = vld [vmem:[#allocation6 + $0x3a] sm:$0xff]  ;;  %v5460_v44 = vld [vmem:[#allocation8 + $0x8] sm:$0xf] }
 0x332   : > { %v2924_v19 = vmax.f32 %v2892_v17, %v2908_v18 }
 0x333   : > { %v2773_v20 = vpop.f32.mrf.mxu3 }
 0x334   : > { %2940 = vst [vmem:[#allocation6 + $0x38] sm:$0xff] %v2924_v19  ;;  %v2774_v21 = vadd.f32 %v2773_v20, %v2725_v60  ;;  %v3002_v22 = vld [vmem:[#allocation7 + $0x9] sm:$0xff] }
 0x335   : > { %v3028_v23 = vld [vmem:[#allocation7 + $0xa] sm:$0xff]  ;;  %v3010_v26 = vpack.c.bf16 %v3002_v22, %v3002_v22 }
 0x336   : > { %v3054_v25 = vld [vmem:[#allocation7 + $0xb] sm:$0xff]  ;;  %v3036_v27 = vpack.c.bf16 %v3028_v23, %v3028_v23  ;;  %v2823_v24 = vadd.f32 %v2822_v11, %v2774_v21  ;;  %v2829_v49 = vpop.f32.mrf.mxu0 }
 0x337   : > { %v3080_v41 = vld [vmem:[#allocation7 + $0xc] sm:$0xff]  ;;  %v3062_v28 = vpack.c.bf16 %v3054_v25, %v3054_v25  ;;  %v2877_v30 = vld [vmem:[#allocation6 + $0x41] sm:$0xff]  ;;  %3018 = vst [vmem:[#allocation8 + $0x18] sm:$0xf] %v3010_v26 }
 0x338   : > { %v3088_v31 = vpack.c.bf16 %v3080_v41, %v3080_v41  ;;  %v2893_v32 = vmax.f32 %v2818_v59, %v2877_v30  ;;  %2847 = vst [vmem:[#allocation6 + $0x50] sm:$0xff] %v2823_v24  ;;  %v2909_v33 = vld [vmem:[#allocation6 + $0x42] sm:$0xff]  ;;  %v6107_v30 = vld [vmem:[%s7876_s5 + $0x138] sm:$0xff] }
 0x339   : > { %3044 = vst [vmem:[#allocation8 + $0x1c] sm:$0xf] %v3036_v27  ;;  %v5472_v58 = vld [vmem:[#allocation8 + $0x28] sm:$0xf]  ;;  %3673 = vmatpush.bf16.msra.mxu2 %v6107_v30 }
 0x33a   : > { %v2925_v34 = vmax.f32 %v2893_v32, %v2909_v33  ;;  %3070 = vst [vmem:[#allocation8 + $0x20] sm:$0xf] %v3062_v28 }
 0x33b   : > { %v2775_v35 = vpop.f32.mrf.mxu3  ;;  %v2955_v36 = vld [vmem:[#allocation6 + $0x30] ss:$2 sm:$0xff]  ;;  %3096 = vst [vmem:[#allocation8 + $0x24] sm:$0xf] %v3088_v31 }
 0x33c   : > { %2941 = vst [vmem:[#allocation6 + $0x40] sm:$0xff] %v2925_v34  ;;  %v2776_v53 = vadd.f32 %v2775_v35, %v2727_v0  ;;  %v2983_v38 = vpack.c.bf16 %v2955_v36, %v2955_v36  ;;  %v6099_v31 = vld [vmem:[%s7876_s5 + $0xf8] sm:$0xff]  ;;  %v6106_v0 = vld [vmem:[%s7876_s5 + $0x130] sm:$0xff] }
 0x33d   : > { %2967 = vst [vmem:[#allocation7 + $0x18] sm:$0xff] %v2955_v36  ;;  %3644 = vmatpush.bf16.msra.mxu1 %v6099_v31  ;;  %v6098_v34 = vld [vmem:[%s7876_s5 + $0xf0] sm:$0xff]  ;;  %3674 = vmatpush.bf16.msra.mxu2 %v6106_v0 }
 0x33e   : > { %v2825_v39 = vadd.f32 %v2824_v29, %v2776_v53  ;;  %v5454_v37 = vld [vmem:[#allocation8 + $0x14] sm:$0xf0]  ;;  %2991 = vst [vmem:[#allocation8 + $0x3c] sm:$0xf] %v2983_v38  ;;  %v2832_v23 = vpop.f32.mrf.mxu0 }
 0x33f   : > { %v2878_v46 = vld [vmem:[#allocation6 + $0x49] sm:$0xff]  ;;  %v5457_v47 = vor.u32 %v6048_v40, %v5454_v37 }
 0x340   : > { %v2894_v48 = vmax.f32 %v2820_v12, %v2878_v46  ;;  %2848 = vst [vmem:[#allocation6 + $0x58] sm:$0xff] %v2825_v39  ;;  %v6051_v1 = vld [vmem:[#allocation8 + $0x18] sm:$0xf0]  ;;  %v2910_v50 = vld [vmem:[#allocation6 + $0x4a] sm:$0xff] }
 0x341   : > { %3594 = vmatmul.bf16.vlgmr.msrb.gmra.mxu2 %v5457_v47  ;;  %v5461_v51 = vor.u32 %v6051_v1, %v5460_v44  ;;  %3645 = vmatpush.bf16.msra.mxu1 %v6098_v34  ;;  %v6105_v46 = vld [vmem:[%s7876_s5 + $0x128] sm:$0xff] }
 0x342   : > { %v2926_v54 = vmax.f32 %v2894_v48, %v2910_v50  ;;  %v6097_v47 = vld [vmem:[%s7876_s5 + $0xe8] sm:$0xff]  ;;  %3675 = vmatpush.bf16.msra.mxu2 %v6105_v46 }
 0x343   : > { %3623 = vmatmul.bf16.vlgmr.msra.gmra.mxu3 %v5461_v51  ;;  %v2778_v56 = vpop.f32.mrf.mxu3 }
 0x344   : > { %2942 = vst [vmem:[#allocation6 + $0x48] sm:$0xff] %v2926_v54  ;;  %v2779_v57 = vadd.f32 %v2778_v56, %v2730_v52  ;;  %v3003_v42 = vld [vmem:[#allocation7 + $0x11] sm:$0xff]  ;;  %v6104_v56 = vld [vmem:[%s7876_s5 + $0x120] sm:$0xff] }
 0x345   : > { %v3029_v59 = vld [vmem:[#allocation7 + $0x12] sm:$0xff]  ;;  %v6055_v61 = vld [vmem:[#allocation8 + $0x38] sm:$0xf0]  ;;  %v3011_v62 = vpack.c.bf16 %v3003_v42, %v3003_v42  ;;  %3646 = vmatpush.bf16.msra.mxu1 %v6097_v47 }
 0x346   : > { %v3055_v55 = vld [vmem:[#allocation7 + $0x13] sm:$0xff]  ;;  %v3037_v63 = vpack.c.bf16 %v3029_v59, %v3029_v59  ;;  %v2828_v43 = vadd.f32 %v2827_v45, %v2779_v57  ;;  %v5473_v3 = vor.u32 %v6055_v61, %v5472_v58  ;;  %v2834_v1 = vpop.f32.mrf.mxu0  ;;  %v6096_v59 = vld [vmem:[%s7876_s5 + $0xe0] sm:$0xff]  ;;  %3676 = vmatpush.bf16.msra.mxu2 %v6104_v56 }
 0x347   : > { %v3081_v2 = vld [vmem:[#allocation7 + $0x14] sm:$0xff]  ;;  %v3063_v4 = vpack.c.bf16 %v3055_v55, %v3055_v55  ;;  %3019 = vst [vmem:[#allocation8 + $0x2c] sm:$0xf] %v3011_v62 }
 0x348   : > { %v2879_v5 = vld [vmem:[#allocation6 + $0x51] sm:$0xff]  ;;  %v3089_v7 = vpack.c.bf16 %v3081_v2, %v3081_v2  ;;  %2849 = vst [vmem:[#allocation6 + $0x60] sm:$0xff] %v2828_v43  ;;  %3570 = vmatmul.bf16.gmra.mxu1 %v5473_v3 }
 0x349   : > { %v2895_v6 = vmax.f32 %v2823_v24, %v2879_v5  ;;  %v2911_v9 = vld [vmem:[#allocation6 + $0x52] sm:$0xff]  ;;  %3045 = vst [vmem:[#allocation8 + $0x30] sm:$0xf] %v3037_v63  ;;  %3647 = vmatpush.bf16.msra.mxu1 %v6096_v59 }
 0x34a   : > { %3071 = vst [vmem:[#allocation8 + $0x34] sm:$0xf] %v3063_v4  ;;  %v6103_v62 = vld [vmem:[%s7876_s5 + $0x118] sm:$0xff] }
 0x34b   : > { %v2927_v11 = vmax.f32 %v2895_v6, %v2911_v9  ;;  %v2780_v12 = vpop.f32.mrf.mxu3  ;;  %v2957_v14 = vld [vmem:[#allocation6 + $0x40] ss:$2 sm:$0xff]  ;;  %3097 = vst [vmem:[#allocation8 + $0x38] sm:$0xf] %v3089_v7  ;;  %v6095_v7 = vld [vmem:[%s7876_s5 + $0xd8] sm:$0xff]  ;;  %v6102_v9 = vld [vmem:[%s7876_s5 + $0x110] sm:$0xff]  ;;  %3677 = vmatpush.bf16.msra.mxu2 %v6103_v62 }
 0x34c   : > { %v2781_v17 = vadd.f32 %v2780_v12, %v2732_v10  ;;  %v2984_v18 = vpack.c.bf16 %v2957_v14, %v2957_v14  ;;  %2968 = vst [vmem:[#allocation7 + $0x20] sm:$0xff] %v2957_v14 }
 0x34d   : > { %2943 = vst [vmem:[#allocation6 + $0x50] sm:$0xff] %v2927_v11  ;;  %3648 = vmatpush.bf16.msra.mxu1 %v6095_v7 }
 0x34e   : > { %v7533_v60 = vadd.f32 %v2829_v49, %v2781_v17  ;;  %2992 = vst [vmem:[#allocation8 + $0x50] sm:$0xf] %v2984_v18 }
 0x34f   : > { %v2880_v19 = vld [vmem:[#allocation6 + $0x59] sm:$0xff]  ;;  %3678 = vmatpush.bf16.msra.mxu2 %v6102_v9 }
 0x350   : > { %v2896_v20 = vmax.f32 %v2825_v39, %v2880_v19  ;;  %2850 = vst [vmem:[#allocation6 + $0x68] sm:$0xff] %v7533_v60  ;;  %v2912_v21 = vld [vmem:[#allocation6 + $0x5a] sm:$0xff]  ;;  %v2737_v39 = vadd.f32 %v7461_v16, %v7459_v15  ;;  %v6053_v16 = vld [vmem:[#allocation8 + $0x2c] sm:$0xf]  ;;  %v5480_v54 = vld [vmem:[#allocation8 + $0x30] sm:$0xf] }
 0x352   : > { %v2928_v22 = vmax.f32 %v2896_v20, %v2912_v21 }
 0x353   : > { %v2783_v25 = vpop.f32.mrf.mxu3  ;;  %v3004_v27 = vld [vmem:[#allocation7 + $0x19] sm:$0xff] }
 0x354   : > { %2944 = vst [vmem:[#allocation6 + $0x58] sm:$0xff] %v2928_v22  ;;  %v2784_v26 = vadd.f32 %v2783_v25, %v2735_v8  ;;  %v3030_v41 = vld [vmem:[#allocation7 + $0x1a] sm:$0xff]  ;;  %v3012_v28 = vpack.c.bf16 %v3004_v27, %v3004_v27  ;;  %v6101_v27 = vld [vmem:[%s7876_s5 + $0x108] sm:$0xff] }
 0x355   : > { %v3056_v24 = vld [vmem:[#allocation7 + $0x1b] sm:$0xff]  ;;  %v3038_v29 = vpack.c.bf16 %v3030_v41, %v3030_v41  ;;  %v5492_v63 = vld [vmem:[#allocation8 + $0x50] sm:$0xf]  ;;  %v6093_v41 = vld [vmem:[%s7876_s5 + $0xc8] sm:$0xff]  ;;  %3679 = vmatpush.bf16.msra.mxu2 %v6101_v27 }
 0x356   : > { %v7544_v32 = vadd.f32 %v2832_v23, %v2784_v26  ;;  %v3064_v13 = vpack.c.bf16 %v3056_v24, %v3056_v24  ;;  %3020 = vst [vmem:[#allocation8 + $0x40] sm:$0xf] %v3012_v28  ;;  %v3082_v36 = vld [vmem:[#allocation7 + $0x1c] sm:$0xff]  ;;  %v6094_v23 = vld [vmem:[%s7876_s5 + $0xd0] sm:$0xff] }
 0x357   : > { %v2881_v33 = vld [vmem:[#allocation6 + $0x61] sm:$0xff]  ;;  %3046 = vst [vmem:[#allocation8 + $0x44] sm:$0xf] %v3038_v29  ;;  %v3090_v38 = vpack.c.bf16 %v3082_v36, %v3082_v36  ;;  %3649 = vmatpush.bf16.msra.mxu1 %v6094_v23  ;;  %v2998_v36 = vld [vmem:[#allocation8 + $0x8c] sm:$0x1] }
 0x358   : > { %v2897_v35 = vmax.f32 %v2828_v43, %v2881_v33  ;;  %2851 = vst [vmem:[#allocation6 + $0x70] sm:$0xff] %v7544_v32  ;;  %v2913_v53 = vld [vmem:[#allocation6 + $0x62] sm:$0xff]  ;;  %v5468_v23 = vld [vmem:[#allocation8 + $0x10] sm:$0xf]  ;;  %v6054_v27 = vld [vmem:[#allocation8 + $0x34] sm:$0xf] }
 0x359   : > { %3072 = vst [vmem:[#allocation8 + $0x48] sm:$0xf] %v3064_v13  ;;  %v6092_v28 = vld [vmem:[%s7876_s5 + $0xc0] sm:$0xff] }
 0x35a   : > { %v2929_v40 = vmax.f32 %v2897_v35, %v2913_v53  ;;  %3098 = vst [vmem:[#allocation8 + $0x4c] sm:$0xf] %v3090_v38  ;;  %v6100_v29 = vld [vmem:[%s7876_s5 + $0x100] sm:$0xff]  ;;  %v3024_v38 = vld [vmem:[#allocation8 + $0x90] sm:$0x1] }
 0x35b   : > { %v2785_v37 = vpop.f32.mrf.mxu3  ;;  %v2959_v45 = vld [vmem:[#allocation6 + $0x50] ss:$2 sm:$0xff]  ;;  %3650 = vmatpush.bf16.msra.mxu1 %v6093_v41  ;;  %3680 = vmatpush.bf16.msra.mxu2 %v6100_v29 }
 0x35c   : > { %2945 = vst [vmem:[#allocation6 + $0x60] sm:$0xff] %v2929_v40  ;;  %v2786_v48 = vadd.f32 %v2785_v37, %v2737_v39  ;;  %v2985_v44 = vpack.c.bf16 %v2959_v45, %v2959_v45  ;;  %v3050_v39 = vld [vmem:[#allocation8 + $0x94] sm:$0x1] }
 0x35d   : > { %2969 = vst [vmem:[#allocation7 + $0x28] sm:$0xff] %v2959_v45  ;;  %v5474_v50 = vld [vmem:[#allocation8 + $0x3c] sm:$0xf0] }
 0x35e   : > { %v2835_v15 = vadd.f32 %v2834_v1, %v2786_v48  ;;  %2993 = vst [vmem:[#allocation8 + $0x64] sm:$0xf] %v2985_v44  ;;  %v5477_v52 = vor.u32 %v6053_v16, %v5474_v50  ;;  %v6056_v42 = vld [vmem:[#allocation8 + $0x40] sm:$0xf0]  ;;  %v3076_v16 = vld [vmem:[#allocation8 + $0x98] sm:$0x1] }
 0x35f   : > { %v2882_v51 = vld [vmem:[#allocation6 + $0x69] sm:$0xff]  ;;  %v5481_v58 = vor.u32 %v6056_v42, %v5480_v54  ;;  %3651 = vmatpush.bf16.msra.mxu1 %v6092_v28  ;;  %v5488_v28 = vld [vmem:[#allocation8 + $0x38] sm:$0xf] }
 0x360   : > { %v2898_v57 = vmax.f32 %v7533_v60, %v2882_v51  ;;  %2852 = vst [vmem:[#allocation6 + $0x78] sm:$0xf] %v2835_v15  ;;  %v2914_v55 = vld [vmem:[#allocation6 + $0x6a] sm:$0xff]  ;;  %3599 = vmatmul.bf16.gmra.mxu2 %v5477_v52 }
 0x361   : > { %3628 = vmatmul.bf16.gmra.mxu3 %v5481_v58 }
 0x362   : > { %v2930_v61 = vmax.f32 %v2898_v57, %v2914_v55 }
 0x364   : > { %2946 = vst [vmem:[#allocation6 + $0x68] sm:$0xff] %v2930_v61  ;;  %v3005_v2 = vld [vmem:[#allocation7 + $0x21] sm:$0xff] }
 0x365   : > { %v3031_v43 = vld [vmem:[#allocation7 + $0x22] sm:$0xff]  ;;  %v3013_v4 = vpack.c.bf16 %v3005_v2, %v3005_v2 }
 0x366   : > { %v6060_v3 = vld [vmem:[#allocation8 + $0x60] sm:$0xf0]  ;;  %v3039_v5 = vpack.c.bf16 %v3031_v43, %v3031_v43 }
 0x367   : > { %v3057_v6 = vld [vmem:[#allocation7 + $0x23] sm:$0xff]  ;;  %v5493_v49 = vor.u32 %v6060_v3, %v5492_v63  ;;  %v2868_v12 = vld [vmem:[#allocation6 + $0x78] sm:$0x3]  ;;  %3021 = vst [vmem:[#allocation8 + $0x54] sm:$0xf] %v3013_v4 }
 0x368   : > { %v3065_v10 = vpack.c.bf16 %v3057_v6, %v3057_v6  ;;  %v3083_v11 = vld [vmem:[#allocation7 + $0x24] sm:$0xff]  ;;  %v2883_v14 = vld [vmem:[#allocation6 + $0x71] sm:$0xff]  ;;  %v2884_v17 = vld [vmem:[#allocation6 + $0x79] sm:$0x3]  ;;  %3047 = vst [vmem:[#allocation8 + $0x58] sm:$0xf] %v3039_v5 }
 0x369   : > { %v3091_v18 = vpack.c.bf16 %v3083_v11, %v3083_v11  ;;  %v2899_v60 = vmax.f32 %v7544_v32, %v2883_v14  ;;  %v2900_v19 = vmax.f32 %v2868_v12, %v2884_v17  ;;  %3575 = vmatmul.bf16.gmra.mxu1 %v5493_v49  ;;  %v2915_v20 = vld [vmem:[#allocation6 + $0x72] sm:$0xff]  ;;  %v2916_v21 = vld [vmem:[#allocation6 + $0x7a] sm:$0x3]  ;;  %v3102_v5 = vld [vmem:[#allocation8 + $0x9c] sm:$0x1] }
 0x36a   : > { %3073 = vst [vmem:[#allocation8 + $0x5c] sm:$0xf] %v3065_v10 }
 0x36b   : > { %v2931_v8 = vmax.f32 %v2899_v60, %v2915_v20  ;;  %v2932_v22 = vmax.f32 %v2900_v19, %v2916_v21  ;;  %v2961_v25 = vld [vmem:[#allocation6 + $0x60] ss:$2 sm:$0xff]  ;;  %3099 = vst [vmem:[#allocation8 + $0x60] sm:$0xf] %v3091_v18 }
 0x36c   : > { %v2986_v26 = vpack.c.bf16 %v2961_v25, %v2961_v25  ;;  %2970 = vst [vmem:[#allocation7 + $0x30] sm:$0xff] %v2961_v25  ;;  %v5462_v20 = vld [vmem:[#allocation8 + $0x1c] sm:$0xf0]  ;;  %v6049_v21 = vld [vmem:[#allocation8 + $0xc] sm:$0xf] }
 0x36d   : > { %2947 = vst [vmem:[#allocation6 + $0x70] sm:$0xff] %v2931_v8  ;;  %v5465_v8 = vor.u32 %v6049_v21, %v5462_v20  ;;  %v6119_v21 = vld [vmem:[%s7878_s7 + $0x30] sm:$0xff] }
 0x36e   : > { %2948 = vst [vmem:[#allocation6 + $0x78] sm:$0x3] %v2932_v22  ;;  %v6058_v50 = vld [vmem:[#allocation8 + $0x54] sm:$0xf]  ;;  %v6052_v22 = vld [vmem:[#allocation8 + $0x20] sm:$0xf0] }
 0x36f   : > { %2994 = vst [vmem:[#allocation8 + $0x78] sm:$0xf] %v2986_v26  ;;  %v5500_v62 = vld [vmem:[#allocation8 + $0x58] sm:$0xf]  ;;  %v5469_v25 = vor.u32 %v6052_v22, %v5468_v23  ;;  %v5482_v26 = vld [vmem:[#allocation8 + $0x44] sm:$0xf0] }
 0x370   : > { %v5485_v41 = vor.u32 %v6054_v27, %v5482_v26 }
 0x373   : > { %v3006_v30 = vld [vmem:[#allocation7 + $0x29] sm:$0xff] }
 0x374   : > { %v3032_v31 = vld [vmem:[#allocation7 + $0x2a] sm:$0xff]  ;;  %v3014_v13 = vpack.c.bf16 %v3006_v30, %v3006_v30 }
 0x375   : > { %v2963_v24 = vld [vmem:[#allocation6 + $0x70] ss:$2 sm:$0x1f]  ;;  %v3040_v33 = vpack.c.bf16 %v3032_v31, %v3032_v31  ;;  %v6059_v31 = vld [vmem:[#allocation8 + $0x5c] sm:$0xf] }
 0x376   : > { %2971 = vst [vmem:[#allocation7 + $0x38] sm:$0x1f] %v2963_v24  ;;  %v3058_v32 = vld [vmem:[#allocation7 + $0x2b] sm:$0xff]  ;;  %v5512_v9 = vld [vmem:[#allocation8 + $0x78] sm:$0xf] }
 0x377   : > { %v3066_v0 = vpack.c.bf16 %v3058_v32, %v3058_v32  ;;  %v3084_v34 = vld [vmem:[#allocation7 + $0x2c] sm:$0xff]  ;;  %3022 = vst [vmem:[#allocation8 + $0x68] sm:$0xf] %v3014_v13 }
 0x378   : > { %v3092_v35 = vpack.c.bf16 %v3084_v34, %v3084_v34  ;;  %3048 = vst [vmem:[#allocation8 + $0x6c] sm:$0xf] %v3040_v33  ;;  %v6057_v24 = vld [vmem:[#allocation8 + $0x48] sm:$0xf0]  ;;  %v5508_v33 = vld [vmem:[#allocation8 + $0x60] sm:$0xf] }
 0x379   : > { %3074 = vst [vmem:[#allocation8 + $0x70] sm:$0xf] %v3066_v0  ;;  %v5489_v29 = vor.u32 %v6057_v24, %v5488_v28 }
 0x37a   : > { %3100 = vst [vmem:[#allocation8 + $0x74] sm:$0xf] %v3092_v35 }
 0x37d   : > { %v2979_v40 = vld [vmem:[#allocation7 + $0x38] sm:$0x1]  ;;  %v3008_v45 = vld [vmem:[#allocation7 + $0x39] sm:$0x1]  ;;  %v3034_v1 = vld [vmem:[#allocation7 + $0x3a] sm:$0x1] }
 0x37e   : > { %v3007_v37 = vld [vmem:[#allocation7 + $0x31] sm:$0xff]  ;;  %v2987_v46 = vpack.c.bf16 %v2979_v40, %v2979_v40  ;;  %v3016_v48 = vpack.c.bf16 %v3008_v45, %v3008_v45  ;;  %v3042_v52 = vpack.c.bf16 %v3034_v1, %v3034_v1  ;;  %v3060_v54 = vld [vmem:[#allocation7 + $0x3b] sm:$0x1]  ;;  %v3086_v56 = vld [vmem:[#allocation7 + $0x3c] sm:$0x1] }
 0x37f   : > { %v3015_v47 = vpack.c.bf16 %v3007_v37, %v3007_v37  ;;  %v3033_v44 = vld [vmem:[#allocation7 + $0x32] sm:$0xff]  ;;  %v5494_v57 = vld [vmem:[#allocation8 + $0x64] sm:$0xf0]  ;;  %v3068_v55 = vpack.c.bf16 %v3060_v54, %v3060_v54  ;;  %v6061_v63 = vld [vmem:[#allocation8 + $0x68] sm:$0xf0]  ;;  %v3094_v3 = vpack.c.bf16 %v3086_v56, %v3086_v56 }
 0x380   : > { %v3059_v15 = vld [vmem:[#allocation7 + $0x33] sm:$0xff]  ;;  %v3041_v51 = vpack.c.bf16 %v3033_v44, %v3033_v44  ;;  %v2999_v42 = vsel %vm7593_vm4, %v2987_v46, %v2998_v36  ;;  %v3025_v59 = vsel %vm7593_vm4, %v3016_v48, %v3024_v38  ;;  %v5497_v61 = vor.u32 %v6058_v50, %v5494_v57 }
 0x381   : > { %3023 = vst [vmem:[#allocation8 + $0x7c] sm:$0xf] %v3015_v47  ;;  %v3085_v58 = vld [vmem:[#allocation7 + $0x34] sm:$0xff]  ;;  %v3051_v2 = vsel %vm7593_vm4, %v3042_v52, %v3050_v39  ;;  %v3067_v43 = vpack.c.bf16 %v3059_v15, %v3059_v15  ;;  %v5501_v4 = vor.u32 %v6061_v63, %v5500_v62  ;;  %v3077_v7 = vsel %vm7593_vm4, %v3068_v55, %v3076_v16  ;;  %v5502_v30 = vld [vmem:[#allocation8 + $0x6c] sm:$0xf0] }
 0x382   : > { %3000 = vst [vmem:[#allocation8 + $0x8c] sm:$0x1] %v2999_v42  ;;  %3604 = vmatmul.bf16.gmra.mxu2 %v5497_v61  ;;  %v3093_v6 = vpack.c.bf16 %v3085_v58, %v3085_v58  ;;  %v3103_v49 = vsel %vm7593_vm4, %v3094_v3, %v3102_v5  ;;  %v5505_v32 = vor.u32 %v6059_v31, %v5502_v30  ;;  %v6062_v13 = vld [vmem:[#allocation8 + $0x70] sm:$0xf0]  ;;  %v6136_v50 = vld [vmem:[%s7878_s7 + $0xb8] sm:$0xff]  ;;  %v6118_v31 = vld [vmem:[%s7878_s7 + $0x28] sm:$0xff] }
 0x383   : > { %3026 = vst [vmem:[#allocation8 + $0x90] sm:$0x1] %v3025_v59  ;;  %3633 = vmatmul.bf16.gmra.mxu3 %v5501_v4  ;;  %v5509_v0 = vor.u32 %v6062_v13, %v5508_v33  ;;  %4262 = vmatpush.bf16.msra.mxu0 %v6136_v50  ;;  %v7620_v55 = vld [vmem:[#allocation22] ss:$0 sm:$0xff] }
 0x384   : > { %3049 = vst [vmem:[#allocation8 + $0x80] sm:$0xf] %v3041_v51 }
 0x385   : > { %3052 = vst [vmem:[#allocation8 + $0x94] sm:$0x1] %v3051_v2 }
 0x386   : > { %3075 = vst [vmem:[#allocation8 + $0x84] sm:$0xf] %v3067_v43  ;;  %v6135_v43 = vld [vmem:[%s7878_s7 + $0xb0] sm:$0xff] }
 0x387   : > { %3078 = vst [vmem:[#allocation8 + $0x98] sm:$0x1] %v3077_v7  ;;  %4263 = vmatpush.bf16.msra.mxu0 %v6135_v43 }
 0x388   : > { %3101 = vst [vmem:[#allocation8 + $0x88] sm:$0xf] %v3093_v6  ;;  %v6063_v12 = vld [vmem:[#allocation8 + $0x7c] sm:$0xf] }
 0x389   : > { %v6065_v10 = vld [vmem:[#allocation8 + $0x88] sm:$0x10]  ;;  %3104 = vst [vmem:[#allocation8 + $0x9c] sm:$0x1] %v3103_v49 }
 0x38a   : > { %v5513_v11 = vor.u32 %v6065_v10, %v5512_v9  ;;  %v5514_v14 = vld [vmem:[#allocation8 + $0x8c] sm:$0x10] }
 0x38b   : > { %v5520_v17 = vld [vmem:[#allocation8 + $0x80] sm:$0xf]  ;;  %v5517_v60 = vor.u32 %v6063_v12, %v5514_v14 }
 0x38c   : > { %3580 = vmatmul.bf16.gmra.mxu1 %v5513_v11  ;;  %v6066_v18 = vld [vmem:[#allocation8 + $0x90] sm:$0x10]  ;;  %v6120_v11 = vld [vmem:[%s7878_s7 + $0x38] sm:$0xff] }
 0x38d   : > { %v5521_v19 = vor.u32 %v6066_v18, %v5520_v17  ;;  %v6064_v34 = vld [vmem:[#allocation8 + $0x84] sm:$0xf]  ;;  %4226 = vmatpush.bf16.msrb.mxu3 %v6120_v11 }
 0x38e   : > { %v5522_v35 = vld [vmem:[#allocation8 + $0x94] sm:$0x10] }
 0x38f   : > { %v5525_v36 = vor.u32 %v6064_v34, %v5522_v35  ;;  %v5528_v53 = vld [vmem:[#allocation8 + $0x88] sm:$0xf] }
 0x390   : > { %v6067_v38 = vld [vmem:[#allocation8 + $0x98] sm:$0x10] }
 0x391   : > { %v5529_v39 = vor.u32 %v6067_v38, %v5528_v53  ;;  %4227 = vmatpush.bf16.msrb.mxu3 %v6119_v21 }
 0x392   : > { %3609 = vmatmul.bf16.gmra.mxu2 %v5517_v60 }
 0x393   : > { %3638 = vmatmul.bf16.gmra.mxu3 %v5521_v19 }
 0x395   : > { %4228 = vmatpush.bf16.msrb.mxu3 %v6118_v31 }
 0x39c   : > { %3652 = vmatmul.bf16.vlgmr.msra.gmra.mxu1 %v5465_v8  ;;  %v6134_v8 = vld [vmem:[%s7878_s7 + $0xa8] sm:$0xff] }
 0x39d   : > { %4264 = vmatpush.bf16.msra.mxu0 %v6134_v8  ;;  %v6151_v8 = vld [vmem:[%s7878_s7 + $0x130] sm:$0xff] }
 0x3a2   : > { %3681 = vmatmul.bf16.vlgmr.msra.gmra.mxu2 %v5469_v25 }
 0x3a5   : > { %v3566_v40 = vpop.f32.mrf.mxu1 }
 0x3a6   : > { %v3567_v58 = vadd.f32 %v7620_v55, %v3566_v40 }
 0x3ac   : > { %3657 = vmatmul.bf16.gmra.mxu1 %v5485_v41 }
 0x3ad   : > { %v3568_v37 = vpop.f32.mrf.mxu1 }
 0x3ae   : > { %v3569_v4 = vadd.f32 %v7620_v55, %v3568_v37 }
 0x3b2   : > { %3686 = vmatmul.bf16.gmra.mxu2 %v5489_v29 }
 0x3bc   : > { %3662 = vmatmul.bf16.gmra.mxu1 %v5505_v32 }
 0x3c2   : > { %3691 = vmatmul.bf16.gmra.mxu2 %v5509_v0 }
 0x3c4   : > { %v3595_v45 = vpop.f32.mrf.mxu2 }
 0x3c5   : > { %v3571_v46 = vpop.f32.mrf.mxu1  ;;  %v3596_v62 = vadd.f32 %v3595_v45, %v3567_v58 }
 0x3c6   : > { %v3624_v42 = vpop.f32.mrf.mxu3  ;;  %v3572_v14 = vadd.f32 %v7620_v55, %v3571_v46 }
 0x3c7   : > { %v3625_v3 = vadd.f32 %v3624_v42, %v3596_v62 }
 0x3cc   : > { %3667 = vmatmul.bf16.gmra.mxu1 %v5525_v36  ;;  %v3597_v47 = vpop.f32.mrf.mxu2 }
 0x3cd   : > { %v3573_v48 = vpop.f32.mrf.mxu1  ;;  %v3598_v6 = vadd.f32 %v3597_v47, %v3569_v4 }
 0x3ce   : > { %v3626_v2 = vpop.f32.mrf.mxu3  ;;  %v3574_v25 = vadd.f32 %v7620_v55, %v3573_v48  ;;  %v6117_v48 = vld [vmem:[%s7878_s7 + $0x20] sm:$0xff] }
 0x3cf   : > { %v3627_v12 = vadd.f32 %v3626_v2, %v3598_v6  ;;  %4229 = vmatpush.bf16.msrb.mxu3 %v6117_v48 }
 0x3d2   : > { %3696 = vmatmul.bf16.gmra.mxu2 %v5529_v39 }
 0x3e3   : > { %v3600_v44 = vpop.f32.mrf.mxu2 }
 0x3e4   : > { %v3629_v10 = vpop.f32.mrf.mxu3  ;;  %v3601_v60 = vadd.f32 %v3600_v44, %v3572_v14  ;;  %v6133_v44 = vld [vmem:[%s7878_s7 + $0xa0] sm:$0xff]  ;;  %v6144_v14 = vld [vmem:[%s7878_s7 + $0xf8] sm:$0xff] }
 0x3e5   : > { %4265 = vmatpush.bf16.msra.mxu0 %v6133_v44  ;;  %4280 = vmatpush.bf16.msrb.mxu1 %v6144_v14  ;;  %v6141_v44 = vld [vmem:[%s7878_s7 + $0xe0] sm:$0xff] }
 0x3e6   : > { %v3576_v1 = vpop.f32.mrf.mxu1  ;;  %v3630_v22 = vadd.f32 %v3629_v10, %v3601_v60 }
 0x3e7   : > { %v3577_v35 = vadd.f32 %v7620_v55, %v3576_v1 }
 0x3eb   : > { %v3602_v15 = vpop.f32.mrf.mxu2 }
 0x3ec   : > { %v3631_v23 = vpop.f32.mrf.mxu3  ;;  %v3603_v41 = vadd.f32 %v3602_v15, %v3574_v25 }
 0x3ee   : > { %v7607_v16 = vpop.f32.mrf.mxu1  ;;  %v3632_v32 = vadd.f32 %v3631_v23, %v3603_v41 }
 0x3ef   : > { %v3579_v42 = vadd.f32 %v7620_v55, %v7607_v16  ;;  %v6115_v16 = vld [vmem:[%s7878_s7 + $0x10] sm:$0xff] }
 0x405   : > { %v3605_v51 = vpop.f32.mrf.mxu2 }
 0x406   : > { %v3634_v13 = vpop.f32.mrf.mxu3  ;;  %v3606_v40 = vadd.f32 %v3605_v51, %v3577_v35  ;;  %v6130_v35 = vld [vmem:[%s7878_s7 + $0x88] sm:$0xff] }
 0x408   : > { %v3635_v15 = vadd.f32 %v3634_v13, %v3606_v40  ;;  %v6128_v13 = vld [vmem:[%s7878_s7 + $0x78] sm:$0xff]  ;;  %v6127_v40 = vld [vmem:[%s7878_s7 + $0x70] sm:$0xff] }
 0x409   : > { %v7612_v52 = vpop.f32.mrf.mxu1 }
 0x40d   : > { %v7614_v54 = vpop.f32.mrf.mxu2 }
 0x40e   : > { %v3608_v4 = vadd.f32 %v7614_v54, %v3579_v42  ;;  %v6152_v54 = vld [vmem:[%s7878_s7 + $0x138] sm:$0xff] }
 0x40f   : > { %4298 = vmatpush.bf16.msrb.mxu2 %v6152_v54 }
 0x411   : > { %v7616_v56 = vpop.f32.mrf.mxu1 }
 0x413   : > { %4299 = vmatpush.bf16.msrb.mxu2 %v6151_v8  ;;  %v6138_v8 = vld [vmem:[%s7878_s7 + $0xc8] sm:$0xff] }
 0x415   : > { %v7618_v57 = vpop.f32.mrf.mxu2 }
 0x419   : > { %v3653_v59 = vpop.f32.mrf.mxu1 }
 0x41a   : > { %v3654_v5 = vadd.f32 %v3653_v59, %v3625_v3  ;;  %v3636_v59 = vpop.f32.mrf.mxu3  ;;  %v6116_v3 = vld [vmem:[%s7878_s7 + $0x18] sm:$0xff] }
 0x41b   : > { %4230 = vmatpush.bf16.msrb.mxu3 %v6116_v3 }
 0x41d   : > { %v7623_v61 = vpop.f32.mrf.mxu2 }
 0x41f   : > { %4231 = vmatpush.bf16.msrb.mxu3 %v6115_v16 }
 0x421   : > { %v3655_v63 = vpop.f32.mrf.mxu1 }
 0x422   : > { %v3656_v17 = vadd.f32 %v3655_v63, %v3627_v12  ;;  %v6132_v12 = vld [vmem:[%s7878_s7 + $0x98] sm:$0xff] }
 0x423   : > { %4266 = vmatpush.bf16.msra.mxu0 %v6132_v12 }
 0x425   : > { %v3682_v7 = vpop.f32.mrf.mxu2 }
 0x426   : > { %v3683_v49 = vadd.f32 %v3682_v7, %v3654_v5 }
 0x428   : > { %3702 = vst [vmem:[#allocation9] sm:$0xff] %v3683_v49 }
 0x429   : > { %v3658_v9 = vpop.f32.mrf.mxu1 }
 0x42a   : > { %v3659_v26 = vadd.f32 %v3658_v9, %v3630_v22  ;;  %v3637_v9 = vadd.f32 %v3636_v59, %v3608_v4 }
 0x42d   : > { %v3684_v18 = vpop.f32.mrf.mxu2 }
 0x42e   : > { %v3685_v19 = vadd.f32 %v3684_v18, %v3656_v17  ;;  %v3582_v17 = vadd.f32 %v7620_v55, %v7612_v52  ;;  %v6143_v52 = vld [vmem:[%s7878_s7 + $0xf0] sm:$0xff] }
 0x42f   : > { %4281 = vmatpush.bf16.msrb.mxu1 %v6143_v52 }
 0x430   : > { %3703 = vst [vmem:[#allocation9 + $0x8] sm:$0xff] %v3685_v19  ;;  %v3611_v22 = vadd.f32 %v7618_v57, %v3582_v17  ;;  %v6113_v57 = vld [vmem:[%s7878_s7] sm:$0xff] }
 0x431   : > { %v3660_v20 = vpop.f32.mrf.mxu1 }
 0x432   : > { %v3661_v53 = vadd.f32 %v3660_v20, %v3632_v32  ;;  %v6150_v32 = vld [vmem:[%s7878_s7 + $0x128] sm:$0xff] }
 0x433   : > { %4300 = vmatpush.bf16.msrb.mxu2 %v6150_v32 }
 0x435   : > { %v3687_v27 = vpop.f32.mrf.mxu2 }
 0x436   : > { %v3688_v24 = vadd.f32 %v3687_v27, %v3659_v26  ;;  %v6131_v26 = vld [vmem:[%s7878_s7 + $0x90] sm:$0xff]  ;;  %v3639_v27 = vpop.f32.mrf.mxu3 }
 0x437   : > { %v3717_v28 = vld [vmem:[#allocation9 + $0x1] sm:$0xff]  ;;  %4267 = vmatpush.bf16.msra.mxu0 %v6131_v26 }
 0x438   : > { %v3724_v29 = vmax.f32 %v3683_v49, %v3717_v28  ;;  %3704 = vst [vmem:[#allocation9 + $0x10] sm:$0xff] %v3688_v24  ;;  %v3731_v30 = vld [vmem:[#allocation9 + $0x2] sm:$0xff] }
 0x439   : > { %v3745_v0 = vld [vmem:[#allocation9 + $0x3] sm:$0xff]  ;;  %v3663_v34 = vpop.f32.mrf.mxu1 }
 0x43a   : > { %v3738_v33 = vmax.f32 %v3724_v29, %v3731_v30  ;;  %v3759_v38 = vld [vmem:[#allocation9 + $0x4] sm:$0xff]  ;;  %v3664_v62 = vadd.f32 %v3663_v34, %v3635_v15 }
 0x43b   : > { %v6142_v34 = vld [vmem:[%s7878_s7 + $0xe8] sm:$0xff]  ;;  %4268 = vmatpush.bf16.msra.mxu0 %v6130_v35  ;;  %v6124_v35 = vld [vmem:[%s7878_s7 + $0x58] sm:$0xff] }
 0x43c   : > { %v3752_v36 = vmax.f32 %v3738_v33, %v3745_v0  ;;  %v3640_v33 = vadd.f32 %v3639_v27, %v3611_v22  ;;  %4282 = vmatpush.bf16.msrb.mxu1 %v6142_v34  ;;  %v6145_v27 = vld [vmem:[%s7878_s7 + $0x100] sm:$0xff] }
 0x43d   : > { %v3689_v39 = vpop.f32.mrf.mxu2 }
 0x43e   : > { %v3766_v37 = vmax.f32 %v3752_v36, %v3759_v38  ;;  %v7644_v45 = vadd.f32 %v3689_v39, %v3661_v53  ;;  %v3584_v53 = vadd.f32 %v7620_v55, %v7616_v56  ;;  %v3641_v42 = vpop.f32.mrf.mxu3 }
 0x43f   : > { %v3718_v46 = vld [vmem:[#allocation9 + $0x9] sm:$0xff] }
 0x440   : > { %3773 = vst [vmem:[#allocation9] sm:$0xff] %v3766_v37  ;;  %v3725_v47 = vmax.f32 %v3685_v19, %v3718_v46  ;;  %v3732_v1 = vld [vmem:[#allocation9 + $0xa] sm:$0xff]  ;;  %v6149_v46 = vld [vmem:[%s7878_s7 + $0x120] sm:$0xff]  ;;  %v3613_v56 = vadd.f32 %v7623_v61, %v3584_v53  ;;  %4283 = vmatpush.bf16.msrb.mxu1 %v6141_v44 }
 0x441   : > { %3705 = vst [vmem:[#allocation9 + $0x18] sm:$0xff] %v7644_v45  ;;  %v3746_v51 = vld [vmem:[#allocation9 + $0xb] sm:$0xff]  ;;  %v3665_v2 = vpop.f32.mrf.mxu1  ;;  %4301 = vmatpush.bf16.msrb.mxu2 %v6149_v46 }
 0x442   : > { %v3739_v50 = vmax.f32 %v3725_v47, %v3732_v1  ;;  %v3760_v63 = vld [vmem:[#allocation9 + $0xc] sm:$0xff]  ;;  %v3666_v60 = vadd.f32 %v3665_v2, %v3637_v9  ;;  %v6129_v47 = vld [vmem:[%s7878_s7 + $0x80] sm:$0xff]  ;;  %v6140_v2 = vld [vmem:[%s7878_s7 + $0xd8] sm:$0xff] }
 0x443   : > { %v6114_v19 = vld [vmem:[%s7878_s7 + $0x8] sm:$0xff]  ;;  %4269 = vmatpush.bf16.msra.mxu0 %v6129_v47 }
 0x444   : > { %v3753_v58 = vmax.f32 %v3739_v50, %v3746_v51  ;;  %4232 = vmatpush.bf16.msrb.mxu3 %v6114_v19  ;;  %v6126_v51 = vld [vmem:[%s7878_s7 + $0x68] sm:$0xff]  ;;  %4284 = vmatpush.bf16.msrb.mxu1 %v6140_v2  ;;  %v3824_v2 = vld [vmem:[#allocation11 + $0x30] sm:$0xf] }
 0x445   : > { %v3692_v43 = vpop.f32.mrf.mxu2  ;;  %v6122_v46 = vld [vmem:[%s7878_s7 + $0x48] sm:$0xff] }
 0x446   : > { %v3767_v5 = vmax.f32 %v3753_v58, %v3760_v63  ;;  %v7659_v7 = vadd.f32 %v3692_v43, %v3664_v62  ;;  %v6148_v58 = vld [vmem:[%s7878_s7 + $0x118] sm:$0xff]  ;;  %v3642_v62 = vadd.f32 %v3641_v42, %v3613_v56  ;;  %v6121_v56 = vld [vmem:[%s7878_s7 + $0x40] sm:$0xff] }
 0x447   : > { %4302 = vmatpush.bf16.msrb.mxu2 %v6148_v58  ;;  %v3813_v58 = vld [vmem:[#allocation11 + $0x2c] sm:$0xf] }
 0x448   : > { %3774 = vst [vmem:[#allocation9 + $0x8] sm:$0xff] %v3767_v5  ;;  %v3719_v6 = vld [vmem:[#allocation9 + $0x11] sm:$0xff]  ;;  %4233 = vmatpush.bf16.msrb.mxu3 %v6113_v57  ;;  %v6125_v5 = vld [vmem:[%s7878_s7 + $0x60] sm:$0xff] }
 0x449   : > { %v3726_v49 = vmax.f32 %v3688_v24, %v3719_v6  ;;  %3706 = vst [vmem:[#allocation9 + $0x20] sm:$0xff] %v7659_v7  ;;  %v3733_v10 = vld [vmem:[#allocation9 + $0x12] sm:$0xff]  ;;  %v3668_v24 = vpop.f32.mrf.mxu1  ;;  %v6137_v57 = vld [vmem:[%s7878_s7 + $0xc0] sm:$0xff] }
 0x44a   : > { %v3747_v18 = vld [vmem:[#allocation9 + $0x13] sm:$0xff]  ;;  %v3669_v39 = vadd.f32 %v3668_v24, %v3640_v33 }
 0x44b   : > { %v3740_v11 = vmax.f32 %v3726_v49, %v3733_v10  ;;  %v3761_v23 = vld [vmem:[#allocation9 + $0x14] sm:$0xff] }
 0x44c   : > { %4244 = vmatpush.bf16.msra.mxu3 %v6128_v13  ;;  %v6147_v49 = vld [vmem:[%s7878_s7 + $0x110] sm:$0xff] }
 0x44d   : > { %v3754_v20 = vmax.f32 %v3740_v11, %v3747_v18  ;;  %v3694_v21 = vpop.f32.mrf.mxu2  ;;  %v6139_v10 = vld [vmem:[%s7878_s7 + $0xd0] sm:$0xff]  ;;  %4303 = vmatpush.bf16.msrb.mxu2 %v6147_v49 }
 0x44e   : > { %v7683_v25 = vadd.f32 %v3694_v21, %v3666_v60  ;;  %v6146_v60 = vld [vmem:[%s7878_s7 + $0x108] sm:$0xff]  ;;  %4285 = vmatpush.bf16.msrb.mxu1 %v6139_v10 }
 0x44f   : > { %v3768_v41 = vmax.f32 %v3754_v20, %v3761_v23  ;;  %v3780_v28 = vld [vmem:[#allocation9] ss:$2 sm:$0xff] }
 0x450   : > { %v3720_v29 = vld [vmem:[#allocation9 + $0x19] sm:$0xff]  ;;  %3707 = vst [vmem:[#allocation9 + $0x28] sm:$0xff] %v7683_v25  ;;  %v3794_v30 = vpack.c.bf16 %v3780_v28, %v3780_v28  ;;  %4245 = vmatpush.bf16.msra.mxu3 %v6127_v40  ;;  %v6123_v40 = vld [vmem:[%s7878_s7 + $0x50] sm:$0xff] }
 0x451   : > { %3775 = vst [vmem:[#allocation9 + $0x10] sm:$0xff] %v3768_v41  ;;  %v3727_v31 = vmax.f32 %v7644_v45, %v3720_v29  ;;  %v3734_v0 = vld [vmem:[#allocation9 + $0x1a] sm:$0xff]  ;;  %v3670_v59 = vpop.f32.mrf.mxu1  ;;  %4304 = vmatpush.bf16.msrb.mxu2 %v6146_v60 }
 0x452   : > { %3787 = vst [vmem:[#allocation10] sm:$0xff] %v3780_v28  ;;  %v3748_v38 = vld [vmem:[#allocation9 + $0x1b] sm:$0xff]  ;;  %v3671_v4 = vadd.f32 %v3670_v59, %v3642_v62  ;;  %4286 = vmatpush.bf16.msrb.mxu1 %v6138_v8 }
 0x453   : > { %v3741_v36 = vmax.f32 %v3727_v31, %v3734_v0  ;;  %3797 = vst [vmem:[#allocation11] sm:$0xf] %v3794_v30  ;;  %v3762_v55 = vld [vmem:[#allocation9 + $0x1c] sm:$0xff] }
 0x454   : > { %4246 = vmatpush.bf16.msra.mxu3 %v6126_v51 }
 0x455   : > { %v3755_v37 = vmax.f32 %v3741_v36, %v3748_v38  ;;  %v3697_v45 = vpop.f32.mrf.mxu2  ;;  %4305 = vmatpush.bf16.msrb.mxu2 %v6145_v27 }
 0x456   : > { %v3698_v48 = vadd.f32 %v3697_v45, %v3669_v39  ;;  %4287 = vmatpush.bf16.msrb.mxu1 %v6137_v57 }
 0x457   : > { %v3769_v1 = vmax.f32 %v3755_v37, %v3762_v55  ;;  %v3721_v15 = vld [vmem:[#allocation9 + $0x21] sm:$0xff] }
 0x458   : > { %v3728_v50 = vmax.f32 %v7659_v7, %v3721_v15  ;;  %3708 = vst [vmem:[#allocation9 + $0x30] sm:$0xff] %v3698_v48  ;;  %v3735_v61 = vld [vmem:[#allocation9 + $0x22] sm:$0xff]  ;;  %4247 = vmatpush.bf16.msra.mxu3 %v6125_v5 }
 0x459   : > { %3776 = vst [vmem:[#allocation9 + $0x18] sm:$0xff] %v3769_v1  ;;  %v3749_v43 = vld [vmem:[#allocation9 + $0x23] sm:$0xff] }
 0x45a   : > { %v3742_v63 = vmax.f32 %v3728_v50, %v3735_v61  ;;  %v3763_v7 = vld [vmem:[#allocation9 + $0x24] sm:$0xff]  ;;  %v5692_v36 = vld [vmem:[#allocation11] sm:$0xf] }
 0x45b   : > { %v3802_v48 = vld [vmem:[#allocation11 + $0x28] sm:$0xf] }
 0x45c   : > { %v3756_v3 = vmax.f32 %v3742_v63, %v3749_v43  ;;  %4248 = vmatpush.bf16.msra.mxu3 %v6124_v35  ;;  %v3835_v43 = vld [vmem:[#allocation11 + $0x34] sm:$0xf] }
 0x45d   : > { %v3699_v6 = vpop.f32.mrf.mxu2 }
 0x45e   : > { %v3770_v16 = vmax.f32 %v3756_v3, %v3763_v7  ;;  %v3700_v9 = vadd.f32 %v3699_v6, %v3671_v4  ;;  %v3846_v3 = vld [vmem:[#allocation11 + $0x38] sm:$0xf] }
 0x45f   : > { %v3716_v11 = vld [vmem:[#allocation9 + $0x30] sm:$0x1f] }
 0x460   : > { %v3722_v54 = vld [vmem:[#allocation9 + $0x29] sm:$0xff]  ;;  %v3723_v12 = vld [vmem:[#allocation9 + $0x31] sm:$0x1f]  ;;  %3777 = vst [vmem:[#allocation9 + $0x20] sm:$0xff] %v3770_v16  ;;  %4249 = vmatpush.bf16.msra.mxu3 %v6123_v40 }
 0x461   : > { %v3729_v14 = vmax.f32 %v7683_v25, %v3722_v54  ;;  %v3730_v17 = vmax.f32 %v3716_v11, %v3723_v12  ;;  %v3736_v18 = vld [vmem:[#allocation9 + $0x2a] sm:$0xff]  ;;  %3709 = vst [vmem:[#allocation9 + $0x38] sm:$0x1] %v3700_v9  ;;  %v3737_v19 = vld [vmem:[#allocation9 + $0x32] sm:$0x1f] }
 0x462   : > { %v3782_v21 = vld [vmem:[#allocation9 + $0x10] ss:$2 sm:$0xff] }
 0x463   : > { %v3743_v20 = vmax.f32 %v3729_v14, %v3736_v18  ;;  %v3744_v22 = vmax.f32 %v3730_v17, %v3737_v19  ;;  %v3750_v23 = vld [vmem:[#allocation9 + $0x2b] sm:$0xff]  ;;  %3788 = vst [vmem:[#allocation10 + $0x8] sm:$0xff] %v3782_v21  ;;  %v3795_v25 = vpack.c.bf16 %v3782_v21, %v3782_v21  ;;  %v3751_v41 = vld [vmem:[#allocation9 + $0x33] sm:$0x1f] }
 0x464   : > { %v3764_v26 = vld [vmem:[#allocation9 + $0x2c] sm:$0xff]  ;;  %4250 = vmatpush.bf16.msra.mxu3 %v6122_v46 }
 0x465   : > { %v3757_v52 = vmax.f32 %v3743_v20, %v3750_v23  ;;  %3798 = vst [vmem:[#allocation11 + $0x14] sm:$0xf] %v3795_v25  ;;  %v3758_v28 = vmax.f32 %v3744_v22, %v3751_v41 }
 0x467   : > { %v3771_v24 = vmax.f32 %v3757_v52, %v3764_v26 }
 0x468   : > { %v3765_v29 = vld [vmem:[#allocation9 + $0x34] sm:$0x1f]  ;;  %4251 = vmatpush.bf16.msra.mxu3 %v6121_v56 }
 0x469   : > { %3778 = vst [vmem:[#allocation9 + $0x28] sm:$0xff] %v3771_v24  ;;  %v3772_v30 = vmax.f32 %v3758_v28, %v3765_v29 }
 0x46a   : > { %v3816_v31 = vld [vmem:[#allocation10 + $0x2] sm:$0xff] }
 0x46b   : > { %v3827_v32 = vld [vmem:[#allocation10 + $0x3] sm:$0xff]  ;;  %3779 = vst [vmem:[#allocation9 + $0x30] sm:$0x1f] %v3772_v30  ;;  %v3819_v33 = vpack.c.bf16 %v3816_v31, %v3816_v31 }
 0x46c   : > { %v3838_v13 = vld [vmem:[#allocation10 + $0x4] sm:$0xff]  ;;  %v3830_v0 = vpack.c.bf16 %v3827_v32, %v3827_v32  ;;  %v6110_v53 = vld [vmem:[#allocation11 + $0x10] sm:$0xf0] }
 0x46d   : > { %v3841_v34 = vpack.c.bf16 %v3838_v13, %v3838_v13  ;;  %v3805_v38 = vld [vmem:[#allocation10 + $0x1] sm:$0xff]  ;;  %v5693_v39 = vor.u32 %v6110_v53, %v5692_v36  ;;  %3822 = vst [vmem:[#allocation11 + $0x8] sm:$0xf] %v3819_v33 }
 0x46e   : > { %v3808_v37 = vpack.c.bf16 %v3805_v38, %v3805_v38  ;;  %3833 = vst [vmem:[#allocation11 + $0xc] sm:$0xf] %v3830_v0 }
 0x46f   : > { %4234 = vmatmul.bf16.vlgmr.msrb.gmra.mxu3 %v5693_v39  ;;  %3844 = vst [vmem:[#allocation11 + $0x10] sm:$0xf] %v3841_v34 }
 0x470   : > { %v3784_v45 = vld [vmem:[#allocation9 + $0x20] ss:$2 sm:$0xff]  ;;  %3811 = vst [vmem:[#allocation11 + $0x4] sm:$0xf] %v3808_v37 }
 0x471   : > { %3789 = vst [vmem:[#allocation10 + $0x10] sm:$0xff] %v3784_v45 }
 0x472   : > { %v3786_v47 = vld [vmem:[#allocation9 + $0x30] ss:$2 sm:$0x7] }
 0x473   : > { %3790 = vst [vmem:[#allocation10 + $0x18] sm:$0x7] %v3786_v47 }
 0x474   : > { %v5700_v18 = vld [vmem:[#allocation11 + $0x8] sm:$0xf] }
 0x475   : > { %v6109_v20 = vld [vmem:[#allocation11 + $0xc] sm:$0xf] }
 0x476   : > { %v5708_v22 = vld [vmem:[#allocation11 + $0x10] sm:$0xf] }
 0x477   : > { %v6108_v33 = vld [vmem:[#allocation11 + $0x4] sm:$0xf] }
 0x478   : > { %v3817_v44 = vld [vmem:[#allocation10 + $0xa] sm:$0xff] }
 0x479   : > { %v3828_v1 = vld [vmem:[#allocation10 + $0xb] sm:$0xff]  ;;  %v3820_v50 = vpack.c.bf16 %v3817_v44, %v3817_v44  ;;  %v6329_v44 = vld [vmem:[#allocation23] ss:$0 sm:$0xff] }
 0x47a   : > { %v3839_v15 = vld [vmem:[#allocation10 + $0xc] sm:$0xff]  ;;  %v3831_v51 = vpack.c.bf16 %v3828_v1, %v3828_v1  ;;  %v3840_v9 = vld [vmem:[#allocation10 + $0x14] sm:$0x7f] }
 0x47b   : > { %v3842_v42 = vpack.c.bf16 %v3839_v15, %v3839_v15  ;;  %v3793_v61 = vld [vmem:[#allocation10 + $0x10] sm:$0x7f]  ;;  %3823 = vst [vmem:[#allocation11 + $0x1c] sm:$0xf] %v3820_v50  ;;  %v3843_v11 = vpack.c.bf16 %v3840_v9, %v3840_v9 }
 0x47c   : > { %v3807_v59 = vld [vmem:[#allocation10 + $0x11] sm:$0x7f]  ;;  %v3796_v62 = vpack.c.bf16 %v3793_v61, %v3793_v61  ;;  %3834 = vst [vmem:[#allocation11 + $0x20] sm:$0xf] %v3831_v51  ;;  %v3806_v10 = vld [vmem:[#allocation10 + $0x9] sm:$0xff] }
 0x47d   : > { %v3810_v63 = vpack.c.bf16 %v3807_v59, %v3807_v59  ;;  %v3818_v4 = vld [vmem:[#allocation10 + $0x12] sm:$0x7f]  ;;  %3845 = vst [vmem:[#allocation11 + $0x24] sm:$0xf] %v3842_v42  ;;  %v3847_v14 = vsel %vm7768_vm7, %v3843_v11, %v3846_v3  ;;  %v3809_v17 = vpack.c.bf16 %v3806_v10, %v3806_v10 }
 0x47e   : > { %v3829_v5 = vld [vmem:[#allocation10 + $0x13] sm:$0x7f]  ;;  %v3803_v7 = vsel %vm7768_vm7, %v3796_v62, %v3802_v48  ;;  %v3821_v49 = vpack.c.bf16 %v3818_v4, %v3818_v4  ;;  %3848 = vst [vmem:[#allocation11 + $0x38] sm:$0xf] %v3847_v14 }
 0x47f   : > { %v3814_v6 = vsel %vm7768_vm7, %v3810_v63, %v3813_v58  ;;  %v3832_v16 = vpack.c.bf16 %v3829_v5, %v3829_v5  ;;  %3804 = vst [vmem:[#allocation11 + $0x28] sm:$0xf] %v3803_v7  ;;  %v6153_v4 = vld [vmem:[#allocation25] sm:$0xff]  ;;  %v6155_v5 = vld [vmem:[#allocation25 + $0x10] sm:$0xff]  ;;  %v6156_v7 = vld [vmem:[#allocation25 + $0x18] sm:$0xff] }
 0x480   : > { %v3825_v54 = vsel %vm7768_vm7, %v3821_v49, %v3824_v2  ;;  %3815 = vst [vmem:[#allocation11 + $0x2c] sm:$0xf] %v3814_v6  ;;  %v6157_v49 = vld [vmem:[#allocation25 + $0x20] sm:$0xff]  ;;  %4376 = vmatpush.bf16.msrb.mxu3 %v6153_v4  ;;  %4432 = vmatpush.bf16.msrb.mxu0 %v6155_v5 }
 0x481   : > { %v3836_v12 = vsel %vm7768_vm7, %v3832_v16, %v3835_v43  ;;  %3826 = vst [vmem:[#allocation11 + $0x30] sm:$0xf] %v3825_v54  ;;  %4460 = vmatpush.bf16.msra.mxu1 %v6156_v7  ;;  %4488 = vmatpush.bf16.msra.mxu2 %v6157_v49 }
 0x482   : > { %3837 = vst [vmem:[#allocation11 + $0x34] sm:$0xf] %v3836_v12  ;;  %v6111_v60 = vld [vmem:[#allocation11 + $0x18] sm:$0xf0] }
 0x483   : > { %v5701_v19 = vor.u32 %v6111_v60, %v5700_v18  ;;  %v5702_v21 = vld [vmem:[#allocation11 + $0x1c] sm:$0xf0]  ;;  %3812 = vst [vmem:[#allocation11 + $0x18] sm:$0xf] %v3809_v17 }
 0x484   : > { %v5705_v8 = vor.u32 %v6109_v20, %v5702_v21  ;;  %v6112_v23 = vld [vmem:[#allocation11 + $0x20] sm:$0xf0] }
 0x485   : > { %4270 = vmatmul.bf16.vlgmr.msra.gmra.mxu0 %v5701_v19  ;;  %v5709_v25 = vor.u32 %v6112_v23, %v5708_v22  ;;  %v3857_v24 = vld [vmem:[#allocation11 + $0x38] sm:$0xf]  ;;  %v6159_v23 = vld [vmem:[#allocation25 + $0x30] sm:$0xff] }
 0x486   : > { %4288 = vmatmul.bf16.vlgmr.msrb.gmra.mxu1 %v5705_v8  ;;  %v3965_v29 = vunpack.c.l.b16 %v3857_v24  ;;  %v6154_v22 = vld [vmem:[#allocation25 + $0x8] sm:$0xff]  ;;  %4544 = vmatpush.bf16.msra.mxu0 %v6159_v23  ;;  %v4354_v23 = vld [vmem:[#allocation26] sm:$0x1] }
 0x487   : > { %v3855_v52 = vld [vmem:[#allocation11 + $0x28] sm:$0xff]  ;;  %4306 = vmatmul.bf16.vlgmr.msrb.gmra.mxu2 %v5709_v25 }
 0x488   : > { %v3961_v26 = vunpack.c.l.b16 %v3855_v52  ;;  %v3975_v32 = vpack.c.b16 %v3965_v29, %v3965_v29  ;;  %v3962_v34 = vunpack.c.h.b16 %v3855_v52  ;;  %v6160_v25 = vld [vmem:[#allocation25 + $0x38] sm:$0xff]  ;;  %v6161_v52 = vld [vmem:[#allocation25 + $0x40] sm:$0xff] }
 0x489   : > { %v3856_v41 = vld [vmem:[#allocation11 + $0x30] sm:$0xff]  ;;  %4572 = vmatpush.bf16.msrb.mxu1 %v6160_v25  ;;  %4600 = vmatpush.bf16.msrb.mxu2 %v6161_v52 }
 0x48a   : > { %v3971_v27 = vpack.c.b16 %v3961_v26, %v3961_v26  ;;  %v3963_v57 = vunpack.c.l.b16 %v3856_v41  ;;  %v3964_v28 = vunpack.c.h.b16 %v3856_v41  ;;  %v5694_v13 = vld [vmem:[#allocation11 + $0x14] sm:$0xf0]  ;;  %v3972_v35 = vpack.c.b16 %v3962_v34, %v3962_v34 }
 0x48b   : > { %v5697_v0 = vor.u32 %v6108_v33, %v5694_v13 }
 0x48c   : > { %4239 = vmatmul.bf16.gmra.mxu3 %v3971_v27  ;;  %v3973_v30 = vpack.c.b16 %v3963_v57, %v3963_v57  ;;  %v3974_v31 = vpack.c.b16 %v3964_v28, %v3964_v28 }
 0x495   : > { %4275 = vmatmul.bf16.gmra.mxu0 %v3973_v30 }
 0x496   : > { %4293 = vmatmul.bf16.gmra.mxu1 %v3974_v31 }
 0x497   : > { %4311 = vmatmul.bf16.gmra.mxu2 %v3975_v32 }
 0x49c   : > { %4252 = vmatmul.bf16.vlgmr.msra.gmra.mxu3 %v5697_v0 }
 0x49d   : > { %4404 = vmatpush.bf16.msra.mxu3 %v6154_v22  ;;  %v4636_v22 = vld [vmem:[%s7882_s11 + $0x8] sm:$0xff] }
 0x4ac   : > { %4257 = vmatmul.bf16.gmra.mxu3 %v3972_v35 }
 0x4f2   : > { %v4235_v36 = vpop.f32.mrf.mxu3 }
 0x4f3   : > { %v4236_v51 = vadd.f32 %v6329_v44, %v4235_v36 }
 0x4fa   : > { %v4237_v39 = vpop.f32.mrf.mxu3 }
 0x4fb   : > { %v4238_v63 = vadd.f32 %v6329_v44, %v4237_v39 }
 0x502   : > { %v4271_v53 = vpop.f32.mrf.mxu0 }
 0x503   : > { %v4289_v38 = vpop.f32.mrf.mxu1 }
 0x50a   : > { %v4307_v40 = vpop.f32.mrf.mxu2  ;;  %v4273_v37 = vpop.f32.mrf.mxu0 }
 0x50b   : > { %v4291_v45 = vpop.f32.mrf.mxu1 }
 0x50f   : > { %v4240_v46 = vpop.f32.mrf.mxu3 }
 0x510   : > { %v4241_v9 = vadd.f32 %v6329_v44, %v4240_v46 }
 0x512   : > { %v4309_v47 = vpop.f32.mrf.mxu2  ;;  %v4276_v56 = vpop.f32.mrf.mxu0 }
 0x513   : > { %v4294_v55 = vpop.f32.mrf.mxu1 }
 0x517   : > { %v4242_v48 = vpop.f32.mrf.mxu3 }
 0x51a   : > { %v4312_v1 = vpop.f32.mrf.mxu2  ;;  %v4278_v15 = vpop.f32.mrf.mxu0 }
 0x51b   : > { %v4296_v50 = vpop.f32.mrf.mxu1  ;;  %v6158_v15 = vld [vmem:[#allocation25 + $0x28] sm:$0xff] }
 0x51f   : > { %v4253_v42 = vpop.f32.mrf.mxu3 }
 0x520   : > { %v4254_v61 = vadd.f32 %v4253_v42, %v4236_v51 }
 0x522   : > { %v4272_v59 = vadd.f32 %v4271_v53, %v4254_v61  ;;  %v4314_v58 = vpop.f32.mrf.mxu2 }
 0x524   : > { %v4290_v62 = vadd.f32 %v4289_v38, %v4272_v59 }
 0x526   : > { %v4308_v2 = vadd.f32 %v4307_v40, %v4290_v62 }
 0x527   : > { %v4255_v43 = vpop.f32.mrf.mxu3 }
 0x528   : > { %4316 = vst [vmem:[#allocation12] sm:$0xff] %v4308_v2  ;;  %v4256_v3 = vadd.f32 %v4255_v43, %v4238_v63  ;;  %v6162_v63 = vld [vmem:[#allocation25 + $0x48] sm:$0xff] }
 0x52a   : > { %v4274_v6 = vadd.f32 %v4273_v37, %v4256_v3 }
 0x52c   : > { %v4292_v16 = vadd.f32 %v4291_v45, %v4274_v6 }
 0x52e   : > { %v4310_v10 = vadd.f32 %v4309_v47, %v4292_v16 }
 0x52f   : > { %v4258_v11 = vpop.f32.mrf.mxu3 }
 0x530   : > { %4317 = vst [vmem:[#allocation12 + $0x8] sm:$0xff] %v4310_v10  ;;  %v4259_v54 = vadd.f32 %v4258_v11, %v4241_v9 }
 0x532   : > { %v4277_v12 = vadd.f32 %v4276_v56, %v4259_v54  ;;  %v4642_v54 = vld [vmem:[%s7882_s11 + $0x38] sm:$0xff] }
 0x534   : > { %v4295_v14 = vadd.f32 %v4294_v55, %v4277_v12  ;;  %v4641_v12 = vld [vmem:[%s7882_s11 + $0x30] sm:$0xff] }
 0x536   : > { %v4313_v17 = vadd.f32 %v4312_v1, %v4295_v14  ;;  %v4640_v14 = vld [vmem:[%s7882_s11 + $0x28] sm:$0xff] }
 0x537   : > { %v4322_v18 = vld [vmem:[#allocation12 + $0x1] sm:$0xff]  ;;  %v4260_v60 = vpop.f32.mrf.mxu3 }
 0x538   : > { %v4325_v19 = vmax.f32 %v4308_v2, %v4322_v18  ;;  %4318 = vst [vmem:[#allocation12 + $0x10] sm:$0x7f] %v4313_v17  ;;  %v4328_v20 = vld [vmem:[#allocation12 + $0x2] sm:$0xff] }
 0x539   : > { %v4334_v8 = vld [vmem:[#allocation12 + $0x3] sm:$0xff] }
 0x53a   : > { %v4331_v21 = vmax.f32 %v4325_v19, %v4328_v20  ;;  %v4340_v27 = vld [vmem:[#allocation12 + $0x4] sm:$0xff]  ;;  %v4638_v19 = vld [vmem:[%s7882_s11 + $0x18] sm:$0xff] }
 0x53b   : > { %v4639_v18 = vld [vmem:[%s7882_s11 + $0x20] sm:$0xff] }
 0x53c   : > { %v4337_v26 = vmax.f32 %v4331_v21, %v4334_v8  ;;  %v4637_v8 = vld [vmem:[%s7882_s11 + $0x10] sm:$0xff] }
 0x53e   : > { %v4343_v41 = vmax.f32 %v4337_v26, %v4340_v27  ;;  %v4635_v26 = vld [vmem:[%s7882_s11] sm:$0xff] }
 0x53f   : > { %v4321_v24 = vld [vmem:[#allocation12 + $0x10] sm:$0x7]  ;;  %v4336_v34 = vld [vmem:[#allocation12 + $0x13] sm:$0x7] }
 0x540   : > { %v4323_v57 = vld [vmem:[#allocation12 + $0x9] sm:$0xff]  ;;  %v4324_v28 = vld [vmem:[#allocation12 + $0x11] sm:$0x7]  ;;  %4346 = vst [vmem:[#allocation12] sm:$0xff] %v4343_v41  ;;  %v4342_v38 = vld [vmem:[#allocation12 + $0x14] sm:$0x7] }
 0x541   : > { %v4326_v29 = vmax.f32 %v4310_v10, %v4323_v57  ;;  %v4327_v30 = vmax.f32 %v4321_v24, %v4324_v28  ;;  %v4329_v31 = vld [vmem:[#allocation12 + $0xa] sm:$0xff]  ;;  %v4330_v32 = vld [vmem:[#allocation12 + $0x12] sm:$0x7] }
 0x542   : > { %v4335_v0 = vld [vmem:[#allocation12 + $0xb] sm:$0xff] }
 0x543   : > { %v4332_v13 = vmax.f32 %v4326_v29, %v4329_v31  ;;  %v4333_v33 = vmax.f32 %v4327_v30, %v4330_v32  ;;  %v4341_v53 = vld [vmem:[#allocation12 + $0xc] sm:$0xff]  ;;  %v4671_v29 = vld [vmem:[%s7884_s13 + $0x18] sm:$0xff]  ;;  %v4670_v30 = vld [vmem:[%s7884_s13 + $0x10] sm:$0xff] }
 0x545   : > { %v4338_v35 = vmax.f32 %v4332_v13, %v4335_v0  ;;  %v4339_v36 = vmax.f32 %v4333_v33, %v4336_v34  ;;  %v4669_v13 = vld [vmem:[%s7884_s13 + $0x8] sm:$0xff]  ;;  %v4668_v33 = vld [vmem:[%s7884_s13] sm:$0xff] }
 0x547   : > { %v4344_v39 = vmax.f32 %v4338_v35, %v4341_v53  ;;  %v4345_v40 = vmax.f32 %v4339_v36, %v4342_v38 }
 0x549   : > { %4347 = vst [vmem:[#allocation12 + $0x8] sm:$0xff] %v4344_v39 }
 0x54a   : > { %4348 = vst [vmem:[#allocation12 + $0x10] sm:$0x7] %v4345_v40 }
 0x550   : > { %v4349_v37 = vld [vmem:[#allocation12] ss:$2 sm:$0xff] }
 0x551   : > { %4352 = vst [vmem:[#allocation13] sm:$0xff] %v4349_v37  ;;  %v4351_v45 = vld [vmem:[#allocation12 + $0x10] ss:$2 sm:$0x3] }
 0x552   : > { %4353 = vst [vmem:[#allocation13 + $0x8] sm:$0x3] %v4351_v45 }
 0x558   : > { %v4355_v46 = vld [vmem:[#allocation13] sm:$0x1]  ;;  %v4411_v47 = vld [vmem:[#allocation13 + $0x2] sm:$0x1]  ;;  %v4439_v56 = vld [vmem:[#allocation13 + $0x3] sm:$0x1] }
 0x559   : > { %v4356_v55 = vpack.c.bf16 %v4355_v46, %v4355_v46  ;;  %v4412_v48 = vpack.c.bf16 %v4411_v47, %v4411_v47  ;;  %v4440_v44 = vpack.c.bf16 %v4439_v56, %v4439_v56  ;;  %v4467_v1 = vld [vmem:[#allocation13 + $0x4] sm:$0x1]  ;;  %v4383_v51 = vld [vmem:[#allocation13 + $0x1] sm:$0x1]  ;;  %v4523_v42 = vld [vmem:[#allocation13 + $0x6] sm:$0x1] }
 0x55a   : > { %v4468_v50 = vpack.c.bf16 %v4467_v1, %v4467_v1  ;;  %v4551_v61 = vld [vmem:[#allocation13 + $0x7] sm:$0x1]  ;;  %v4579_v59 = vld [vmem:[#allocation13 + $0x8] sm:$0x1]  ;;  %v4384_v58 = vpack.c.bf16 %v4383_v51, %v4383_v51  ;;  %v4524_v62 = vpack.c.bf16 %v4523_v42, %v4523_v42  ;;  %v4495_v3 = vld [vmem:[#allocation13 + $0x5] sm:$0x1] }
 0x55b   : > { %5874 = vmatmul.msk.bf16.vlgmr.msrb.gmra.mxu3 %vm4365_vm8, %v4356_v55  ;;  %5884 = vmatmul.msk.bf16.vlgmr.msrb.gmra.mxu0 %vm4365_vm8, %v4412_v48  ;;  %v4552_v2 = vpack.c.bf16 %v4551_v61, %v4551_v61  ;;  %v4580_v43 = vpack.c.bf16 %v4579_v59, %v4579_v59  ;;  %v4496_v4 = vpack.c.bf16 %v4495_v3, %v4495_v3  ;;  %v4607_v5 = vld [vmem:[#allocation13 + $0x9] sm:$0x1]  ;;  %v4698_v47 = vld [vmem:[%s7886_s15 + $0x8] sm:$0xff]  ;;  %v4697_v56 = vld [vmem:[%s7886_s15] sm:$0xff] }
 0x55c   : > { %5889 = vmatmul.msk.bf16.vlgmr.msra.gmra.mxu1 %vm4365_vm8, %v4440_v44  ;;  %5894 = vmatmul.msk.bf16.vlgmr.msra.gmra.mxu2 %vm4365_vm8, %v4468_v50  ;;  %v4608_v7 = vpack.c.bf16 %v4607_v5, %v4607_v5  ;;  %v4643_v55 = vld [vmem:[#allocation28] sm:$0x1]  ;;  %v4723_v1 = vld [vmem:[%s7888_s17] sm:$0xf] }
 0x55d   : > { %4516 = vmatpush.bf16.msrb.mxu3 %v6158_v15  ;;  %4656 = vmatpush.msrb.mxu0 %v4642_v54  ;;  %v4672_v15 = vld [vmem:[#allocation29] sm:$0x1]  ;;  %v4699_v42 = vld [vmem:[#allocation31] sm:$0x1] }
 0x55e   : > { %4689 = vmatpush.msra.mxu1 %v4671_v29  ;;  %4717 = vmatpush.msra.mxu2 %v4698_v47 }
 0x55f   : > { %4657 = vmatpush.msrb.mxu0 %v4641_v12 }
 0x560   : > { %4690 = vmatpush.msra.mxu1 %v4670_v30  ;;  %4718 = vmatpush.msra.mxu2 %v4697_v56 }
 0x561   : > { %4658 = vmatpush.msrb.mxu0 %v4640_v14 }
 0x562   : > { %4691 = vmatpush.msra.mxu1 %v4669_v13 }
 0x563   : > { %4659 = vmatpush.msrb.mxu0 %v4639_v18 }
 0x564   : > { %4692 = vmatpush.msra.mxu1 %v4668_v33 }
 0x565   : > { %4660 = vmatpush.msrb.mxu0 %v4638_v19 }
 0x567   : > { %4661 = vmatpush.msrb.mxu0 %v4637_v8 }
 0x569   : > { %4662 = vmatpush.msrb.mxu0 %v4636_v22 }
 0x56b   : > { %5879 = vmatmul.msk.bf16.vlgmr.msra.gmra.mxu3 %vm4365_vm8, %v4384_v58  ;;  %5904 = vmatmul.msk.bf16.vlgmr.msra.gmra.mxu0 %vm4365_vm8, %v4524_v62  ;;  %v4724_v58 = vld [vmem:[#allocation32] sm:$0x1] }
 0x56c   : > { %5909 = vmatmul.msk.bf16.vlgmr.msrb.gmra.mxu1 %vm4365_vm8, %v4552_v2  ;;  %5914 = vmatmul.msk.bf16.vlgmr.msrb.gmra.mxu2 %vm4365_vm8, %v4580_v43 }
 0x56d   : > { %4628 = vmatpush.bf16.msra.mxu3 %v6162_v63  ;;  %4663 = vmatpush.msrb.mxu0 %v4635_v26 }
 0x57b   : > { %5899 = vmatmul.msk.bf16.vlgmr.msrb.gmra.mxu3 %vm4365_vm8, %v4496_v4 }
 0x57c   : > { %5923 = vmatpush.msk.msrb.mxu3 %vm3799_vm5, %v4723_v1 }
 0x58b   : > { %5919 = vmatmul.msk.bf16.vlgmr.msra.gmra.mxu3 %vm4365_vm8, %v4608_v7 }
 0x5d8   : > { %v4434_v6 = vpop.f32.mrf.mxu0 }
 0x5d9   : > { %v4462_v49 = vpop.f32.mrf.mxu1 }
 0x5de   : > { %v4378_v16 = vpop.f32.mrf.mxu3 }
 0x5df   : > { %v4490_v9 = vpop.f32.mrf.mxu2  ;;  %v4382_v41 = vadd.f32 %v4378_v16, %v4354_v23 }
 0x5e0   : > { %v4436_v10 = vpop.f32.mrf.mxu0 }
 0x5e1   : > { %v4464_v11 = vpop.f32.mrf.mxu1 }
 0x5e6   : > { %v4380_v17 = vpop.f32.mrf.mxu3 }
 0x5e7   : > { %v4492_v60 = vpop.f32.mrf.mxu2 }
 0x5e8   : > { %v4546_v20 = vpop.f32.mrf.mxu0 }
 0x5e9   : > { %v4574_v21 = vpop.f32.mrf.mxu1 }
 0x5ee   : > { %v4406_v25 = vpop.f32.mrf.mxu3 }
 0x5ef   : > { %v4602_v52 = vpop.f32.mrf.mxu2  ;;  %v4410_v57 = vadd.f32 %v4406_v25, %v4382_v41 }
 0x5f0   : > { %v4548_v27 = vpop.f32.mrf.mxu0 }
 0x5f1   : > { %v4576_v24 = vpop.f32.mrf.mxu1  ;;  %v4438_v31 = vadd.f32 %v4434_v6, %v4410_v57 }
 0x5f3   : > { %v4466_v0 = vadd.f32 %v4462_v49, %v4438_v31 }
 0x5f5   : > { %v4494_v35 = vadd.f32 %v4490_v9, %v4466_v0 }
 0x5f6   : > { %v4408_v28 = vpop.f32.mrf.mxu3 }
 0x5f7   : > { %v4604_v32 = vpop.f32.mrf.mxu2 }
 0x5fe   : > { %v4518_v34 = vpop.f32.mrf.mxu3 }
 0x5ff   : > { %v4522_v36 = vadd.f32 %v4518_v34, %v4494_v35 }
 0x601   : > { %v4550_v53 = vadd.f32 %v4546_v20, %v4522_v36 }
 0x603   : > { %v4578_v39 = vadd.f32 %v4574_v21, %v4550_v53 }
 0x605   : > { %v4606_v40 = vadd.f32 %v4602_v52, %v4578_v39 }
 0x606   : > { %v4520_v38 = vpop.f32.mrf.mxu3 }
 0x60e   : > { %v4630_v37 = vpop.f32.mrf.mxu3 }
 0x60f   : > { %v4634_v45 = vadd.f32 %v4630_v37, %v4606_v40 }
 0x611   : > { %5920 = vmatmul.msk.f32.vlgmr.msrb.gmra.mxu0 %vm4644_vm9, %v4634_v45 }
 0x616   : > { %v4632_v46 = vpop.f32.mrf.mxu3 }
 0x68e   : > { %v4665_v48 = vpop.f32.mrf.mxu0 }
 0x68f   : > { %v4666_v44 = vadd.f32 %v4665_v48, %v4643_v55 }
 0x691   : > { %5921 = vmatmul.msk.f32.vlgmr.msra.gmra.mxu1 %vm4673_vm10, %v4666_v44 }
 0x70e   : > { %v4694_v50 = vpop.f32.mrf.mxu1 }
 0x70f   : > { %v4695_v51 = vadd.f32 %v4694_v50, %v4672_v15 }
 0x711   : > { %5922 = vmatmul.msk.f32.vlgmr.msra.gmra.mxu2 %vm4365_vm8, %v4695_v51 }
 0x794   : > { %v4720_v61 = vpop.f32.mrf.mxu2 }
 0x795   : > { %v4721_v59 = vadd.f32 %v4720_v61, %v4699_v42 }
 0x797   : > { %5924 = vmatmul.msk.f32.vlgmr.msrb.gmra.mxu3 %vm4725_vm11, %v4721_v59 }
 0x81a   : > { %v4750_v62 = vpop.f32.mrf.mxu3 }
 0x81b   : > { %v4751_v63 = vadd.f32 %v4750_v62, %v4724_v58 }
 0x81d   : > { %4754 = vst.msk [vmem:[%s775_s10] sm:$0x1] %vm4753_vm12, %v4751_v63 }
 0x81e   : > { %6718 = shalt.err (!%p6715_p8)
}
 0x81f   : > { %6211 = dma.vmem_to_hbm [thread:$0]  (%p6936_p5), %s4767_s23, 16, %s4769_s26, %s4756_s14  }
 0x820 PF: > { %s7934_s4 = sld [smem:[#allocation45_spill]] }
 0x821   : > { %s7935_s21 = sld [smem:[#allocation43_spill]] }
 0x826   : > { %p6278_p9 = scmp.ge.s32.totalorder %s7934_s4, 2 }
 0x827   : > { %s4780_s28 = sand.u32 1, %s7935_s21  }
 0x828   : > { %p6251_p10 = pnand %p6278_p9, %p6940_p6  ;;  %s4781_s0 = scalar_lea.sflag [#allocation16], %s4780_s28 }
 0x82a   : > { %p6252_p11 = pneg %p6251_p10 }
 0x82c   : > { %6764 = dma.done.wait (%p6252_p11), %s4781_s0, 16  }
 0x82d   : > { %6766 = vsyncadd (%p6252_p11), %s4781_s0, 4294967280  ;;  %s7937_s21 = sld [smem:[#allocation46_spill]]  ;;  %s7940_s0 = smov %s6773_s30 }
 0x82e   : > { %s7938_s22 = sld [smem:[#allocation44_spill]] }
 0x82f   : > { %s7939_s20 = sld [smem:[#allocation47_spill]] }
 0x833   : > { %p36_p12 = scmp.ge.s32.totalorder %s7937_s21, 4  }
 0x834   : > { %s7941_s30 = smov %s7938_s22 }
 0x835   :  { %38 = sbr.rel (!%p36_p12) target bundleno = 20 (0x14), region = 215 }
 0x83a   :  { %4786 = vsyncpa [#allocation15], 1 }
 0x83b   :  { %4788 = vsyncpa [#allocation15 + $0x1], 1 }
 0x83c   :  { %4789 = vsyncpa [#allocation18], 1 }
 0x83d   :  { %4790 = vsyncpa [#allocation21], 1 }
 0x83e   :  { %4791 = vsyncpa [#allocation24], 1 }
 0x83f   :  { %4792 = vsyncpa [#allocation27], 1 }
 0x840   :  { %4793 = vsyncpa [#allocation30], 1 }
 0x841   :  { %4794 = vsyncpa [#allocation33], 1 }
 0x842   :  { %4795 = vsyncpa [#allocation16], 1 }
 0x843   :  { %4797 = vsyncpa [#allocation16 + $0x1], 1 }

</bundles_post_ra>
